<compile_context>
chip_gen: v6e
topology: v6e:2x2x1
jax: 0.10.0
libtpu: 0.0.40
codegen_flags: <defaults>
</compile_context>

<pallas_src>
import functools

import jax
import jax.numpy as jnp
from jax import lax
from jax.experimental import pallas as pl
from jax.experimental.pallas import tpu as pltpu

_LANES = 128  # TPU vreg lane width; channel dims are zero-padded to this.


def _ceil_to(n, m):
    return ((n + m - 1) // m) * m


def _hardswish(x):
    # linear_hardswish: x * relu6(x + 3) / 6
    return x * jnp.clip(x + 3.0, 0.0, 6.0) * (1.0 / 6.0)


def _mv3_kernel(x_ref, w1_ref, b1_ref, dw_ref, b2_ref,
                fc1w_ref, fc1b_ref, fc2w_ref, fc2b_ref,
                w3_ref, b3_ref, o_ref,
                *, Bt, H, W, Cp, Hp, Op, use_res):
    f32 = jnp.float32
    bf16 = jnp.bfloat16
    HW = H * W
    N = Bt * HW                     # flattened pixel rows handled per step

    # ---- 1x1 expand conv (BN1 scale pre-folded into w1) + bias + hardswish.
    # bf16 operands, f32 accumulation on the MXU.  xb's live range ends at the
    # dot; the residual re-reads x_ref at the epilogue.
    xb = x_ref[...].reshape(N, Cp)                       # bf16 (N, Cp)
    h = jnp.dot(xb, w1_ref[...], preferred_element_type=f32)
    h = _hardswish(h + b1_ref[...])                      # (N, Hp) f32

    # ---- 3x3 depthwise conv, stride=1, pad=1 (BN2 scale folded into taps).
    # All four neighbour accesses are XLU rolls of the flattened pixel axis
    # with border masks built from a pixel-index iota.  Pixel p = b*HW + y*W+x,
    # so x-1/x+1 are shifts by +-1 and y-1/y+1 are shifts by +-W; modulo-HW
    # masks also stop leakage across images when Bt > 1.
    pix = lax.broadcasted_iota(jnp.int32, (N, 1), 0)
    at_left = (pix % W) == 0
    at_right = (pix % W) == (W - 1)
    at_top = (pix % HW) < W
    at_bottom = (pix % HW) >= (HW - W)

    def shift_pixels(v, delta, edge_mask):
        # out[p] = v[p - delta], zeroed where the shift crosses an image edge.
        rolled = pltpu.roll(v, shift=delta % N, axis=0)
        return jnp.where(edge_mask, 0.0, rolled)

    h_l = shift_pixels(h, 1, at_left)        # h[y, x-1]
    h_r = shift_pixels(h, -1, at_right)      # h[y, x+1]

    def hrow(ky):                            # horizontal 1x3 with filter row ky
        return (h_l * dw_ref[ky, 0, :][None, :]
                + h * dw_ref[ky, 1, :][None, :]
                + h_r * dw_ref[ky, 2, :][None, :])

    acc = hrow(1)                                        # from row y
    acc = acc + shift_pixels(hrow(0), W, at_top)         # from row y-1
    acc = acc + shift_pixels(hrow(2), -W, at_bottom)     # from row y+1
    hdw = _hardswish(acc + b2_ref[...])                  # (N, Hp) f32
    hb = hdw.astype(bf16)                                # MXU operand, reused twice

    # ---- Squeeze-and-Excite.  Per-image global mean as a tiny MXU matmul
    # against a block-diagonal 1/HW matrix (M=Bt); the two small FCs stay on
    # the VPU (broadcast-multiply + reduce), in f32.
    if Bt == 1:
        pool = jnp.full((1, N), 1.0 / HW, dtype=bf16)
    else:
        img_of_pix = lax.broadcasted_iota(jnp.int32, (Bt, N), 1) // HW
        img_idx = lax.broadcasted_iota(jnp.int32, (Bt, N), 0)
        pool = jnp.where(img_of_pix == img_idx, 1.0 / HW, 0.0).astype(bf16)
    y = jnp.dot(pool, hb, preferred_element_type=f32)            # (Bt, Hp)

    z = jnp.sum(y[:, None, :] * fc1w_ref[...][None, :, :], axis=-1) \
        + fc1b_ref[...]                                           # (Bt, red)
    z = jnp.clip(z, 0.0, 6.0)                                     # ReLU6
    z = jnp.sum(z[:, :, None] * fc2w_ref[...][None, :, :], axis=1) \
        + fc2b_ref[...]                                           # (Bt, Hp)
    gate = jnp.clip(z + 3.0, 0.0, 6.0) * (1.0 / 6.0)              # HardSigmoid

    if Bt == 1:
        hg = hb * gate.astype(bf16)                               # (N, Hp) bf16
    else:
        gate_rows = jnp.broadcast_to(gate.astype(bf16)[:, None, :],
                                     (Bt, HW, Hp)).reshape(N, Hp)
        hg = hb * gate_rows

    # ---- 1x1 project conv (BN3 scale pre-folded into w3) + bias (+ residual).
    out = jnp.dot(hg, w3_ref[...], preferred_element_type=f32) + b3_ref[...]
    if use_res:
        # Re-read x from VMEM here (f32 add of the bf16-stored input) instead
        # of keeping it live across the whole body.
        out = out + x_ref[...].reshape(N, Cp).astype(f32)
    o_ref[...] = out.astype(o_ref.dtype).reshape(Bt, H, W, Op)


def _fold_bn(gamma, beta, mean, var, eps=1e-5):
    scale = gamma / jnp.sqrt(var + eps)
    bias = beta - mean * scale
    return scale, bias


def prepare_mv3_weights(params):
    """Fold eval-mode BN into the conv weights once (off the hot path), pad all
    channel dims to multiples of 128 (lane-dense, full MXU tiles), and cast the
    MXU operands to bf16."""
    s1, b1 = _fold_bn(*params["bn1"])
    s2, b2 = _fold_bn(*params["bn2"])
    s3, b3 = _fold_bn(*params["bn3"])
    Cin, Hid = params["w1"].shape
    Cout = params["w3"].shape[1]
    red = params["fc1_w"].shape[0]
    Cp, Hp, Op = _ceil_to(Cin, _LANES), _ceil_to(Hid, _LANES), _ceil_to(Cout, _LANES)
    f32 = jnp.float32

    def pad2(a, r, c):
        return jnp.pad(a, ((0, r - a.shape[0]), (0, c - a.shape[1])))

    return {
        "w1": pad2(params["w1"] * s1[None, :], Cp, Hp).astype(jnp.bfloat16),
        "b1": pad2(b1.reshape(1, Hid), 1, Hp).astype(f32),
        "dw": jnp.pad(params["dw"] * s2[None, None, :],
                      ((0, 0), (0, 0), (0, Hp - Hid))).astype(f32),
        "b2": pad2(b2.reshape(1, Hid), 1, Hp).astype(f32),
        "fc1w": pad2(params["fc1_w"], red, Hp).astype(f32),        # (red, Hp)
        "fc1b": params["fc1_b"].reshape(1, red).astype(f32),       # (1, red)
        "fc2w": pad2(params["fc2_w"], red, Hp).astype(f32),        # (red, Hp)
        "fc2b": pad2(params["fc2_b"].reshape(1, Hid), 1, Hp).astype(f32),
        "w3": pad2(params["w3"] * s3[None, :], Hp, Op).astype(jnp.bfloat16),
        "b3": pad2(b3.reshape(1, Cout), 1, Op).astype(f32),
    }


def mv3_block(x_nhwc, prep, *, out_channels, use_res=True, images_per_step=1):
    """MV3Block forward.  x_nhwc: (B, H, W, Cin) NHWC.  Returns
    (B, H, W, out_channels) bf16 (bf16 HBM I/O; f32 accumulation in-kernel)."""
    B, H, W, Cin = x_nhwc.shape
    Cp = prep["w1"].shape[0]          # padded Cin
    Hp = prep["dw"].shape[-1]         # padded hidden
    Op = prep["w3"].shape[-1]         # padded Cout
    Bt = images_per_step
    assert B % Bt == 0, "batch must be divisible by images_per_step"
    if use_res:
        assert Cin == out_channels and Cp == Op, "residual needs Cin == Cout"

    # bf16 cast + zero channel pad to the lane width (one fused XLA pass; in a
    # full network the padded/bf16 layout lives at the network boundary).
    xp = jnp.pad(x_nhwc.astype(jnp.bfloat16),
                 ((0, 0), (0, 0), (0, 0), (0, Cp - Cin)))

    weights = (prep["w1"], prep["b1"], prep["dw"], prep["b2"],
               prep["fc1w"], prep["fc1b"], prep["fc2w"], prep["fc2b"],
               prep["w3"], prep["b3"])

    def full_spec(a):  # whole (small) weight array resident in VMEM every step
        return pl.BlockSpec(a.shape, lambda b, n=a.ndim: (0,) * n)

    kernel = functools.partial(_mv3_kernel, Bt=Bt, H=H, W=W,
                               Cp=Cp, Hp=Hp, Op=Op, use_res=use_res)

    out_p = pl.pallas_call(
        kernel,
        out_shape=jax.ShapeDtypeStruct((B, H, W, Op), jnp.bfloat16),
        grid_spec=pltpu.PrefetchScalarGridSpec(
            num_scalar_prefetch=0,
            grid=(B // Bt,),
            in_specs=[pl.BlockSpec((Bt, H, W, Cp), lambda b: (b, 0, 0, 0))]
                     + [full_spec(w) for w in weights],
            out_specs=pl.BlockSpec((Bt, H, W, Op), lambda b: (b, 0, 0, 0)),
        ),
        compiler_params=pltpu.CompilerParams(
            dimension_semantics=("parallel",),      # batch splits across v7x's 2 TCs
            vmem_limit_bytes=48 * 1024 * 1024),     # <= 64 MiB v7x with headroom
    )(xp, *weights)
    return out_p[..., :out_channels]


def mv3_block_nchw(x_nchw, prep, *, out_channels, use_res=True):
    """Torch-layout convenience wrapper (prefer NHWC mv3_block on the hot path)."""
    y = mv3_block(jnp.transpose(x_nchw, (0, 2, 3, 1)), prep,
                  out_channels=out_channels, use_res=use_res)
    return jnp.transpose(y, (0, 3, 1, 2))


def mv3_ref(x_nhwc, params, *, use_res=True):
    """Pure-JAX f32 reference matching the PyTorch module (eval-mode BN)."""
    s1, b1 = _fold_bn(*params["bn1"])
    s2, b2 = _fold_bn(*params["bn2"])
    s3, b3 = _fold_bn(*params["bn3"])
    x = x_nhwc.astype(jnp.float32)
    h = _hardswish(jnp.einsum("bhwc,cd->bhwd", x, params["w1"],
                              precision="highest") * s1 + b1)
    B, H, W, Hid = h.shape
    hp = jnp.pad(h, ((0, 0), (1, 1), (1, 1), (0, 0)))
    acc = jnp.zeros_like(h)
    for ky in range(3):
        for kx in range(3):
            acc = acc + hp[:, ky:ky + H, kx:kx + W, :] * params["dw"][ky, kx]
    h = _hardswish(acc * s2 + b2)
    y = jnp.mean(h, axis=(1, 2))                                   # (B, Hid)
    z = jnp.clip(y @ params["fc1_w"].T + params["fc1_b"], 0.0, 6.0)
    z = z @ params["fc2_w"] + params["fc2_b"]
    gate = jnp.clip(z + 3.0, 0.0, 6.0) / 6.0
    h = h * gate[:, None, None, :]
    out = jnp.einsum("bhwc,cd->bhwd", h, params["w3"],
                     precision="highest") * s3 + b3
    return out + x if use_res else out


def make_params(key, inp, oup, expansion=4, reduction_ratio=16):
    hidden = int(inp * expansion)
    red = max(hidden // reduction_ratio, 1)
    ks = jax.random.split(key, 7)

    def rnd(k, shape, scale=0.1):
        return (scale * jax.random.normal(k, shape)).astype(jnp.float32)

    def bn(c):
        return (jnp.ones((c,), jnp.float32),            # gamma
                jnp.zeros((c,), jnp.float32),           # beta
                0.05 * jnp.ones((c,), jnp.float32),     # running mean
                jnp.ones((c,), jnp.float32))            # running var

    return {
        # 1x1 expand conv: torch weight (hidden, inp, 1, 1) -> (inp, hidden)
        "w1": rnd(ks[0], (inp, hidden)),
        "bn1": bn(hidden),
        # depthwise 3x3: torch weight (hidden, 1, 3, 3) -> (3, 3, hidden)
        "dw": rnd(ks[1], (3, 3, hidden)),
        "bn2": bn(hidden),
        # SE: Linear(hidden, red) weight in torch layout (red, hidden)
        "fc1_w": rnd(ks[2], (red, hidden)),
        "fc1_b": rnd(ks[3], (red,)),
        # SE: Linear(red, hidden) weight stored transposed -> (red, hidden)
        "fc2_w": rnd(ks[4], (red, hidden)),
        "fc2_b": rnd(ks[5], (hidden,)),
        # 1x1 project conv: torch weight (oup, hidden, 1, 1) -> (hidden, oup)
        "w3": rnd(ks[6], (hidden, oup)),
        "bn3": bn(oup),
    }


if __name__ == "__main__":
    key = jax.random.PRNGKey(0)
    k_x, k_p = jax.random.split(key)

    B, C, Hsp, Wsp = 2, 4, 16, 16               # inp = oup = 4, stride = 1
    # Kernel-native layout is NHWC; no NCHW relayout on the hot path.
    x = jax.random.normal(k_x, (B, Hsp, Wsp, C), dtype=jnp.float32)
    params = make_params(k_p, inp=C, oup=C, expansion=4, reduction_ratio=16)

    prep = prepare_mv3_weights(params)          # fold BN / pad / cast once
    fwd = jax.jit(functools.partial(mv3_block, out_channels=C, use_res=True))

    out = jax.block_until_ready(fwd(x, prep))
    assert out.shape == (B, Hsp, Wsp, C), out.shape

    # Pure-JAX f32 reference check (bf16 HBM I/O + bf16 MXU operands => loose
    # tolerance; accumulation is f32).
    ref = mv3_ref(x, params, use_res=True)
    err = float(jnp.max(jnp.abs(out.astype(jnp.float32) - ref)))
    assert err < 5e-2, f"kernel/reference mismatch: max|err|={err}"
    print("KERNEL_OK")
</pallas_src>

<mosaic_0001>
module attributes {stable_mosaic.version = 11 : i64} {
  func.func @_mv3_kernel(%arg0: i32, %arg1: memref<1x16x16x128xbf16, #tpu.memory_space<vmem>>, %arg2: memref<128x128xbf16, #tpu.memory_space<vmem>>, %arg3: memref<1x128xf32, #tpu.memory_space<vmem>>, %arg4: memref<3x3x128xf32, #tpu.memory_space<vmem>>, %arg5: memref<1x128xf32, #tpu.memory_space<vmem>>, %arg6: memref<1x128xf32, #tpu.memory_space<vmem>>, %arg7: memref<1x1xf32, #tpu.memory_space<vmem>>, %arg8: memref<1x128xf32, #tpu.memory_space<vmem>>, %arg9: memref<1x128xf32, #tpu.memory_space<vmem>>, %arg10: memref<128x128xbf16, #tpu.memory_space<vmem>>, %arg11: memref<1x128xf32, #tpu.memory_space<vmem>>, %arg12: memref<1x16x16x128xbf16, #tpu.memory_space<vmem>>) attributes {dimension_semantics = [#tpu.dimension_semantics<parallel>], iteration_bounds = array<i64: 2>, scalar_prefetch = 0 : i64, scratch_operands = 0 : i64, tpu.core_type = #tpu.core_type<tc>, window_params = [{transform_indices = @transform_0, window_bounds = array<i64: 1, 16, 16, 128>}, {pipeline_mode = #tpu.pipeline_mode<synchronous>, transform_indices = @transform_1, window_bounds = array<i64: 128, 128>}, {pipeline_mode = #tpu.pipeline_mode<synchronous>, transform_indices = @transform_2, window_bounds = array<i64: 1, 128>}, {pipeline_mode = #tpu.pipeline_mode<synchronous>, transform_indices = @transform_3, window_bounds = array<i64: 3, 3, 128>}, {pipeline_mode = #tpu.pipeline_mode<synchronous>, transform_indices = @transform_4, window_bounds = array<i64: 1, 128>}, {pipeline_mode = #tpu.pipeline_mode<synchronous>, transform_indices = @transform_5, window_bounds = array<i64: 1, 128>}, {pipeline_mode = #tpu.pipeline_mode<synchronous>, transform_indices = @transform_6, window_bounds = array<i64: 1, 1>}, {pipeline_mode = #tpu.pipeline_mode<synchronous>, transform_indices = @transform_7, window_bounds = array<i64: 1, 128>}, {pipeline_mode = #tpu.pipeline_mode<synchronous>, transform_indices = @transform_8, window_bounds = array<i64: 1, 128>}, {pipeline_mode = #tpu.pipeline_mode<synchronous>, transform_indices = @transform_9, window_bounds = array<i64: 128, 128>}, {pipeline_mode = #tpu.pipeline_mode<synchronous>, transform_indices = @transform_10, window_bounds = array<i64: 1, 128>}, {transform_indices = @transform_11, window_bounds = array<i64: 1, 16, 16, 128>}]} {
    %c0 = arith.constant 0 : index
    %c0_0 = arith.constant 0 : index
    %c0_1 = arith.constant 0 : index
    %c0_2 = arith.constant 0 : index
    %0 = vector.load %arg1[%c0, %c0_0, %c0_1, %c0_2] : memref<1x16x16x128xbf16, #tpu.memory_space<vmem>>, vector<1x16x16x128xbf16>
    %1 = vector.shape_cast %0 : vector<1x16x16x128xbf16> to vector<256x128xbf16>
    %c0_3 = arith.constant 0 : index
    %c0_4 = arith.constant 0 : index
    %2 = vector.load %arg2[%c0_3, %c0_4] : memref<128x128xbf16, #tpu.memory_space<vmem>>, vector<128x128xbf16>
    %cst = arith.constant dense<0.000000e+00> : vector<256x128xf32>
    %3 = tpu.matmul %1, %2, %cst {dimension_numbers = #tpu.dot_dimension_numbers<[1], [0], [0], [1], [0, 0, 1, 1], [], []>} : vector<256x128xbf16>, vector<128x128xbf16>, vector<256x128xf32> -> vector<256x128xf32>
    %c0_5 = arith.constant 0 : index
    %c0_6 = arith.constant 0 : index
    %4 = vector.load %arg3[%c0_5, %c0_6] : memref<1x128xf32, #tpu.memory_space<vmem>>, vector<1x128xf32>
    %5 = vector.broadcast %4 : vector<1x128xf32> to vector<256x128xf32>
    %6 = arith.addf %3, %5 : vector<256x128xf32>
    %cst_7 = arith.constant 3.000000e+00 : f32
    %7 = vector.broadcast %cst_7 : f32 to vector<256x128xf32>
    %8 = arith.addf %6, %7 : vector<256x128xf32>
    %cst_8 = arith.constant 0.000000e+00 : f32
    %cst_9 = arith.constant 6.000000e+00 : f32
    %9 = vector.broadcast %cst_8 : f32 to vector<256x128xf32>
    %10 = arith.maximumf %9, %8 : vector<256x128xf32>
    %11 = vector.broadcast %cst_9 : f32 to vector<256x128xf32>
    %12 = arith.minimumf %11, %10 : vector<256x128xf32>
    %13 = arith.mulf %6, %12 : vector<256x128xf32>
    %cst_10 = arith.constant 0.166666672 : f32
    %14 = vector.broadcast %cst_10 : f32 to vector<256x128xf32>
    %15 = arith.mulf %13, %14 : vector<256x128xf32>
    %16 = tpu.iota {dimensions = array<i32: 0>} : vector<256x1xi32>
    %c16_i32 = arith.constant 16 : i32
    %c0_i32 = arith.constant 0 : i32
    %17 = arith.cmpi eq, %c16_i32, %c0_i32 : i32
    %c1_i32 = arith.constant 1 : i32
    %18 = arith.select %17, %c1_i32, %c16_i32 : i32
    %19 = vector.broadcast %18 : i32 to vector<256x1xi32>
    %20 = arith.remsi %16, %19 : vector<256x1xi32>
    %c0_i32_11 = arith.constant 0 : i32
    %21 = vector.broadcast %c0_i32_11 : i32 to vector<256x1xi32>
    %22 = arith.cmpi ne, %20, %21 : vector<256x1xi32>
    %c0_i32_12 = arith.constant 0 : i32
    %23 = vector.broadcast %c0_i32_12 : i32 to vector<256x1xi32>
    %24 = arith.cmpi slt, %20, %23 : vector<256x1xi32>
    %c0_i32_13 = arith.constant 0 : i32
    %25 = arith.cmpi slt, %18, %c0_i32_13 : i32
    %26 = vector.broadcast %25 : i1 to vector<256x1xi1>
    %27 = vector.broadcast %26 : vector<256x1xi1> to vector<256x1xi1>
    %28 = arith.xori %24, %27 : vector<256x1xi1>
    %29 = arith.andi %28, %22 : vector<256x1xi1>
    %30 = vector.broadcast %18 : i32 to vector<256x1xi32>
    %31 = arith.addi %20, %30 : vector<256x1xi32>
    %32 = arith.select %29, %31, %20 : vector<256x1xi1>, vector<256x1xi32>
    %c0_i32_14 = arith.constant 0 : i32
    %33 = vector.broadcast %c0_i32_14 : i32 to vector<256x1xi32>
    %34 = arith.cmpi eq, %32, %33 : vector<256x1xi32>
    %c16_i32_15 = arith.constant 16 : i32
    %c0_i32_16 = arith.constant 0 : i32
    %35 = arith.cmpi eq, %c16_i32_15, %c0_i32_16 : i32
    %c1_i32_17 = arith.constant 1 : i32
    %36 = arith.select %35, %c1_i32_17, %c16_i32_15 : i32
    %37 = vector.broadcast %36 : i32 to vector<256x1xi32>
    %38 = arith.remsi %16, %37 : vector<256x1xi32>
    %c0_i32_18 = arith.constant 0 : i32
    %39 = vector.broadcast %c0_i32_18 : i32 to vector<256x1xi32>
    %40 = arith.cmpi ne, %38, %39 : vector<256x1xi32>
    %c0_i32_19 = arith.constant 0 : i32
    %41 = vector.broadcast %c0_i32_19 : i32 to vector<256x1xi32>
    %42 = arith.cmpi slt, %38, %41 : vector<256x1xi32>
    %c0_i32_20 = arith.constant 0 : i32
    %43 = arith.cmpi slt, %36, %c0_i32_20 : i32
    %44 = vector.broadcast %43 : i1 to vector<256x1xi1>
    %45 = vector.broadcast %44 : vector<256x1xi1> to vector<256x1xi1>
    %46 = arith.xori %42, %45 : vector<256x1xi1>
    %47 = arith.andi %46, %40 : vector<256x1xi1>
    %48 = vector.broadcast %36 : i32 to vector<256x1xi32>
    %49 = arith.addi %38, %48 : vector<256x1xi32>
    %50 = arith.select %47, %49, %38 : vector<256x1xi1>, vector<256x1xi32>
    %c15_i32 = arith.constant 15 : i32
    %51 = vector.broadcast %c15_i32 : i32 to vector<256x1xi32>
    %52 = arith.cmpi eq, %50, %51 : vector<256x1xi32>
    %c256_i32 = arith.constant 256 : i32
    %c0_i32_21 = arith.constant 0 : i32
    %53 = arith.cmpi eq, %c256_i32, %c0_i32_21 : i32
    %c1_i32_22 = arith.constant 1 : i32
    %54 = arith.select %53, %c1_i32_22, %c256_i32 : i32
    %55 = vector.broadcast %54 : i32 to vector<256x1xi32>
    %56 = arith.remsi %16, %55 : vector<256x1xi32>
    %c0_i32_23 = arith.constant 0 : i32
    %57 = vector.broadcast %c0_i32_23 : i32 to vector<256x1xi32>
    %58 = arith.cmpi ne, %56, %57 : vector<256x1xi32>
    %c0_i32_24 = arith.constant 0 : i32
    %59 = vector.broadcast %c0_i32_24 : i32 to vector<256x1xi32>
    %60 = arith.cmpi slt, %56, %59 : vector<256x1xi32>
    %c0_i32_25 = arith.constant 0 : i32
    %61 = arith.cmpi slt, %54, %c0_i32_25 : i32
    %62 = vector.broadcast %61 : i1 to vector<256x1xi1>
    %63 = vector.broadcast %62 : vector<256x1xi1> to vector<256x1xi1>
    %64 = arith.xori %60, %63 : vector<256x1xi1>
    %65 = arith.andi %64, %58 : vector<256x1xi1>
    %66 = vector.broadcast %54 : i32 to vector<256x1xi32>
    %67 = arith.addi %56, %66 : vector<256x1xi32>
    %68 = arith.select %65, %67, %56 : vector<256x1xi1>, vector<256x1xi32>
    %c16_i32_26 = arith.constant 16 : i32
    %69 = vector.broadcast %c16_i32_26 : i32 to vector<256x1xi32>
    %70 = arith.cmpi slt, %68, %69 : vector<256x1xi32>
    %c256_i32_27 = arith.constant 256 : i32
    %c0_i32_28 = arith.constant 0 : i32
    %71 = arith.cmpi eq, %c256_i32_27, %c0_i32_28 : i32
    %c1_i32_29 = arith.constant 1 : i32
    %72 = arith.select %71, %c1_i32_29, %c256_i32_27 : i32
    %73 = vector.broadcast %72 : i32 to vector<256x1xi32>
    %74 = arith.remsi %16, %73 : vector<256x1xi32>
    %c0_i32_30 = arith.constant 0 : i32
    %75 = vector.broadcast %c0_i32_30 : i32 to vector<256x1xi32>
    %76 = arith.cmpi ne, %74, %75 : vector<256x1xi32>
    %c0_i32_31 = arith.constant 0 : i32
    %77 = vector.broadcast %c0_i32_31 : i32 to vector<256x1xi32>
    %78 = arith.cmpi slt, %74, %77 : vector<256x1xi32>
    %c0_i32_32 = arith.constant 0 : i32
    %79 = arith.cmpi slt, %72, %c0_i32_32 : i32
    %80 = vector.broadcast %79 : i1 to vector<256x1xi1>
    %81 = vector.broadcast %80 : vector<256x1xi1> to vector<256x1xi1>
    %82 = arith.xori %78, %81 : vector<256x1xi1>
    %83 = arith.andi %82, %76 : vector<256x1xi1>
    %84 = vector.broadcast %72 : i32 to vector<256x1xi32>
    %85 = arith.addi %74, %84 : vector<256x1xi32>
    %86 = arith.select %83, %85, %74 : vector<256x1xi1>, vector<256x1xi32>
    %c240_i32 = arith.constant 240 : i32
    %87 = vector.broadcast %c240_i32 : i32 to vector<256x1xi32>
    %88 = arith.cmpi sge, %86, %87 : vector<256x1xi32>
    %c1_i32_33 = arith.constant 1 : i32
    %89 = tpu.dynamic_rotate %15 by %c1_i32_33 dim 0 : vector<256x128xf32>, i32 -> vector<256x128xf32>
    %cst_34 = arith.constant 0.000000e+00 : f32
    %90 = vector.shape_cast %34 : vector<256x1xi1> to vector<256x1xi1>
    %91 = vector.broadcast %90 : vector<256x1xi1> to vector<256x128xi1>
    %92 = vector.broadcast %cst_34 : f32 to vector<256x128xf32>
    %93 = arith.select %91, %92, %89 : vector<256x128xi1>, vector<256x128xf32>
    %c255_i32 = arith.constant 255 : i32
    %94 = tpu.dynamic_rotate %15 by %c255_i32 dim 0 : vector<256x128xf32>, i32 -> vector<256x128xf32>
    %cst_35 = arith.constant 0.000000e+00 : f32
    %95 = vector.shape_cast %52 : vector<256x1xi1> to vector<256x1xi1>
    %96 = vector.broadcast %95 : vector<256x1xi1> to vector<256x128xi1>
    %97 = vector.broadcast %cst_35 : f32 to vector<256x128xf32>
    %98 = arith.select %96, %97, %94 : vector<256x128xi1>, vector<256x128xf32>
    %c1 = arith.constant 1 : index
    %c0_36 = arith.constant 0 : index
    %c0_37 = arith.constant 0 : index
    %99 = vector.load %arg4[%c1, %c0_36, %c0_37] : memref<3x3x128xf32, #tpu.memory_space<vmem>>, vector<1x1x128xf32>
    %100 = vector.shape_cast %99 : vector<1x1x128xf32> to vector<128xf32>
    %101 = vector.shape_cast %100 : vector<128xf32> to vector<1x128xf32>
    %102 = vector.broadcast %101 : vector<1x128xf32> to vector<256x128xf32>
    %103 = arith.mulf %93, %102 : vector<256x128xf32>
    %c1_38 = arith.constant 1 : index
    %c1_39 = arith.constant 1 : index
    %c0_40 = arith.constant 0 : index
    %104 = vector.load %arg4[%c1_38, %c1_39, %c0_40] : memref<3x3x128xf32, #tpu.memory_space<vmem>>, vector<1x1x128xf32>
    %105 = vector.shape_cast %104 : vector<1x1x128xf32> to vector<128xf32>
    %106 = vector.shape_cast %105 : vector<128xf32> to vector<1x128xf32>
    %107 = vector.broadcast %106 : vector<1x128xf32> to vector<256x128xf32>
    %108 = arith.mulf %15, %107 : vector<256x128xf32>
    %109 = arith.addf %103, %108 : vector<256x128xf32>
    %c1_41 = arith.constant 1 : index
    %c2 = arith.constant 2 : index
    %c0_42 = arith.constant 0 : index
    %110 = vector.load %arg4[%c1_41, %c2, %c0_42] : memref<3x3x128xf32, #tpu.memory_space<vmem>>, vector<1x1x128xf32>
    %111 = vector.shape_cast %110 : vector<1x1x128xf32> to vector<128xf32>
    %112 = vector.shape_cast %111 : vector<128xf32> to vector<1x128xf32>
    %113 = vector.broadcast %112 : vector<1x128xf32> to vector<256x128xf32>
    %114 = arith.mulf %98, %113 : vector<256x128xf32>
    %115 = arith.addf %109, %114 : vector<256x128xf32>
    %c0_43 = arith.constant 0 : index
    %c0_44 = arith.constant 0 : index
    %c0_45 = arith.constant 0 : index
    %116 = vector.load %arg4[%c0_43, %c0_44, %c0_45] : memref<3x3x128xf32, #tpu.memory_space<vmem>>, vector<1x1x128xf32>
    %117 = vector.shape_cast %116 : vector<1x1x128xf32> to vector<128xf32>
    %118 = vector.shape_cast %117 : vector<128xf32> to vector<1x128xf32>
    %119 = vector.broadcast %118 : vector<1x128xf32> to vector<256x128xf32>
    %120 = arith.mulf %93, %119 : vector<256x128xf32>
    %c0_46 = arith.constant 0 : index
    %c1_47 = arith.constant 1 : index
    %c0_48 = arith.constant 0 : index
    %121 = vector.load %arg4[%c0_46, %c1_47, %c0_48] : memref<3x3x128xf32, #tpu.memory_space<vmem>>, vector<1x1x128xf32>
    %122 = vector.shape_cast %121 : vector<1x1x128xf32> to vector<128xf32>
    %123 = vector.shape_cast %122 : vector<128xf32> to vector<1x128xf32>
    %124 = vector.broadcast %123 : vector<1x128xf32> to vector<256x128xf32>
    %125 = arith.mulf %15, %124 : vector<256x128xf32>
    %126 = arith.addf %120, %125 : vector<256x128xf32>
    %c0_49 = arith.constant 0 : index
    %c2_50 = arith.constant 2 : index
    %c0_51 = arith.constant 0 : index
    %127 = vector.load %arg4[%c0_49, %c2_50, %c0_51] : memref<3x3x128xf32, #tpu.memory_space<vmem>>, vector<1x1x128xf32>
    %128 = vector.shape_cast %127 : vector<1x1x128xf32> to vector<128xf32>
    %129 = vector.shape_cast %128 : vector<128xf32> to vector<1x128xf32>
    %130 = vector.broadcast %129 : vector<1x128xf32> to vector<256x128xf32>
    %131 = arith.mulf %98, %130 : vector<256x128xf32>
    %132 = arith.addf %126, %131 : vector<256x128xf32>
    %c16_i32_52 = arith.constant 16 : i32
    %133 = tpu.dynamic_rotate %132 by %c16_i32_52 dim 0 : vector<256x128xf32>, i32 -> vector<256x128xf32>
    %cst_53 = arith.constant 0.000000e+00 : f32
    %134 = vector.shape_cast %70 : vector<256x1xi1> to vector<256x1xi1>
    %135 = vector.broadcast %134 : vector<256x1xi1> to vector<256x128xi1>
    %136 = vector.broadcast %cst_53 : f32 to vector<256x128xf32>
    %137 = arith.select %135, %136, %133 : vector<256x128xi1>, vector<256x128xf32>
    %138 = arith.addf %115, %137 : vector<256x128xf32>
    %c2_54 = arith.constant 2 : index
    %c0_55 = arith.constant 0 : index
    %c0_56 = arith.constant 0 : index
    %139 = vector.load %arg4[%c2_54, %c0_55, %c0_56] : memref<3x3x128xf32, #tpu.memory_space<vmem>>, vector<1x1x128xf32>
    %140 = vector.shape_cast %139 : vector<1x1x128xf32> to vector<128xf32>
    %141 = vector.shape_cast %140 : vector<128xf32> to vector<1x128xf32>
    %142 = vector.broadcast %141 : vector<1x128xf32> to vector<256x128xf32>
    %143 = arith.mulf %93, %142 : vector<256x128xf32>
    %c2_57 = arith.constant 2 : index
    %c1_58 = arith.constant 1 : index
    %c0_59 = arith.constant 0 : index
    %144 = vector.load %arg4[%c2_57, %c1_58, %c0_59] : memref<3x3x128xf32, #tpu.memory_space<vmem>>, vector<1x1x128xf32>
    %145 = vector.shape_cast %144 : vector<1x1x128xf32> to vector<128xf32>
    %146 = vector.shape_cast %145 : vector<128xf32> to vector<1x128xf32>
    %147 = vector.broadcast %146 : vector<1x128xf32> to vector<256x128xf32>
    %148 = arith.mulf %15, %147 : vector<256x128xf32>
    %149 = arith.addf %143, %148 : vector<256x128xf32>
    %c2_60 = arith.constant 2 : index
    %c2_61 = arith.constant 2 : index
    %c0_62 = arith.constant 0 : index
    %150 = vector.load %arg4[%c2_60, %c2_61, %c0_62] : memref<3x3x128xf32, #tpu.memory_space<vmem>>, vector<1x1x128xf32>
    %151 = vector.shape_cast %150 : vector<1x1x128xf32> to vector<128xf32>
    %152 = vector.shape_cast %151 : vector<128xf32> to vector<1x128xf32>
    %153 = vector.broadcast %152 : vector<1x128xf32> to vector<256x128xf32>
    %154 = arith.mulf %98, %153 : vector<256x128xf32>
    %155 = arith.addf %149, %154 : vector<256x128xf32>
    %c240_i32_63 = arith.constant 240 : i32
    %156 = tpu.dynamic_rotate %155 by %c240_i32_63 dim 0 : vector<256x128xf32>, i32 -> vector<256x128xf32>
    %cst_64 = arith.constant 0.000000e+00 : f32
    %157 = vector.shape_cast %88 : vector<256x1xi1> to vector<256x1xi1>
    %158 = vector.broadcast %157 : vector<256x1xi1> to vector<256x128xi1>
    %159 = vector.broadcast %cst_64 : f32 to vector<256x128xf32>
    %160 = arith.select %158, %159, %156 : vector<256x128xi1>, vector<256x128xf32>
    %161 = arith.addf %138, %160 : vector<256x128xf32>
    %c0_65 = arith.constant 0 : index
    %c0_66 = arith.constant 0 : index
    %162 = vector.load %arg5[%c0_65, %c0_66] : memref<1x128xf32, #tpu.memory_space<vmem>>, vector<1x128xf32>
    %163 = vector.broadcast %162 : vector<1x128xf32> to vector<256x128xf32>
    %164 = arith.addf %161, %163 : vector<256x128xf32>
    %cst_67 = arith.constant 3.000000e+00 : f32
    %165 = vector.broadcast %cst_67 : f32 to vector<256x128xf32>
    %166 = arith.addf %164, %165 : vector<256x128xf32>
    %cst_68 = arith.constant 0.000000e+00 : f32
    %cst_69 = arith.constant 6.000000e+00 : f32
    %167 = vector.broadcast %cst_68 : f32 to vector<256x128xf32>
    %168 = arith.maximumf %167, %166 : vector<256x128xf32>
    %169 = vector.broadcast %cst_69 : f32 to vector<256x128xf32>
    %170 = arith.minimumf %169, %168 : vector<256x128xf32>
    %171 = arith.mulf %164, %170 : vector<256x128xf32>
    %cst_70 = arith.constant 0.166666672 : f32
    %172 = vector.broadcast %cst_70 : f32 to vector<256x128xf32>
    %173 = arith.mulf %171, %172 : vector<256x128xf32>
    %174 = arith.truncf %173 : vector<256x128xf32> to vector<256x128xbf16>
    %cst_71 = arith.constant 3.906250e-03 : bf16
    %175 = vector.broadcast %cst_71 : bf16 to vector<1x256xbf16>
    %cst_72 = arith.constant dense<0.000000e+00> : vector<1x128xf32>
    %176 = tpu.matmul %175, %174, %cst_72 {dimension_numbers = #tpu.dot_dimension_numbers<[1], [0], [0], [1], [0, 0, 1, 1], [], []>} : vector<1x256xbf16>, vector<256x128xbf16>, vector<1x128xf32> -> vector<1x128xf32>
    %177 = vector.shape_cast %176 : vector<1x128xf32> to vector<1x1x128xf32>
    %c0_73 = arith.constant 0 : index
    %c0_74 = arith.constant 0 : index
    %178 = vector.load %arg6[%c0_73, %c0_74] : memref<1x128xf32, #tpu.memory_space<vmem>>, vector<1x128xf32>
    %179 = vector.shape_cast %178 : vector<1x128xf32> to vector<1x1x128xf32>
    %180 = arith.mulf %177, %179 : vector<1x1x128xf32>
    %cst_75 = arith.constant dense<0.000000e+00> : vector<1x1xf32>
    %181 = vector.multi_reduction <add>, %180, %cst_75 [2] : vector<1x1x128xf32> to vector<1x1xf32>
    %c0_76 = arith.constant 0 : index
    %c0_77 = arith.constant 0 : index
    %182 = vector.load %arg7[%c0_76, %c0_77] : memref<1x1xf32, #tpu.memory_space<vmem>>, vector<1x1xf32>
    %183 = arith.addf %181, %182 : vector<1x1xf32>
    %cst_78 = arith.constant 0.000000e+00 : f32
    %cst_79 = arith.constant 6.000000e+00 : f32
    %184 = vector.broadcast %cst_78 : f32 to vector<1x1xf32>
    %185 = arith.maximumf %184, %183 : vector<1x1xf32>
    %186 = vector.broadcast %cst_79 : f32 to vector<1x1xf32>
    %187 = arith.minimumf %186, %185 : vector<1x1xf32>
    %188 = vector.shape_cast %187 : vector<1x1xf32> to vector<1x1x1xf32>
    %c0_80 = arith.constant 0 : index
    %c0_81 = arith.constant 0 : index
    %189 = vector.load %arg8[%c0_80, %c0_81] : memref<1x128xf32, #tpu.memory_space<vmem>>, vector<1x128xf32>
    %190 = vector.shape_cast %189 : vector<1x128xf32> to vector<1x1x128xf32>
    %191 = vector.broadcast %188 : vector<1x1x1xf32> to vector<1x1x128xf32>
    %192 = arith.mulf %191, %190 : vector<1x1x128xf32>
    %cst_82 = arith.constant dense<0.000000e+00> : vector<1x128xf32>
    %193 = vector.multi_reduction <add>, %192, %cst_82 [1] : vector<1x1x128xf32> to vector<1x128xf32>
    %c0_83 = arith.constant 0 : index
    %c0_84 = arith.constant 0 : index
    %194 = vector.load %arg9[%c0_83, %c0_84] : memref<1x128xf32, #tpu.memory_space<vmem>>, vector<1x128xf32>
    %195 = arith.addf %193, %194 : vector<1x128xf32>
    %cst_85 = arith.constant 3.000000e+00 : f32
    %196 = vector.broadcast %cst_85 : f32 to vector<1x128xf32>
    %197 = arith.addf %195, %196 : vector<1x128xf32>
    %cst_86 = arith.constant 0.000000e+00 : f32
    %cst_87 = arith.constant 6.000000e+00 : f32
    %198 = vector.broadcast %cst_86 : f32 to vector<1x128xf32>
    %199 = arith.maximumf %198, %197 : vector<1x128xf32>
    %200 = vector.broadcast %cst_87 : f32 to vector<1x128xf32>
    %201 = arith.minimumf %200, %199 : vector<1x128xf32>
    %cst_88 = arith.constant 0.166666672 : f32
    %202 = vector.broadcast %cst_88 : f32 to vector<1x128xf32>
    %203 = arith.mulf %201, %202 : vector<1x128xf32>
    %204 = arith.truncf %203 : vector<1x128xf32> to vector<1x128xbf16>
    %205 = vector.broadcast %204 : vector<1x128xbf16> to vector<256x128xbf16>
    %206 = arith.mulf %174, %205 : vector<256x128xbf16>
    %c0_89 = arith.constant 0 : index
    %c0_90 = arith.constant 0 : index
    %207 = vector.load %arg10[%c0_89, %c0_90] : memref<128x128xbf16, #tpu.memory_space<vmem>>, vector<128x128xbf16>
    %cst_91 = arith.constant dense<0.000000e+00> : vector<256x128xf32>
    %208 = tpu.matmul %206, %207, %cst_91 {dimension_numbers = #tpu.dot_dimension_numbers<[1], [0], [0], [1], [0, 0, 1, 1], [], []>} : vector<256x128xbf16>, vector<128x128xbf16>, vector<256x128xf32> -> vector<256x128xf32>
    %c0_92 = arith.constant 0 : index
    %c0_93 = arith.constant 0 : index
    %209 = vector.load %arg11[%c0_92, %c0_93] : memref<1x128xf32, #tpu.memory_space<vmem>>, vector<1x128xf32>
    %210 = vector.broadcast %209 : vector<1x128xf32> to vector<256x128xf32>
    %211 = arith.addf %208, %210 : vector<256x128xf32>
    %c0_94 = arith.constant 0 : index
    %c0_95 = arith.constant 0 : index
    %c0_96 = arith.constant 0 : index
    %c0_97 = arith.constant 0 : index
    %212 = vector.load %arg1[%c0_94, %c0_95, %c0_96, %c0_97] : memref<1x16x16x128xbf16, #tpu.memory_space<vmem>>, vector<1x16x16x128xbf16>
    %213 = vector.shape_cast %212 : vector<1x16x16x128xbf16> to vector<256x128xbf16>
    %214 = arith.extf %213 : vector<256x128xbf16> to vector<256x128xf32>
    %215 = arith.addf %211, %214 : vector<256x128xf32>
    %216 = arith.truncf %215 : vector<256x128xf32> to vector<256x128xbf16>
    %217 = vector.shape_cast %216 : vector<256x128xbf16> to vector<1x16x16x128xbf16>
    %c0_98 = arith.constant 0 : index
    %c0_99 = arith.constant 0 : index
    %c0_100 = arith.constant 0 : index
    %c0_101 = arith.constant 0 : index
    %218 = vector.load %arg12[%c0_98, %c0_99, %c0_100, %c0_101] : memref<1x16x16x128xbf16, #tpu.memory_space<vmem>>, vector<1x16x16x128xbf16>
    tpu.vector_store %arg12[%c0_98, %c0_99, %c0_100, %c0_101], %217 {strides = array<i32>} : memref<1x16x16x128xbf16, #tpu.memory_space<vmem>>, vector<1x16x16x128xbf16>,
    return
  }
  func.func @transform_0(%arg0: i32) -> (i32, i32, i32, i32) {
    %c0_i32 = arith.constant 0 : i32
    %c0_i32_0 = arith.constant 0 : i32
    %c0_i32_1 = arith.constant 0 : i32
    %c0_i32_2 = arith.constant 0 : i32
    return %arg0, %c0_i32, %c0_i32_0, %c0_i32_1 : i32, i32, i32, i32
  }
  func.func @transform_1(%arg0: i32) -> (i32, i32) {
    %c0_i32 = arith.constant 0 : i32
    %c0_i32_0 = arith.constant 0 : i32
    %c0_i32_1 = arith.constant 0 : i32
    return %c0_i32, %c0_i32_0 : i32, i32
  }
  func.func @transform_2(%arg0: i32) -> (i32, i32) {
    %c0_i32 = arith.constant 0 : i32
    %c0_i32_0 = arith.constant 0 : i32
    %c0_i32_1 = arith.constant 0 : i32
    return %c0_i32, %c0_i32_0 : i32, i32
  }
  func.func @transform_3(%arg0: i32) -> (i32, i32, i32) {
    %c0_i32 = arith.constant 0 : i32
    %c0_i32_0 = arith.constant 0 : i32
    %c0_i32_1 = arith.constant 0 : i32
    %c0_i32_2 = arith.constant 0 : i32
    return %c0_i32, %c0_i32_0, %c0_i32_1 : i32, i32, i32
  }
  func.func @transform_4(%arg0: i32) -> (i32, i32) {
    %c0_i32 = arith.constant 0 : i32
    %c0_i32_0 = arith.constant 0 : i32
    %c0_i32_1 = arith.constant 0 : i32
    return %c0_i32, %c0_i32_0 : i32, i32
  }
  func.func @transform_5(%arg0: i32) -> (i32, i32) {
    %c0_i32 = arith.constant 0 : i32
    %c0_i32_0 = arith.constant 0 : i32
    %c0_i32_1 = arith.constant 0 : i32
    return %c0_i32, %c0_i32_0 : i32, i32
  }
  func.func @transform_6(%arg0: i32) -> (i32, i32) {
    %c0_i32 = arith.constant 0 : i32
    %c0_i32_0 = arith.constant 0 : i32
    %c0_i32_1 = arith.constant 0 : i32
    return %c0_i32, %c0_i32_0 : i32, i32
  }
  func.func @transform_7(%arg0: i32) -> (i32, i32) {
    %c0_i32 = arith.constant 0 : i32
    %c0_i32_0 = arith.constant 0 : i32
    %c0_i32_1 = arith.constant 0 : i32
    return %c0_i32, %c0_i32_0 : i32, i32
  }
  func.func @transform_8(%arg0: i32) -> (i32, i32) {
    %c0_i32 = arith.constant 0 : i32
    %c0_i32_0 = arith.constant 0 : i32
    %c0_i32_1 = arith.constant 0 : i32
    return %c0_i32, %c0_i32_0 : i32, i32
  }
  func.func @transform_9(%arg0: i32) -> (i32, i32) {
    %c0_i32 = arith.constant 0 : i32
    %c0_i32_0 = arith.constant 0 : i32
    %c0_i32_1 = arith.constant 0 : i32
    return %c0_i32, %c0_i32_0 : i32, i32
  }
  func.func @transform_10(%arg0: i32) -> (i32, i32) {
    %c0_i32 = arith.constant 0 : i32
    %c0_i32_0 = arith.constant 0 : i32
    %c0_i32_1 = arith.constant 0 : i32
    return %c0_i32, %c0_i32_0 : i32, i32
  }
  func.func @transform_11(%arg0: i32) -> (i32, i32, i32, i32) {
    %c0_i32 = arith.constant 0 : i32
    %c0_i32_0 = arith.constant 0 : i32
    %c0_i32_1 = arith.constant 0 : i32
    %c0_i32_2 = arith.constant 0 : i32
    return %arg0, %c0_i32, %c0_i32_0, %c0_i32_1 : i32, i32, i32, i32
  }
}

</mosaic_0001>

<bundles_post_ra>
// kernel: mv3_block.1
= control target key start
LH: loop header
LB: loop body
LE: loop exit
PB: predicated region body
PF: predicated region fallthrough
CT: control target
= control target key end

     0   :  { %s4308_s19 = smov 0   ;;  %s6268_s0 = inlined_call_operand.vmem [shape: bf16[2,16,16,128], index: 0, kind: input, shape index: {}]   ;;  %s6269_s1 = inlined_call_operand.vmem [shape: bf16[128,128], index: 1, kind: input, shape index: {}]   ;;  %s6270_s2 = inlined_call_operand.vmem [shape: f32[1,128], index: 2, kind: input, shape index: {}]   ;;  %s6271_s3 = inlined_call_operand.vmem [shape: f32[3,3,128], index: 3, kind: input, shape index: {}]   ;;  %s6272_s4 = inlined_call_operand.vmem [shape: f32[1,128], index: 4, kind: input, shape index: {}]   ;;  %s6273_s5 = inlined_call_operand.vmem [shape: f32[1,128], index: 5, kind: input, shape index: {}]   ;;  %s6274_s6 = inlined_call_operand.<no memory space> [shape: f32[1,1], index: 6, kind: input, shape index: {}]   ;;  %s6275_s7 = inlined_call_operand.vmem [shape: f32[1,128], index: 7, kind: input, shape index: {}]   ;;  %s6276_s8 = inlined_call_operand.vmem [shape: f32[1,128], index: 8, kind: input, shape index: {}]   ;;  %s6277_s9 = inlined_call_operand.vmem [shape: bf16[128,128], index: 9, kind: input, shape index: {}]   ;;  %s6278_s10 = inlined_call_operand.vmem [shape: f32[1,128], index: 10, kind: input, shape index: {}]   ;;  %s6279_s11 = inlined_call_operand.vmem [shape: bf16[2,16,16,128], index: 11, kind: output, shape index: {}]  }
   0x1   :  { %v16_v0 = vstv %s6274_s6 }
   0x2   :  { %17 = vst [vmem:[#allocation2] sm:$0x1] %v16_v0 }
   0x3 LB: > { %s3759_s20 = sadd.s32 4294967295, %s4241_s19   ;;  %p3763_p0 = scmp.ge.s32.totalorder %s4241_s19, 1  ;;  %s4241_s19 = sphi %s4308_s19, %s23_s19  }
   0x4   : > { %p339_p1 = scmp.lt.s32.totalorder %s4241_s19, 3 }
   0x6   : > { %p340_p2 = pnand %p3763_p0, %p339_p1 }
   0x8   : > { %343 = sbr.rel (%p340_p2) target bundleno = 1306 (0x51a), region = 64 }
   0xd   : > { %v4158_v1 = vld [vmem:[%s6269_s1 + $0x38] sm:$0xff]   ;;  %p379_p3 = scmp.lt.s32.totalorder %s3759_s20, 1  ;;  %v4159_v2 = vld [vmem:[%s6269_s1 + $0x30] sm:$0xff]   ;;  %v4160_v3 = vld [vmem:[%s6269_s1 + $0x28] sm:$0xff]   ;;  %v911_v25 = vlaneseq }
   0xe   : > { %4051 = vmatprep.subr.bf16.mxu0 %v4158_v1  ;;  %v4161_v4 = vld [vmem:[%s6269_s1 + $0x20] sm:$0xff]   ;;  %v4162_v6 = vld [vmem:[%s6269_s1 + $0x18] sm:$0xff]   ;;  %v4163_v7 = vld [vmem:[%s6269_s1 + $0x10] sm:$0xff]  }
   0xf   : > { %s6669_s20 = smov (!%p379_p3, %s3759_s20), 1  ;;  %4052 = vmatpush3.bf16.msra.mxu0 %v4158_v1  ;;  %v4164_v8 = vld [vmem:[%s6269_s1 + $0x8] sm:$0xff]   ;;  %v4165_v9 = vld [vmem:[%s6269_s1] sm:$0xff]   ;;  %v4366_v26 = vshrl.u32 %v911_v25, 7 }
  0x10   : > { %4053 = vmatprep.subr.bf16.mxu0 %v4159_v2  ;;  %s3852_s26 = sshll.u32 %s6669_s20, 7  ;;  %v4386_v32 = vld [vmem:[%s6270_s2] ss:$0 sm:$0xff] }
  0x11   : > { %s4333_s29 = scalar_lea.vmem %s6268_s0, %s3852_s26  ;;  %v4369_v27 = vadd.s32 8, %v4366_v26  ;;  %v4372_v28 = vadd.s32 16, %v4366_v26  ;;  %v4375_v29 = vadd.s32 24, %v4366_v26  ;;  %v4378_v30 = vadd.s32 32, %v4366_v26  ;;  %s6205_s15 = scalar_lea.vmem %s6279_s11, %s3852_s26 }
  0x12   : > { %v391_v5 = vld [vmem:[%s4333_s29] sm:$0xff]   ;;  %v393_v10 = vld [vmem:[%s4333_s29 + $0x8] sm:$0xff]   ;;  %v395_v11 = vld [vmem:[%s4333_s29 + $0x10] sm:$0xff]   ;;  %v4381_v31 = vadd.s32 40, %v4366_v26  ;;  %v4389_v33 = vadd.s32 48, %v4366_v26  ;;  %v4392_v34 = vadd.s32 56, %v4366_v26 }
  0x13   : > { %4054 = vmatpush3.bf16.msra.mxu0 %v4159_v2  ;;  %4067 = vmatprep.mubr.bf16.mxu0 %v391_v5  ;;  %v397_v12 = vld [vmem:[%s4333_s29 + $0x18] sm:$0xff]   ;;  %v399_v13 = vld [vmem:[%s4333_s29 + $0x20] sm:$0xff]   ;;  %v401_v14 = vld [vmem:[%s4333_s29 + $0x28] sm:$0xff]   ;;  %v955_v35 = vand.u32 15, %v4369_v27  ;;  %v962_v36 = vand.u32 15, %v4372_v28  ;;  %v4397_v37 = vadd.s32 64, %v4366_v26 }
  0x14   : > { %4055 = vmatprep.subr.bf16.mxu0 %v4160_v3  ;;  %v403_v15 = vld [vmem:[%s4333_s29 + $0x30] sm:$0xff]   ;;  %v405_v16 = vld [vmem:[%s4333_s29 + $0x38] sm:$0xff]   ;;  %v407_v17 = vld [vmem:[%s4333_s29 + $0x40] sm:$0xff]   ;;  %v4400_v38 = vadd.s32 72, %v4366_v26  ;;  %v4404_v41 = vadd.s32 80, %v4366_v26  ;;  %v4407_v42 = vadd.s32 88, %v4366_v26 }
  0x15   : > { %v409_v18 = vld [vmem:[%s4333_s29 + $0x48] sm:$0xff]   ;;  %v411_v19 = vld [vmem:[%s4333_s29 + $0x50] sm:$0xff]   ;;  %v413_v20 = vld [vmem:[%s4333_s29 + $0x58] sm:$0xff]   ;;  %v4410_v43 = vadd.s32 96, %v4366_v26  ;;  %v4416_v47 = vadd.s32 104, %v4366_v26  ;;  %v4421_v51 = vadd.s32 112, %v4366_v26 }
  0x16   : > { %v415_v21 = vld [vmem:[%s4333_s29 + $0x60] sm:$0xff]   ;;  %v417_v22 = vld [vmem:[%s4333_s29 + $0x68] sm:$0xff]   ;;  %v419_v23 = vld [vmem:[%s4333_s29 + $0x70] sm:$0xff]   ;;  %v4424_v52 = vadd.s32 120, %v4366_v26  ;;  %v4433_v61 = vadd.s32 128, %v4366_v26  ;;  %v4440_v5 = vadd.s32 224, %v4366_v26 }
  0x17   : > { %4056 = vmatpush3.bf16.msra.mxu0 %v4160_v3  ;;  %v421_v24 = vld [vmem:[%s4333_s29 + $0x78] sm:$0xff]   ;;  %vm1872_vm0 = vcmp.lt.s32.totalorder %v4366_v26, 1  ;;  %vm2033_vm1 = vcmp.lt.s32.totalorder %v4366_v26, 7  ;;  %vm4499_vm2 = vcmp.eq.s32.totalorder %v962_v36, 0  ;;  %vm4505_vm3 = vcmp.eq.s32.totalorder %v955_v35, 15 }
  0x18   : > { %4057 = vmatprep.subr.bf16.mxu0 %v4161_v4 }
  0x1b   : > { %4058 = vmatpush3.bf16.msra.mxu0 %v4161_v4 }
  0x1c   : > { %4059 = vmatprep.subr.bf16.mxu0 %v4162_v6 }
  0x1f   : > { %4060 = vmatpush3.bf16.msra.mxu0 %v4162_v6  ;;  %v4443_v6 = vadd.s32 136, %v4366_v26 }
  0x20   : > { %4061 = vmatprep.subr.bf16.mxu0 %v4163_v7 }
  0x23   : > { %4062 = vmatpush3.bf16.msra.mxu0 %v4163_v7 }
  0x24   : > { %4063 = vmatprep.subr.bf16.mxu0 %v4164_v8 }
  0x27   : > { %4064 = vmatpush3.bf16.msra.mxu0 %v4164_v8 }
  0x28   : > { %4065 = vmatprep.subr.bf16.mxu0 %v4165_v9 }
  0x2b   : > { %4066 = vmatpush3.bf16.msra.mxu0 %v4165_v9 }
  0x2e   : > { %4068 = vmatmul.mubr.bf16.vlgmr.msra.gmra.mxu0 %v393_v10 }
  0x2f   : > { %4071 = vmatprep.mubr.bf16.mxu0 %v395_v11 }
  0x36   : > { %4072 = vmatmul.mubr.bf16.gmra.mxu0 %v397_v12 }
  0x37   : > { %4075 = vmatprep.mubr.bf16.mxu0 %v399_v13  ;;  %v4448_v13 = vadd.s32 232, %v4366_v26 }
  0x3e   : > { %4076 = vmatmul.mubr.bf16.gmra.mxu0 %v401_v14  ;;  %v4451_v14 = vadd.s32 240, %v4366_v26 }
  0x3f   : > { %4079 = vmatprep.mubr.bf16.mxu0 %v403_v15  ;;  %v4454_v15 = vadd.s32 248, %v4366_v26 }
  0x46   : > { %4080 = vmatmul.mubr.bf16.gmra.mxu0 %v405_v16 }
  0x47   : > { %4083 = vmatprep.mubr.bf16.mxu0 %v407_v17 }
  0x4e   : > { %4084 = vmatmul.mubr.bf16.gmra.mxu0 %v409_v18 }
  0x4f   : > { %4087 = vmatprep.mubr.bf16.mxu0 %v411_v19 }
  0x56   : > { %4088 = vmatmul.mubr.bf16.gmra.mxu0 %v413_v20  ;;  %v4459_v20 = vld [vmem:[%s6271_s3 + $0x5] ss:$0 sm:$0xff] }
  0x57   : > { %4091 = vmatprep.mubr.bf16.mxu0 %v415_v21 }
  0x5e   : > { %4092 = vmatmul.mubr.bf16.gmra.mxu0 %v417_v22 }
  0x5f   : > { %4095 = vmatprep.mubr.bf16.mxu0 %v419_v23  ;;  %v6353_v23 = vand.u32 15, %v4375_v29 }
  0x61   : > { %vm4624_vm5 = vcmp.eq.s32.totalorder %v6353_v23, 15 }
  0x66   : > { %4096 = vmatmul.mubr.bf16.gmra.mxu0 %v421_v24 }
  0xee   : > { %v4069_v39 = vpop.f32.mrf.mxu0 }
  0xef   : > { %v633_v44 = vadd.f32 %v4069_v39, %v4386_v32 }
  0xf0   : > { %v624_v48 = vpop.f32.mrf.mxu0 }
  0xf1   : > { %v753_v53 = vadd.f32 3.0, %v633_v44  ;;  %v625_v54 = vadd.f32 %v4386_v32, %v624_v48 }
  0xf2   : > { %v4070_v57 = vpop.f32.mrf.mxu0 }
  0xf3   : > { %v785_v62 = vmax.f32 %v753_v53, 0.0  ;;  %v751_v63 = vadd.f32 3.0, %v625_v54  ;;  %v636_v0 = vadd.f32 %v4070_v57, %v4386_v32 }
  0xf4   : > { %v627_v2 = vpop.f32.mrf.mxu0 }
  0xf5   : > { %v817_v7 = vmin.f32 %v785_v62, 6.0  ;;  %v783_v8 = vmax.f32 %v751_v63, 0.0  ;;  %v754_v9 = vadd.f32 3.0, %v636_v0  ;;  %v628_v10 = vadd.f32 %v4386_v32, %v627_v2 }
  0xf6   : > { %v4073_v11 = vpop.f32.mrf.mxu0 }
  0xf7   : > { %v849_v16 = vmul.f32 %v817_v7, %v633_v44  ;;  %v815_v17 = vmin.f32 %v783_v8, 6.0  ;;  %v786_v18 = vmax.f32 %v754_v9, 0.0  ;;  %v752_v19 = vadd.f32 3.0, %v628_v10  ;;  %v4472_v44 = vld [vmem:[%s6271_s3 + $0x1] ss:$0 sm:$0xff] }
  0xf8   : > { %v649_v21 = vadd.f32 %v4073_v11, %v4386_v32  ;;  %v640_v22 = vpop.f32.mrf.mxu0 }
  0xf9   : > { %v4467_v39 = vmul.f32 0.16666667, %v849_v16  ;;  %v847_v48 = vmul.f32 %v815_v17, %v625_v54  ;;  %v818_v53 = vmin.f32 %v786_v18, 6.0  ;;  %v784_v57 = vmax.f32 %v752_v19, 0.0  ;;  %v4488_v54 = vld [vmem:[%s6271_s3 + $0x9] ss:$0 sm:$0xff] }
  0xfa   : > { %v757_v62 = vadd.f32 3.0, %v649_v21  ;;  %v4475_v63 = vadd.f32 %v4386_v32, %v640_v22  ;;  %v4074_v2 = vpop.f32.mrf.mxu0 }
  0xfb   : > { %v1842_v9 = vrot.slane %v4467_v39, 7  ;;  %v2003_v11 = vrot.slane %v4467_v39, 1  ;;  %v4483_v16 = vmul.f32 %v4459_v20, %v4467_v39  ;;  %v4493_v18 = vmul.f32 %v4472_v44, %v4467_v39 }
  0xfc   : > { %v4495_v19 = vmul.f32 0.16666667, %v847_v48  ;;  %v850_v22 = vmul.f32 %v818_v53, %v636_v0  ;;  %v816_v8 = vmin.f32 %v784_v57, 6.0  ;;  %v643_v24 = vpop.f32.mrf.mxu0  ;;  %v789_v17 = vmax.f32 %v757_v62, 0.0 }
  0xfd   : > { %6334 = vst [vmem:[#allocation3_spill] sm:$0xff] %v4483_v16  ;;  %6335 = vst [vmem:[#allocation4_spill] sm:$0xff] %v4493_v18  ;;  %v755_v25 = vadd.f32 3.0, %v4475_v63  ;;  %v4511_v48 = vadd.f32 %v4074_v2, %v4386_v32  ;;  %v4514_v0 = vadd.f32 %v4386_v32, %v643_v24  ;;  %v4518_v28 = vmul.f32 %v4488_v54, %v4467_v39  ;;  %v4535_v39 = vld [vmem:[%s6271_s3 + $0x4] ss:$0 sm:$0xff] }
  0xfe   : > { %v4524_v35 = vmul.f32 %v4459_v20, %v4495_v19  ;;  %v4077_v53 = vpop.f32.mrf.mxu0  ;;  %v4526_v57 = vmul.f32 0.16666667, %v850_v22  ;;  %v848_v62 = vmul.f32 %v816_v8, %v628_v10  ;;  %v821_v2 = vmin.f32 %v789_v17, 6.0  ;;  %v4549_v17 = vld [vmem:[%s6271_s3] ss:$0 sm:$0xff] }
  0xff   : > { %6340 = vst [vmem:[#allocation5_spill] sm:$0xff] %v4518_v28  ;;  %v787_v4 = vmax.f32 %v755_v25, 0.0  ;;  %v4530_v24 = vmul.f32 %v4472_v44, %v4495_v19  ;;  %v758_v12 = vadd.f32 3.0, %v4511_v48  ;;  %v756_v1 = vadd.f32 3.0, %v4514_v0 }
 0x100   : > { %6341 = vst [vmem:[#allocation6_spill] sm:$0xff] %v4524_v35  ;;  %v4540_v3 = vadd.f32 %v4077_v53, %v4386_v32  ;;  %v656_v22 = vpop.f32.mrf.mxu0  ;;  %v6280_v10 = vrot.slane %v4526_v57, 7  ;;  %v6281_v25 = vrot.slane %v4526_v57, 1  ;;  %v2208_v8 = vmul.f32 %v4459_v20, %v4526_v57  ;;  %v4556_v53 = vld [vmem:[%s6271_s3 + $0x8] ss:$0 sm:$0xff] }
 0x101   : > { %v2383_v59 = vmul.f32 %v4472_v44, %v4526_v57  ;;  %v2687_v60 = vmul.f32 %v4488_v54, %v4526_v57  ;;  %v880_v56 = vmul.f32 0.16666667, %v848_v62  ;;  %v853_v58 = vmul.f32 %v821_v2, %v649_v21 }
 0x102   : > { %v819_v50 = vmin.f32 %v787_v4, 6.0  ;;  %v1901_v55 = vsel %vm1872_vm0, %v1842_v9, %v6280_v10  ;;  %v4568_v46 = vsel %vm2033_vm1, %v2003_v11, %v6281_v25  ;;  %v790_v49 = vmax.f32 %v758_v12, 0.0  ;;  %v4078_v62 = vpop.f32.mrf.mxu0 }
 0x103   : > { %6342 = vst [vmem:[#allocation7_spill] sm:$0xff] %v4568_v46  ;;  %v788_v40 = vmax.f32 %v756_v1, 0.0  ;;  %v2171_v45 = vmul.f32 %v4535_v39, %v1901_v55  ;;  %v2346_v27 = vmul.f32 %v4549_v17, %v1901_v55  ;;  %v2650_v21 = vmul.f32 %v4556_v53, %v1901_v55 }
 0x104   : > { %v1841_v4 = vrot.slane %v880_v56, 7  ;;  %v2002_v2 = vrot.slane %v880_v56, 1  ;;  %v2206_v36 = vmul.f32 %v4459_v20, %v880_v56  ;;  %v2381_v10 = vmul.f32 %v4472_v44, %v880_v56 }
 0x105   : > { %v4575_v28 = vmul.f32 0.16666667, %v853_v58  ;;  %v4577_v35 = vadd.f32 %v2208_v8, %v2171_v45  ;;  %v4579_v25 = vadd.f32 %v2383_v59, %v2346_v27  ;;  %v4581_v1 = vadd.f32 %v2687_v60, %v2650_v21  ;;  %v4600_v59 = vld [vmem:[%s6271_s3 + $0x6] ss:$0 sm:$0xff]  ;;  %v4614_v27 = vld [vmem:[%s6271_s3 + $0x2] ss:$0 sm:$0xff] }
 0x106   : > { %v1902_v12 = vsel %vm1872_vm0, %v1841_v4, %v1842_v9  ;;  %v6346_v55 = vrot.slane %v4495_v19, 7  ;;  %v2063_v56 = vsel %vm2033_vm1, %v2002_v2, %v2003_v11  ;;  %v6347_v45 = vrot.slane %v4495_v19, 1 }
 0x107   : > { %6343 = vst [vmem:[#allocation8_spill] sm:$0xff] %v4577_v35  ;;  %6344 = vst [vmem:[#allocation9_spill] sm:$0xff] %v4579_v25  ;;  %v1971_v46 = vsel %vm4499_vm2, 0.0, %v1902_v12  ;;  %v2131_v60 = vsel %vm4505_vm3, 0.0, %v2063_v56  ;;  %v6350_v8 = vand.u32 15, %v4378_v30  ;;  %v4648_v35 = vmul.f32 %v4472_v44, %v4575_v28 }
 0x108   : > { %6345 = vst [vmem:[#allocation10_spill] sm:$0xff] %v4581_v1  ;;  %v1903_v16 = vsel %vm1872_vm0, %v6346_v55, %v1841_v4  ;;  %v2064_v58 = vsel %vm2033_vm1, %v6347_v45, %v2002_v2  ;;  %v4606_v7 = vmul.f32 %v4535_v39, %v1971_v46  ;;  %v659_v2 = vpop.f32.mrf.mxu0  ;;  %v2275_v12 = vmul.f32 %v4600_v59, %v2131_v60 }
 0x109   : > { %v2169_v9 = vmul.f32 %v4535_v39, %v1903_v16  ;;  %v4609_v11 = vmul.f32 %v4600_v59, %v2064_v58  ;;  %vm4618_vm4 = vcmp.eq.s32.totalorder %v6350_v8, 0  ;;  %v2344_v55 = vmul.f32 %v4549_v17, %v1903_v16  ;;  %6360 = vst [vmem:[#allocation17_spill] sm:$0xff] %v4648_v35 }
 0x10a   : > { %6348 = vst [vmem:[#allocation11_spill] sm:$0xff] %v4606_v7  ;;  %v4631_v56 = vmul.f32 %v4549_v17, %v1971_v46  ;;  %v4634_v30 = vmul.f32 %v4614_v27, %v2064_v58  ;;  %v2450_v8 = vmul.f32 %v4614_v27, %v2131_v60  ;;  %v4638_v29 = vmul.f32 %v4556_v53, %v1971_v46 }
 0x10b   : > { %6349 = vst [vmem:[#allocation12_spill] sm:$0xff] %v4609_v11  ;;  %v2238_v45 = vadd.f32 %v2206_v36, %v2169_v9  ;;  %v2413_v1 = vadd.f32 %v2381_v10, %v2344_v55  ;;  %v4644_v16 = vmul.f32 %v4459_v20, %v4575_v28  ;;  %v4654_v36 = vmul.f32 %v4488_v54, %v4575_v28  ;;  %v4081_v10 = vpop.f32.mrf.mxu0 }
 0x10c   : > { %6356 = vst [vmem:[#allocation13_spill] sm:$0xff] %v4631_v56  ;;  %6357 = vst [vmem:[#allocation14_spill] sm:$0xff] %v4634_v30  ;;  %v851_v46 = vmul.f32 %v819_v50, %v4475_v63  ;;  %v822_v60 = vmin.f32 %v790_v49, 6.0  ;;  %v820_v55 = vmin.f32 %v788_v40, 6.0  ;;  %v761_v11 = vadd.f32 3.0, %v4540_v3 }
 0x10d   : > { %6358 = vst [vmem:[#allocation15_spill] sm:$0xff] %v4638_v29  ;;  %6359 = vst [vmem:[#allocation16_spill] sm:$0xff] %v4644_v16  ;;  %v4650_v58 = vadd.f32 %v2275_v12, %v2238_v45  ;;  %v4657_v9 = vadd.f32 %v2450_v8, %v2413_v1  ;;  %v4661_v23 = vadd.f32 %v4386_v32, %v656_v22  ;;  %v6364_v50 = vand.u32 15, %v4389_v33  ;;  %v672_v7 = vpop.f32.mrf.mxu0 }
 0x10e   : > { %6362 = vst [vmem:[#allocation19_spill] sm:$0xff] %v4654_v36  ;;  %v883_v29 = vmul.f32 0.16666667, %v851_v46  ;;  %v854_v12 = vmul.f32 %v822_v60, %v4511_v48  ;;  %v4665_v45 = vadd.f32 %v4078_v62, %v4386_v32  ;;  %v852_v49 = vmul.f32 %v820_v55, %v4514_v0 }
 0x10f   : > { %6361 = vst [vmem:[#allocation18_spill] sm:$0xff] %v4650_v58  ;;  %6363 = vst [vmem:[#allocation20_spill] sm:$0xff] %v4657_v9  ;;  %v4668_v58 = vadd.f32 %v4386_v32, %v659_v2  ;;  %vm4673_vm6 = vcmp.eq.s32.totalorder %v6364_v50, 0  ;;  %v793_v63 = vmax.f32 %v761_v11, 0.0  ;;  %v759_v22 = vadd.f32 3.0, %v4661_v23 }
 0x110   : > { %v4679_v1 = vadd.f32 %v4081_v10, %v4386_v32  ;;  %v1844_v48 = vrot.slane %v883_v29, 7  ;;  %v2005_v62 = vrot.slane %v883_v29, 1  ;;  %v2209_v8 = vmul.f32 %v4459_v20, %v883_v29 }
 0x111   : > { %v2384_v2 = vmul.f32 %v4472_v44, %v883_v29  ;;  %v6367_v0 = vand.u32 15, %v4381_v31  ;;  %v2688_v46 = vmul.f32 %v4488_v54, %v883_v29  ;;  %v4690_v11 = vmul.f32 0.16666667, %v854_v12 }
 0x112   : > { %v884_v60 = vmul.f32 0.16666667, %v852_v49  ;;  %v825_v55 = vmin.f32 %v793_v63, 6.0  ;;  %v6370_v10 = vrot.slane %v4526_v57, 7  ;;  %v6371_v9 = vrot.slane %v4526_v57, 1 }
 0x113   : > { %vm4685_vm7 = vcmp.eq.s32.totalorder %v6367_v0, 15  ;;  %v791_v0 = vmax.f32 %v759_v22, 0.0  ;;  %v762_v30 = vadd.f32 3.0, %v4665_v45  ;;  %v6284_v49 = vrot.slane %v4690_v11, 7 }
 0x114   : > { %v1900_v50 = vsel %vm1872_vm0, %v6370_v10, %v1844_v48  ;;  %v2061_v31 = vsel %vm2033_vm1, %v6371_v9, %v2005_v62  ;;  %v6285_v63 = vrot.slane %v4690_v11, 1  ;;  %v2212_v22 = vmul.f32 %v4459_v20, %v4690_v11 }
 0x115   : > { %v1973_v29 = vsel %vm4618_vm4, 0.0, %v1900_v50  ;;  %v4705_v12 = vsel %vm4624_vm5, 0.0, %v2061_v31  ;;  %v6373_v21 = vrot.slane %v4575_v28, 7  ;;  %v6374_v50 = vrot.slane %v4575_v28, 1 }
 0x116   : > { %6372 = vst [vmem:[#allocation21_spill] sm:$0xff] %v4705_v12  ;;  %v2172_v10 = vmul.f32 %v4535_v39, %v1973_v29  ;;  %v2347_v57 = vmul.f32 %v4549_v17, %v1973_v29  ;;  %v2651_v9 = vmul.f32 %v4556_v53, %v1973_v29  ;;  %v2387_v29 = vmul.f32 %v4472_v44, %v4690_v11 }
 0x117   : > { %v1897_v4 = vsel %vm1872_vm0, %v6373_v21, %v6284_v49  ;;  %v4726_v31 = vsel %vm2033_vm1, %v6374_v50, %v6285_v63  ;;  %v2691_v36 = vmul.f32 %v4488_v54, %v4690_v11  ;;  %v1845_v50 = vrot.slane %v884_v60, 7 }
 0x118   : > { %6375 = vst [vmem:[#allocation22_spill] sm:$0xff] %v4726_v31  ;;  %v4732_v25 = vadd.f32 %v2209_v8, %v2172_v10  ;;  %v4734_v12 = vadd.f32 %v2384_v2, %v2347_v57  ;;  %v4736_v18 = vadd.f32 %v2688_v46, %v2651_v9  ;;  %v2175_v21 = vmul.f32 %v4535_v39, %v1897_v4  ;;  %v4082_v2 = vpop.f32.mrf.mxu0 }
 0x119   : > { %v2350_v49 = vmul.f32 %v4549_v17, %v1897_v4  ;;  %v2654_v56 = vmul.f32 %v4556_v53, %v1897_v4  ;;  %v2006_v63 = vrot.slane %v884_v60, 1  ;;  %v2210_v35 = vmul.f32 %v4459_v20, %v884_v60 }
 0x11a   : > { %6376 = vst [vmem:[#allocation23_spill] sm:$0xff] %v4732_v25  ;;  %6377 = vst [vmem:[#allocation24_spill] sm:$0xff] %v4734_v12  ;;  %v4741_v16 = vadd.f32 %v2212_v22, %v2175_v21  ;;  %v2385_v31 = vmul.f32 %v4472_v44, %v884_v60  ;;  %v2689_v8 = vmul.f32 %v4488_v54, %v884_v60  ;;  %v6382_v57 = vrot.slane %v4575_v28, 7 }
 0x11b   : > { %6378 = vst [vmem:[#allocation25_spill] sm:$0xff] %v4736_v18  ;;  %v4746_v10 = vadd.f32 %v2387_v29, %v2350_v49  ;;  %v4748_v46 = vadd.f32 %v2691_v36, %v2654_v56  ;;  %v1899_v22 = vsel %vm1872_vm0, %v1844_v48, %v1845_v50  ;;  %v6384_v21 = vrot.slane %v4575_v28, 1 }
 0x11c   : > { %6379 = vst [vmem:[#allocation26_spill] sm:$0xff] %v4741_v16  ;;  %v1898_v9 = vsel %vm1872_vm0, %v1845_v50, %v6382_v57  ;;  %v4766_v56 = vsel %vm2033_vm1, %v2005_v62, %v2006_v63  ;;  %v2173_v36 = vmul.f32 %v4535_v39, %v1899_v22  ;;  %v6386_v49 = vand.u32 15, %v4397_v37 }
 0x11d   : > { %6380 = vst [vmem:[#allocation27_spill] sm:$0xff] %v4746_v10  ;;  %6381 = vst [vmem:[#allocation28_spill] sm:$0xff] %v4748_v46  ;;  %v4758_v4 = vsel %vm4673_vm6, 0.0, %v1898_v9  ;;  %v2059_v60 = vsel %vm2033_vm1, %v2006_v63, %v6384_v21  ;;  %v6389_v40 = vand.u32 15, %v4392_v34  ;;  %v2348_v62 = vmul.f32 %v4549_v17, %v1899_v22  ;;  %v675_v21 = vpop.f32.mrf.mxu0 }
 0x11e   : > { %6383 = vst [vmem:[#allocation29_spill] sm:$0xff] %v4758_v4  ;;  %6385 = vst [vmem:[#allocation30_spill] sm:$0xff] %v4766_v56  ;;  %vm4771_vm8 = vcmp.eq.s32.totalorder %v6386_v49, 0  ;;  %v4783_v28 = vsel %vm4685_vm7, 0.0, %v2059_v60  ;;  %v2652_v63 = vmul.f32 %v4556_v53, %v1899_v22  ;;  %v857_v37 = vmul.f32 %v825_v55, %v4540_v3 }
 0x11f   : > { %vm4777_vm9 = vcmp.eq.s32.totalorder %v6389_v40, 15  ;;  %6392 = vst [vmem:[#allocation31_spill] sm:$0xff] %v4783_v28  ;;  %v4788_v50 = vadd.f32 %v2210_v35, %v2173_v36  ;;  %v823_v57 = vmin.f32 %v791_v0, 6.0  ;;  %v794_v9 = vmax.f32 %v762_v30, 0.0  ;;  %v4817_v36 = vpop.f32.mrf.mxu0 }
 0x120   : > { %v760_v34 = vadd.f32 3.0, %v4668_v58  ;;  %v4791_v49 = vadd.f32 %v2385_v31, %v2348_v62  ;;  %v4793_v40 = vadd.f32 %v2689_v8, %v2652_v63  ;;  %v4795_v33 = vmul.f32 0.16666667, %v857_v37 }
 0x121   : > { %6393 = vst [vmem:[#allocation32_spill] sm:$0xff] %v4788_v50  ;;  %v765_v60 = vadd.f32 3.0, %v4679_v1  ;;  %v855_v18 = vmul.f32 %v823_v57, %v4661_v23  ;;  %v826_v22 = vmin.f32 %v794_v9, 6.0  ;;  %v4800_v3 = vadd.f32 %v4386_v32, %v672_v7 }
 0x122   : > { %6394 = vst [vmem:[#allocation33_spill] sm:$0xff] %v4791_v49  ;;  %6395 = vst [vmem:[#allocation34_spill] sm:$0xff] %v4793_v40  ;;  %v792_v46 = vmax.f32 %v760_v34, 0.0  ;;  %v4806_v55 = vmul.f32 %v4459_v20, %v4795_v33  ;;  %v4810_v0 = vmul.f32 %v4472_v44, %v4795_v33  ;;  %v4814_v23 = vmul.f32 %v4488_v54, %v4795_v33 }
 0x123   : > { %v887_v31 = vmul.f32 0.16666667, %v855_v18  ;;  %v858_v7 = vmul.f32 %v826_v22, %v4665_v45  ;;  %v797_v62 = vmax.f32 %v765_v60, 0.0  ;;  %v763_v63 = vadd.f32 3.0, %v4800_v3 }
 0x124   : > { %6396 = vst [vmem:[#allocation35_spill] sm:$0xff] %v4806_v55  ;;  %6397 = vst [vmem:[#allocation36_spill] sm:$0xff] %v4814_v23  ;;  %v824_v8 = vmin.f32 %v792_v46, 6.0  ;;  %v4821_v37 = vadd.f32 %v4082_v2, %v4386_v32  ;;  %v4824_v57 = vadd.f32 %v4386_v32, %v675_v21  ;;  %v6398_v22 = vand.u32 15, %v4404_v41 }
 0x125   : > { %v1848_v9 = vrot.slane %v887_v31, 7  ;;  %v2009_v34 = vrot.slane %v887_v31, 1  ;;  %v2213_v30 = vmul.f32 %v4459_v20, %v887_v31  ;;  %v2388_v18 = vmul.f32 %v4472_v44, %v887_v31 }
 0x126   : > { %v2692_v45 = vmul.f32 %v4488_v54, %v887_v31  ;;  %v4829_v46 = vmul.f32 0.16666667, %v858_v7  ;;  %v856_v60 = vmul.f32 %v824_v8, %v4668_v58  ;;  %vm4834_vm10 = vcmp.eq.s32.totalorder %v6398_v22, 0  ;;  %v688_v22 = vpop.f32.mrf.mxu0 }
 0x127   : > { %v6401_v21 = vand.u32 15, %v4400_v38  ;;  %v829_v40 = vmin.f32 %v797_v62, 6.0  ;;  %v6404_v50 = vrot.slane %v4690_v11, 7  ;;  %v6405_v58 = vrot.slane %v4690_v11, 1 }
 0x128   : > { %v795_v7 = vmax.f32 %v763_v63, 0.0  ;;  %v766_v8 = vadd.f32 3.0, %v4821_v37  ;;  %v6407_v29 = vrot.slane %v4795_v33, 7  ;;  %v2695_v49 = vmul.f32 %v4488_v54, %v4829_v46 }
 0x129   : > { %vm4840_vm11 = vcmp.eq.s32.totalorder %v6401_v21, 15  ;;  %v1896_v31 = vsel %vm1872_vm0, %v6404_v50, %v1848_v9  ;;  %v2057_v41 = vsel %vm2033_vm1, %v6405_v58, %v2009_v34  ;;  %v6288_v21 = vrot.slane %v4829_v46, 7 }
 0x12a   : > { %v1977_v38 = vsel %vm4771_vm8, 0.0, %v1896_v31  ;;  %v4857_v62 = vsel %vm4777_vm9, 0.0, %v2057_v41  ;;  %v6290_v50 = vrot.slane %v4829_v46, 1  ;;  %v2216_v58 = vmul.f32 %v4459_v20, %v4829_v46 }
 0x12b   : > { %6406 = vst [vmem:[#allocation37_spill] sm:$0xff] %v4857_v62  ;;  %v2176_v11 = vmul.f32 %v4535_v39, %v1977_v38  ;;  %v2351_v25 = vmul.f32 %v4549_v17, %v1977_v38  ;;  %v2655_v63 = vmul.f32 %v4556_v53, %v1977_v38  ;;  %v1893_v48 = vsel %vm1872_vm0, %v6407_v29, %v6288_v21  ;;  %v4086_v21 = vpop.f32.mrf.mxu0 }
 0x12c   : > { %v6408_v31 = vrot.slane %v4795_v33, 1  ;;  %v2391_v38 = vmul.f32 %v4472_v44, %v4829_v46  ;;  %v2179_v29 = vmul.f32 %v4535_v39, %v1893_v48  ;;  %v2354_v56 = vmul.f32 %v4549_v17, %v1893_v48 }
 0x12d   : > { %v4884_v12 = vadd.f32 %v2213_v30, %v2176_v11  ;;  %v4886_v16 = vadd.f32 %v2388_v18, %v2351_v25  ;;  %v4888_v28 = vadd.f32 %v2692_v45, %v2655_v63  ;;  %v861_v23 = vmul.f32 %v829_v40, %v4679_v1  ;;  %v691_v1 = vpop.f32.mrf.mxu0 }
 0x12e   : > { %v4878_v41 = vsel %vm2033_vm1, %v6408_v31, %v6290_v50  ;;  %v2658_v31 = vmul.f32 %v4556_v53, %v1893_v48  ;;  %v888_v50 = vmul.f32 0.16666667, %v856_v60  ;;  %v4894_v10 = vadd.f32 %v2216_v58, %v2179_v29 }
 0x12f   : > { %6409 = vst [vmem:[#allocation38_spill] sm:$0xff] %v4884_v12  ;;  %6410 = vst [vmem:[#allocation39_spill] sm:$0xff] %v4886_v16  ;;  %v827_v62 = vmin.f32 %v795_v7, 6.0  ;;  %v798_v4 = vmax.f32 %v766_v8, 0.0  ;;  %v764_v30 = vadd.f32 3.0, %v4824_v57  ;;  %v4897_v25 = vadd.f32 %v2391_v38, %v2354_v56 }
 0x130   : > { %6411 = vst [vmem:[#allocation40_spill] sm:$0xff] %v4888_v28  ;;  %6412 = vst [vmem:[#allocation41_spill] sm:$0xff] %v4894_v10  ;;  %v4899_v18 = vadd.f32 %v2695_v49, %v2658_v31  ;;  %v1849_v45 = vrot.slane %v888_v50, 7  ;;  %v2010_v11 = vrot.slane %v888_v50, 1  ;;  %v2214_v63 = vmul.f32 %v4459_v20, %v888_v50 }
 0x131   : > { %6413 = vst [vmem:[#allocation42_spill] sm:$0xff] %v4897_v25  ;;  %v2389_v28 = vmul.f32 %v4472_v44, %v888_v50  ;;  %v2693_v60 = vmul.f32 %v4488_v54, %v888_v50  ;;  %v4904_v48 = vmul.f32 0.16666667, %v861_v23  ;;  %v6415_v40 = vrot.slane %v4795_v33, 7 }
 0x132   : > { %6414 = vst [vmem:[#allocation43_spill] sm:$0xff] %v4899_v18  ;;  %v1895_v56 = vsel %vm1872_vm0, %v1848_v9, %v1849_v45  ;;  %v6416_v49 = vrot.slane %v4795_v33, 1  ;;  %v4918_v58 = vsel %vm2033_vm1, %v2009_v34, %v2010_v11  ;;  %v6418_v23 = vand.u32 15, %v4410_v43 }
 0x133   : > { %v1894_v7 = vsel %vm1872_vm0, %v1849_v45, %v6415_v40  ;;  %6417 = vst [vmem:[#allocation44_spill] sm:$0xff] %v4918_v58  ;;  %v6421_v38 = vand.u32 15, %v4407_v42  ;;  %v2177_v43 = vmul.f32 %v4535_v39, %v1895_v56  ;;  %v2352_v34 = vmul.f32 %v4549_v17, %v1895_v56 }
 0x134   : > { %v2055_v8 = vsel %vm2033_vm1, %v2010_v11, %v6416_v49  ;;  %vm4922_vm12 = vcmp.eq.s32.totalorder %v6418_v23, 0  ;;  %v4934_v33 = vsel %vm4834_vm10, 0.0, %v1894_v7  ;;  %v2656_v31 = vmul.f32 %v4556_v53, %v1895_v56  ;;  %v4089_v56 = vpop.f32.mrf.mxu0 }
 0x135   : > { %vm4928_vm13 = vcmp.eq.s32.totalorder %v6421_v38, 15  ;;  %v4938_v9 = vsel %vm4840_vm11, 0.0, %v2055_v8  ;;  %v4947_v11 = vmul.f32 %v4459_v20, %v4904_v48  ;;  %v4949_v2 = vadd.f32 %v2214_v63, %v2177_v43 }
 0x136   : > { %6424 = vst [vmem:[#allocation45_spill] sm:$0xff] %v4938_v9  ;;  %v4951_v40 = vadd.f32 %v2389_v28, %v2352_v34  ;;  %v4955_v35 = vmul.f32 %v4472_v44, %v4904_v48  ;;  %v4959_v7 = vmul.f32 %v4488_v54, %v4904_v48  ;;  %v4961_v49 = vadd.f32 %v2693_v60, %v2656_v31 }
 0x137   : > { %6425 = vst [vmem:[#allocation46_spill] sm:$0xff] %v4949_v2  ;;  %v859_v8 = vmul.f32 %v827_v62, %v4800_v3  ;;  %v830_v23 = vmin.f32 %v798_v4, 6.0  ;;  %v796_v38 = vmax.f32 %v764_v30, 0.0  ;;  %v697_v63 = vadd.f32 %v4817_v36, %v4386_v32 }
 0x138   : > { %6426 = vst [vmem:[#allocation47_spill] sm:$0xff] %v4951_v40  ;;  %6427 = vst [vmem:[#allocation48_spill] sm:$0xff] %v4955_v35  ;;  %v689_v28 = vadd.f32 %v4386_v32, %v688_v22  ;;  %v4968_v43 = vadd.f32 %v4086_v21, %v4386_v32  ;;  %v4971_v34 = vadd.f32 %v4386_v32, %v691_v1  ;;  %v4983_v21 = vpop.f32.mrf.mxu0  ;;  %v6430_v42 = vand.u32 15, %v4421_v51 }
 0x139   : > { %6428 = vst [vmem:[#allocation49_spill] sm:$0xff] %v4959_v7  ;;  %6429 = vst [vmem:[#allocation50_spill] sm:$0xff] %v4961_v49  ;;  %v4973_v45 = vmul.f32 0.16666667, %v859_v8  ;;  %v862_v60 = vmul.f32 %v830_v23, %v4821_v37  ;;  %v828_v31 = vmin.f32 %v796_v38, 6.0  ;;  %v4977_v3 = vadd.f32 %v4089_v56, %v4386_v32 }
 0x13a   : > { %v769_v4 = vadd.f32 3.0, %v697_v63  ;;  %v767_v62 = vadd.f32 3.0, %v689_v28  ;;  %v770_v36 = vadd.f32 3.0, %v4968_v43  ;;  %v4981_v22 = vadd.f32 3.0, %v4971_v34  ;;  %v5024_v40 = vpop.f32.mrf.mxu0 }
 0x13b   : > { %v1852_v30 = vrot.slane %v4973_v45, 7  ;;  %v2013_v1 = vrot.slane %v4973_v45, 1  ;;  %v2217_v37 = vmul.f32 %v4459_v20, %v4973_v45  ;;  %v2392_v56 = vmul.f32 %v4472_v44, %v4973_v45 }
 0x13c   : > { %v2696_v8 = vmul.f32 %v4488_v54, %v4973_v45  ;;  %v4993_v23 = vmul.f32 0.16666667, %v862_v60  ;;  %v860_v38 = vmul.f32 %v828_v31, %v4824_v57  ;;  %vm4998_vm14 = vcmp.eq.s32.totalorder %v6430_v42, 0  ;;  %v5063_v55 = vpop.f32.mrf.mxu0 }
 0x13d   : > { %v6433_v49 = vand.u32 15, %v4416_v47  ;;  %v801_v2 = vmax.f32 %v769_v4, 0.0  ;;  %v6436_v12 = vrot.slane %v4829_v46, 7  ;;  %v6437_v57 = vrot.slane %v4829_v46, 1 }
 0x13e   : > { %v799_v42 = vmax.f32 %v767_v62, 0.0  ;;  %v802_v60 = vmax.f32 %v770_v36, 0.0  ;;  %v6293_v31 = vrot.slane %v4993_v23, 7  ;;  %v6294_v4 = vrot.slane %v4993_v23, 1 }
 0x13f   : > { %vm5004_vm15 = vcmp.eq.s32.totalorder %v6433_v49, 15  ;;  %v1892_v45 = vsel %vm1872_vm0, %v6436_v12, %v1852_v30  ;;  %v2053_v51 = vsel %vm2033_vm1, %v6437_v57, %v2013_v1  ;;  %v2220_v50 = vmul.f32 %v4459_v20, %v4993_v23 }
 0x140   : > { %v1981_v47 = vsel %vm4922_vm12, 0.0, %v1892_v45  ;;  %v5020_v49 = vsel %vm4928_vm13, 0.0, %v2053_v51  ;;  %v6438_v29 = vrot.slane %v4904_v48, 7  ;;  %v6440_v45 = vrot.slane %v4904_v48, 1 }
 0x141   : > { %v2180_v12 = vmul.f32 %v4535_v39, %v1981_v47  ;;  %v2355_v46 = vmul.f32 %v4549_v17, %v1981_v47  ;;  %v2659_v62 = vmul.f32 %v4556_v53, %v1981_v47  ;;  %v5049_v51 = vmul.f32 %v4472_v44, %v4993_v23 }
 0x142   : > { %v5037_v36 = vsel %vm1872_vm0, %v6438_v29, %v6293_v31  ;;  %v5045_v57 = vsel %vm2033_vm1, %v6440_v45, %v6294_v4  ;;  %v2699_v47 = vmul.f32 %v4488_v54, %v4993_v23  ;;  %v892_v4 = vmul.f32 0.16666667, %v860_v38 }
 0x143   : > { %6439 = vst [vmem:[#allocation51_spill] sm:$0xff] %v5037_v36  ;;  %6441 = vst [vmem:[#allocation52_spill] sm:$0xff] %v5045_v57  ;;  %v5053_v16 = vadd.f32 %v2217_v37, %v2180_v12  ;;  %v5055_v10 = vadd.f32 %v2392_v56, %v2355_v46  ;;  %v5057_v29 = vadd.f32 %v2696_v8, %v2659_v62  ;;  %v833_v9 = vmin.f32 %v801_v2, 6.0 }
 0x144   : > { %6442 = vst [vmem:[#allocation53_spill] sm:$0xff] %v5049_v51  ;;  %v2183_v31 = vmul.f32 %v4535_v39, %v5037_v36  ;;  %v2662_v45 = vmul.f32 %v4556_v53, %v5037_v36  ;;  %v831_v58 = vmin.f32 %v799_v42, 6.0  ;;  %v6444_v37 = vand.u32 15, %v4433_v61 }
 0x145   : > { %6443 = vst [vmem:[#allocation54_spill] sm:$0xff] %v5057_v29  ;;  %v6447_v8 = vand.u32 15, %v4424_v52  ;;  %v834_v46 = vmin.f32 %v802_v60, 6.0  ;;  %v800_v2 = vmax.f32 %v4981_v22, 0.0  ;;  %v773_v38 = vadd.f32 3.0, %v4977_v3 }
 0x146   : > { %v5065_v51 = vadd.f32 %v2220_v50, %v2183_v31  ;;  %vm5069_vm2 = vcmp.eq.s32.totalorder %v6444_v37, 0  ;;  %v5081_v42 = vadd.f32 %v2699_v47, %v2662_v45  ;;  %v1853_v31 = vrot.slane %v892_v4, 7 }
 0x147   : > { %vm5075_vm3 = vcmp.eq.s32.totalorder %v6447_v8, 15  ;;  %v2014_v62 = vrot.slane %v892_v4, 1  ;;  %v2218_v61 = vmul.f32 %v4459_v20, %v892_v4  ;;  %v2393_v50 = vmul.f32 %v4472_v44, %v892_v4 }
 0x148   : > { %6450 = vst [vmem:[#allocation55_spill] sm:$0xff] %v5081_v42  ;;  %v2697_v37 = vmul.f32 %v4488_v54, %v892_v4  ;;  %v865_v52 = vmul.f32 %v833_v9, %v697_v63  ;;  %v863_v8 = vmul.f32 %v831_v58, %v689_v28  ;;  %v6451_v36 = vrot.slane %v4904_v48, 7  ;;  %v4093_v4 = vpop.f32.mrf.mxu0 }
 0x149   : > { %v1891_v22 = vsel %vm1872_vm0, %v1852_v30, %v1853_v31  ;;  %v6452_v47 = vrot.slane %v4904_v48, 1  ;;  %v5098_v29 = vsel %vm2033_vm1, %v2013_v1, %v2014_v62  ;;  %v866_v1 = vmul.f32 %v834_v46, %v4968_v43 }
 0x14a   : > { %v1890_v60 = vsel %vm1872_vm0, %v1853_v31, %v6451_v36  ;;  %v2181_v63 = vmul.f32 %v4535_v39, %v1891_v22  ;;  %v2356_v48 = vmul.f32 %v4549_v17, %v1891_v22  ;;  %v2660_v28 = vmul.f32 %v4556_v53, %v1891_v22 }
 0x14b   : > { %v2051_v45 = vsel %vm2033_vm1, %v2014_v62, %v6452_v47  ;;  %v5102_v58 = vsel %vm4998_vm14, 0.0, %v1890_v60  ;;  %v5111_v30 = vmul.f32 0.16666667, %v865_v52  ;;  %v895_v36 = vmul.f32 0.16666667, %v863_v8  ;;  %v720_v52 = vpop.f32.mrf.mxu0 }
 0x14c   : > { %6453 = vst [vmem:[#allocation56_spill] sm:$0xff] %v5102_v58  ;;  %v5106_v9 = vsel %vm5004_vm15, 0.0, %v2051_v45  ;;  %v5114_v31 = vadd.f32 %v2218_v61, %v2181_v63  ;;  %v5116_v35 = vadd.f32 %v2393_v50, %v2356_v48  ;;  %v832_v62 = vmin.f32 %v800_v2, 6.0 }
 0x14d   : > { %6454 = vst [vmem:[#allocation57_spill] sm:$0xff] %v5111_v30  ;;  %v805_v60 = vmax.f32 %v773_v38, 0.0  ;;  %v5118_v18 = vadd.f32 %v2697_v37, %v2660_v28  ;;  %v1858_v47 = vrot.slane %v5111_v30, 7  ;;  %v5124_v22 = vmul.f32 %v4459_v20, %v5111_v30 }
 0x14e   : > { %v5128_v43 = vmul.f32 %v4472_v44, %v5111_v30  ;;  %v5132_v46 = vmul.f32 %v4488_v54, %v5111_v30  ;;  %v1856_v2 = vrot.slane %v895_v36, 7  ;;  %v2017_v38 = vrot.slane %v895_v36, 1 }
 0x14f   : > { %6455 = vst [vmem:[#allocation58_spill] sm:$0xff] %v5118_v18  ;;  %6456 = vst [vmem:[#allocation59_spill] sm:$0xff] %v5124_v22  ;;  %v5135_v61 = vmul.f32 %v4459_v20, %v895_v36  ;;  %v5138_v50 = vmul.f32 %v4472_v44, %v895_v36  ;;  %v2700_v37 = vmul.f32 %v4488_v54, %v895_v36  ;;  %v5141_v8 = vmul.f32 0.16666667, %v866_v1  ;;  %v4094_v22 = vpop.f32.mrf.mxu0 }
 0x150   : > { %6457 = vst [vmem:[#allocation60_spill] sm:$0xff] %v5128_v43  ;;  %6458 = vst [vmem:[#allocation61_spill] sm:$0xff] %v5132_v46  ;;  %v6462_v63 = vrot.slane %v4993_v23, 7  ;;  %v6463_v28 = vrot.slane %v4993_v23, 1  ;;  %v864_v46 = vmul.f32 %v832_v62, %v4971_v34 }
 0x151   : > { %6459 = vst [vmem:[#allocation62_spill] sm:$0xff] %v5135_v61  ;;  %6460 = vst [vmem:[#allocation63_spill] sm:$0xff] %v5138_v50  ;;  %v837_v61 = vmin.f32 %v805_v60, 6.0  ;;  %v6300_v1 = vrot.slane %v5141_v8, 7  ;;  %v5166_v34 = vmul.f32 %v4459_v20, %v5141_v8  ;;  %v5170_v56 = vmul.f32 %v4472_v44, %v5141_v8 }
 0x152   : > { %6461 = vst [vmem:[#allocation64_spill] sm:$0xff] %v5141_v8  ;;  %v1888_v48 = vsel %vm1872_vm0, %v6462_v63, %v1856_v2  ;;  %v2049_v45 = vsel %vm2033_vm1, %v6463_v28, %v2017_v38  ;;  %v5174_v12 = vmul.f32 %v4488_v54, %v5141_v8  ;;  %v896_v60 = vmul.f32 0.16666667, %v864_v46  ;;  %v723_v46 = vpop.f32.mrf.mxu0 }
 0x153   : > { %v5154_v50 = vsel %vm5069_vm2, 0.0, %v1888_v48  ;;  %v5158_v36 = vsel %vm5075_vm3, 0.0, %v2049_v45  ;;  %6466 = vst [vmem:[#allocation67_spill] sm:$0xff] %v5166_v34  ;;  %6467 = vst [vmem:[#allocation68_spill] sm:$0xff] %v5170_v56  ;;  %v5180_v62 = vsel %vm1872_vm0, %v1858_v47, %v6300_v1  ;;  %v869_v45 = vmul.f32 %v837_v61, %v4977_v3 }
 0x154   : > { %6464 = vst [vmem:[#allocation65_spill] sm:$0xff] %v5154_v50  ;;  %6465 = vst [vmem:[#allocation66_spill] sm:$0xff] %v5158_v36  ;;  %v2663_v23 = vmul.f32 %v4556_v53, %v5154_v50  ;;  %v705_v48 = vadd.f32 %v4386_v32, %v4983_v21  ;;  %v716_v63 = vadd.f32 %v5024_v40, %v4386_v32  ;;  %v1857_v34 = vrot.slane %v896_v60, 7  ;;  %v4097_v43 = vpop.f32.mrf.mxu0 }
 0x155   : > { %6468 = vst [vmem:[#allocation69_spill] sm:$0xff] %v5174_v12  ;;  %6469 = vst [vmem:[#allocation70_spill] sm:$0xff] %v5180_v62  ;;  %v708_v12 = vadd.f32 %v4386_v32, %v5063_v55  ;;  %v729_v50 = vadd.f32 %v4093_v4, %v4386_v32  ;;  %v2018_v56 = vrot.slane %v896_v60, 1  ;;  %v5193_v1 = vmul.f32 %v4459_v20, %v896_v60 }
 0x156   : > { %v5185_v28 = vadd.f32 %v2700_v37, %v2663_v23  ;;  %v5196_v3 = vmul.f32 %v4472_v44, %v896_v60  ;;  %v2701_v21 = vmul.f32 %v4488_v54, %v896_v60  ;;  %v5199_v61 = vmul.f32 0.16666667, %v869_v45 }
 0x157   : > { %6470 = vst [vmem:[#allocation71_spill] sm:$0xff] %v5193_v1  ;;  %v771_v37 = vadd.f32 3.0, %v705_v48  ;;  %v774_v40 = vadd.f32 3.0, %v716_v63  ;;  %v5203_v55 = vsel %vm1872_vm0, %v1857_v34, %v1858_v47  ;;  %v5207_v4 = vsel %vm1872_vm0, %v1856_v2, %v1857_v34 }
 0x158   : > { %6471 = vst [vmem:[#allocation72_spill] sm:$0xff] %v5196_v3  ;;  %6472 = vst [vmem:[#allocation73_spill] sm:$0xff] %v5199_v61  ;;  %v6475_v23 = vrot.slane %v5111_v30, 1  ;;  %v5217_v60 = vsel %vm2033_vm1, %v2017_v38, %v2018_v56  ;;  %v2664_v45 = vmul.f32 %v4556_v53, %v5207_v4  ;;  %v5225_v2 = vmul.f32 %v4459_v20, %v5199_v61 }
 0x159   : > { %6473 = vst [vmem:[#allocation74_spill] sm:$0xff] %v5203_v55  ;;  %6474 = vst [vmem:[#allocation75_spill] sm:$0xff] %v5207_v4  ;;  %v5229_v34 = vmul.f32 %v4472_v44, %v5199_v61  ;;  %v803_v38 = vmax.f32 %v771_v37, 0.0  ;;  %v772_v47 = vadd.f32 3.0, %v708_v12  ;;  %v777_v62 = vadd.f32 3.0, %v729_v50 }
 0x15a   : > { %v5213_v1 = vsel %vm2033_vm1, %v2018_v56, %v6475_v23  ;;  %6476 = vst [vmem:[#allocation76_spill] sm:$0xff] %v5217_v60  ;;  %6477 = vst [vmem:[#allocation77_spill] sm:$0xff] %v5225_v2  ;;  %v5233_v23 = vmul.f32 %v4488_v54, %v5199_v61  ;;  %v806_v56 = vmax.f32 %v774_v40, 0.0  ;;  %v5235_v4 = vadd.f32 %v2701_v21, %v2664_v45 }
 0x15b   : > { %6478 = vst [vmem:[#allocation78_spill] sm:$0xff] %v5229_v34  ;;  %v721_v3 = vadd.f32 %v4386_v32, %v720_v52  ;;  %v835_v55 = vmin.f32 %v803_v38, 6.0  ;;  %v732_v2 = vadd.f32 %v4094_v22, %v4386_v32  ;;  %v5240_v18 = vadd.f32 %v4386_v32, %v723_v46  ;;  %v736_v22 = vpop.f32.mrf.mxu0 }
 0x15c   : > { %6479 = vst [vmem:[#allocation79_spill] sm:$0xff] %v5233_v23  ;;  %v838_v30 = vmin.f32 %v806_v56, 6.0  ;;  %v804_v34 = vmax.f32 %v772_v47, 0.0  ;;  %v809_v42 = vmax.f32 %v777_v62, 0.0  ;;  %v5243_v37 = vadd.f32 %v4097_v43, %v4386_v32 }
 0x15d   : > { %v775_v7 = vadd.f32 3.0, %v721_v3  ;;  %v867_v40 = vmul.f32 %v835_v55, %v705_v48  ;;  %v778_v45 = vadd.f32 3.0, %v732_v2  ;;  %v776_v23 = vadd.f32 3.0, %v5240_v18 }
 0x15e   : > { %v870_v21 = vmul.f32 %v838_v30, %v716_v63  ;;  %v836_v25 = vmin.f32 %v804_v34, 6.0  ;;  %v841_v52 = vmin.f32 %v809_v42, 6.0  ;;  %v781_v56 = vadd.f32 3.0, %v5243_v37 }
 0x15f   : > { %v807_v38 = vmax.f32 %v775_v7, 0.0  ;;  %v6480_v46 = vand.u32 15, %v4443_v6  ;;  %v5253_v62 = vmul.f32 0.16666667, %v867_v40  ;;  %v810_v30 = vmax.f32 %v778_v45, 0.0 }
 0x160   : > { %v5255_v32 = vmul.f32 0.16666667, %v870_v21  ;;  %v808_v43 = vmax.f32 %v776_v23, 0.0  ;;  %v868_v63 = vmul.f32 %v836_v25, %v708_v12  ;;  %v873_v48 = vmul.f32 %v841_v52, %v729_v50  ;;  %v4098_v23 = vpop.f32.mrf.mxu0 }
 0x161   : > { %vm5249_vm4 = vcmp.eq.s32.totalorder %v6480_v46, 15  ;;  %6483 = vst [vmem:[#allocation80_spill] sm:$0xff] %v5253_v62  ;;  %v839_v55 = vmin.f32 %v807_v38, 6.0  ;;  %v813_v42 = vmax.f32 %v781_v56, 0.0  ;;  %v1860_v7 = vrot.slane %v5253_v62, 7 }
 0x162   : > { %6484 = vst [vmem:[#allocation81_spill] sm:$0xff] %v5255_v32  ;;  %v5261_v6 = vmul.f32 %v4459_v20, %v5253_v62  ;;  %v5265_v40 = vmul.f32 %v4472_v44, %v5253_v62  ;;  %v5269_v21 = vmul.f32 %v4488_v54, %v5253_v62  ;;  %v1863_v25 = vrot.slane %v5255_v32, 7 }
 0x163   : > { %v5275_v12 = vmul.f32 %v4459_v20, %v5255_v32  ;;  %v6489_v45 = vrot.slane %v5141_v8, 7  ;;  %v5285_v38 = vmul.f32 %v4472_v44, %v5255_v32  ;;  %v5289_v56 = vmul.f32 %v4488_v54, %v5255_v32 }
 0x164   : > { %6485 = vst [vmem:[#allocation82_spill] sm:$0xff] %v5261_v6  ;;  %6486 = vst [vmem:[#allocation83_spill] sm:$0xff] %v5265_v40  ;;  %v5291_v46 = vmul.f32 0.16666667, %v868_v63  ;;  %v6494_v34 = vrot.slane %v5199_v61, 7  ;;  %v842_v6 = vmin.f32 %v810_v30, 6.0 }
 0x165   : > { %6487 = vst [vmem:[#allocation84_spill] sm:$0xff] %v5269_v21  ;;  %6488 = vst [vmem:[#allocation85_spill] sm:$0xff] %v5275_v12  ;;  %v5281_v52 = vsel %vm1872_vm0, %v6489_v45, %v1860_v7  ;;  %v5299_v21 = vmul.f32 0.16666667, %v873_v48  ;;  %v871_v45 = vmul.f32 %v839_v55, %v721_v3  ;;  %v739_v55 = vpop.f32.mrf.mxu0  ;;  %v6500_v40 = vrot.slane %v5199_v61, 7 }
 0x166   : > { %6490 = vst [vmem:[#allocation86_spill] sm:$0xff] %v5281_v52  ;;  %6491 = vst [vmem:[#allocation87_spill] sm:$0xff] %v5285_v38  ;;  %v5297_v50 = vsel %vm1872_vm0, %v6494_v34, %v1863_v25  ;;  %v1861_v8 = vrot.slane %v5291_v46, 7  ;;  %v5305_v12 = vmul.f32 %v4459_v20, %v5291_v46  ;;  %v5309_v63 = vmul.f32 %v4472_v44, %v5291_v46 }
 0x167   : > { %6492 = vst [vmem:[#allocation88_spill] sm:$0xff] %v5289_v56  ;;  %6493 = vst [vmem:[#allocation89_spill] sm:$0xff] %v5291_v46  ;;  %v5313_v34 = vmul.f32 %v4488_v54, %v5291_v46  ;;  %v1866_v48 = vrot.slane %v5299_v21, 7  ;;  %v5319_v30 = vmul.f32 %v4459_v20, %v5299_v21  ;;  %v5337_v3 = vmul.f32 %v4488_v54, %v5299_v21 }
 0x168   : > { %6495 = vst [vmem:[#allocation90_spill] sm:$0xff] %v5297_v50  ;;  %6496 = vst [vmem:[#allocation91_spill] sm:$0xff] %v5305_v12  ;;  %v5325_v56 = vsel %vm1872_vm0, %v1861_v8, %v6500_v40  ;;  %v5329_v12 = vsel %vm1872_vm0, %v1860_v7, %v1861_v8  ;;  %v874_v52 = vmul.f32 %v842_v6, %v732_v2  ;;  %v840_v62 = vmin.f32 %v808_v43, 6.0  ;;  %v4206_v40 = vld [vmem:[%s6270_s2] ss:$0 sm:$0xff] }
 0x169   : > { %6497 = vst [vmem:[#allocation92_spill] sm:$0xff] %v5309_v63  ;;  %6498 = vst [vmem:[#allocation93_spill] sm:$0xff] %v5313_v34  ;;  %v5333_v34 = vmul.f32 %v4472_v44, %v5299_v21  ;;  %v5339_v63 = vmul.f32 0.16666667, %v871_v45  ;;  %v845_v46 = vmin.f32 %v813_v42, 6.0  ;;  %v737_v38 = vadd.f32 %v4206_v40, %v736_v22 }
 0x16a   : > { %6499 = vst [vmem:[#allocation94_spill] sm:$0xff] %v5319_v30  ;;  %6501 = vst [vmem:[#allocation95_spill] sm:$0xff] %v5325_v56  ;;  %v748_v8 = vadd.f32 %v4206_v40, %v4098_v23  ;;  %v740_v7 = vadd.f32 %v4206_v40, %v739_v55  ;;  %v5363_v42 = vmul.f32 0.16666667, %v874_v52  ;;  %v2182_v56 = vmul.f32 %v4535_v39, %v5102_v58  ;;  %v5522_v58 = vld [vmem:[%s6271_s3 + $0x4] ss:$0 sm:$0xff] }
 0x16b   : > { %6502 = vst [vmem:[#allocation96_spill] sm:$0xff] %v5329_v12  ;;  %6503 = vst [vmem:[#allocation97_spill] sm:$0xff] %v5337_v3  ;;  %v5347_v12 = vsel %vm5249_vm4, 0.0, %v5213_v1  ;;  %v1864_v50 = vrot.slane %v5339_v63, 7  ;;  %v5353_v2 = vmul.f32 %v4459_v20, %v5339_v63  ;;  %v5357_v43 = vmul.f32 %v4472_v44, %v5339_v63 }
 0x16c   : > { %6504 = vst [vmem:[#allocation98_spill] sm:$0xff] %v5339_v63  ;;  %6505 = vst [vmem:[#allocation99_spill] sm:$0xff] %v5347_v12  ;;  %v5361_v22 = vmul.f32 %v4488_v54, %v5339_v63  ;;  %v872_v1 = vmul.f32 %v840_v62, %v5240_v18  ;;  %v877_v47 = vmul.f32 %v845_v46, %v5243_v37  ;;  %v779_v23 = vadd.f32 3.0, %v737_v38 }
 0x16d   : > { %6506 = vst [vmem:[#allocation100_spill] sm:$0xff] %v5353_v2  ;;  %6507 = vst [vmem:[#allocation101_spill] sm:$0xff] %v5357_v43  ;;  %v5369_v6 = vsel %vm1872_vm0, %v1863_v25, %v1864_v50  ;;  %v782_v55 = vadd.f32 3.0, %v748_v8  ;;  %v780_v40 = vadd.f32 3.0, %v740_v7  ;;  %v6315_v45 = vrot.slane %v5363_v42, 7 }
 0x16e   : > { %6508 = vst [vmem:[#allocation102_spill] sm:$0xff] %v5361_v22  ;;  %6509 = vst [vmem:[#allocation103_spill] sm:$0xff] %v5369_v6  ;;  %v5375_v22 = vmul.f32 %v4459_v20, %v5363_v42  ;;  %v5379_v18 = vmul.f32 %v4472_v44, %v5363_v42  ;;  %v5383_v37 = vmul.f32 %v4488_v54, %v5363_v42  ;;  %v5385_v62 = vmul.f32 0.16666667, %v872_v1 }
 0x16f   : > { %v5387_v25 = vmul.f32 0.16666667, %v877_v47  ;;  %v811_v52 = vmax.f32 %v779_v23, 0.0  ;;  %v5393_v46 = vsel %vm1872_vm0, %v1866_v48, %v6315_v45  ;;  %v814_v3 = vmax.f32 %v782_v55, 0.0 }
 0x170   : > { %6510 = vst [vmem:[#allocation104_spill] sm:$0xff] %v5375_v22  ;;  %6511 = vst [vmem:[#allocation105_spill] sm:$0xff] %v5383_v37  ;;  %v812_v2 = vmax.f32 %v780_v40, 0.0  ;;  %v1865_v61 = vrot.slane %v5385_v62, 7  ;;  %v5401_v1 = vmul.f32 %v4459_v20, %v5385_v62  ;;  %v5405_v47 = vmul.f32 %v4472_v44, %v5385_v62 }
 0x171   : > { %6512 = vst [vmem:[#allocation106_spill] sm:$0xff] %v5385_v62  ;;  %v5409_v23 = vmul.f32 %v4488_v54, %v5385_v62  ;;  %v1870_v55 = vrot.slane %v5387_v25, 7  ;;  %v5415_v45 = vmul.f32 %v4459_v20, %v5387_v25  ;;  %v6516_v37 = vand.u32 15, %v4366_v26 }
 0x172   : > { %6513 = vst [vmem:[#allocation107_spill] sm:$0xff] %v5401_v1  ;;  %6514 = vst [vmem:[#allocation108_spill] sm:$0xff] %v5405_v47  ;;  %v5425_v44 = vsel %vm1872_vm0, %v1865_v61, %v1866_v48  ;;  %v5433_v40 = vmul.f32 %v4488_v54, %v5387_v25  ;;  %v843_v20 = vmin.f32 %v811_v52, 6.0  ;;  %v846_v32 = vmin.f32 %v814_v3, 6.0 }
 0x173   : > { %6515 = vst [vmem:[#allocation109_spill] sm:$0xff] %v5409_v23  ;;  %vm5419_vm5 = vcmp.eq.s32.totalorder %v6516_v37, 0  ;;  %v5429_v23 = vsel %vm1872_vm0, %v1864_v50, %v1865_v61  ;;  %v844_v47 = vmin.f32 %v812_v2, 6.0  ;;  %v6520_v37 = vand.u32 15, %v4451_v14 }
 0x174   : > { %6519 = vst [vmem:[#allocation110_spill] sm:$0xff] %v5429_v23  ;;  %v2251_v48 = vadd.f32 %v4947_v11, %v2182_v56  ;;  %v2288_v22 = vmul.f32 %v4600_v59, %v5045_v57  ;;  %v875_v61 = vmul.f32 %v843_v20, %v737_v38  ;;  %v6523_v50 = vand.u32 15, %v4440_v5  ;;  %v5459_v11 = vld [vmem:[%s6271_s3 + $0xa] ss:$0 sm:$0xff] }
 0x175   : > { %vm5437_vm6 = vcmp.eq.s32.totalorder %v6520_v37, 0  ;;  %v2289_v3 = vmul.f32 %v4600_v59, %v5158_v36  ;;  %v2461_v14 = vmul.f32 %v4614_v27, %v5098_v29  ;;  %v2462_v2 = vmul.f32 %v4614_v27, %v5106_v9 }
 0x176   : > { %vm5446_vm7 = vcmp.eq.s32.totalorder %v6523_v50, 0  ;;  %v878_v38 = vmul.f32 %v846_v32, %v748_v8  ;;  %v876_v5 = vmul.f32 %v844_v47, %v740_v7  ;;  %v6526_v56 = vand.u32 15, %v4448_v13 }
 0x177   : > { %v6529_v20 = vand.u32 15, %v4454_v15  ;;  %v2320_v50 = vadd.f32 %v2288_v22, %v2251_v48  ;;  %v2769_v23 = vmul.f32 %v5459_v11, %v5217_v60  ;;  %v5475_v30 = vmul.f32 0.16666667, %v875_v61  ;;  %v4207_v61 = vld [vmem:[%s6271_s3 + $0x5] ss:$0 sm:$0xff] }
 0x178   : > { %vm5463_vm8 = vcmp.eq.s32.totalorder %v6526_v56, 15  ;;  %v2321_v32 = vadd.f32 %v2289_v3, %v5065_v51  ;;  %v2493_v13 = vadd.f32 %v2461_v14, %v5055_v10  ;;  %v2494_v8 = vadd.f32 %v2462_v2, %v5116_v35  ;;  %v4208_v10 = vld [vmem:[%s6271_s3 + $0x1] ss:$0 sm:$0xff] }
 0x179   : > { %vm5469_vm9 = vcmp.eq.s32.totalorder %v6529_v20, 15  ;;  %v910_v7 = vmul.f32 0.16666667, %v878_v38  ;;  %v908_v47 = vmul.f32 0.16666667, %v876_v5  ;;  %v2770_v15 = vmul.f32 %v5459_v11, %v5347_v12 }
 0x17a   : > { %v2801_v56 = vadd.f32 %v2769_v23, %v5185_v28  ;;  %v1868_v22 = vrot.slane %v5475_v30, 7  ;;  %v2029_v48 = vrot.slane %v5475_v30, 1  ;;  %v5489_v51 = vmul.f32 %v4207_v61, %v5475_v30  ;;  %v4209_v28 = vld [vmem:[%s6271_s3 + $0x9] ss:$0 sm:$0xff] }
 0x17b   : > { %v2408_v35 = vmul.f32 %v4208_v10, %v5475_v30  ;;  %v5499_v23 = vmul.f32 %v4209_v28, %v5475_v30  ;;  %v1871_v3 = vrot.slane %v910_v7, 7  ;;  %v2032_v14 = vrot.slane %v910_v7, 1 }
 0x17c   : > { %v2236_v2 = vmul.f32 %v4207_v61, %v910_v7  ;;  %v2715_v38 = vmul.f32 %v4209_v28, %v910_v7  ;;  %v1869_v5 = vrot.slane %v908_v47, 7  ;;  %v2030_v20 = vrot.slane %v908_v47, 1 }
 0x17d   : > { %6532 = vst [vmem:[#allocation111_spill] sm:$0xff] %v5499_v23  ;;  %v5501_v12 = vmul.f32 %v4207_v61, %v908_v47  ;;  %v1873_v60 = vsel %vm1872_vm0, %v1870_v55, %v1871_v3  ;;  %v6533_v6 = vrot.slane %v4495_v19, 7  ;;  %v6534_v62 = vrot.slane %v4495_v19, 1 }
 0x17e   : > { %v2409_v23 = vmul.f32 %v4208_v10, %v908_v47  ;;  %v2199_v61 = vmul.f32 %v4535_v39, %v1873_v60  ;;  %v2678_v36 = vmul.f32 %v4556_v53, %v1873_v60  ;;  %v5517_v57 = vmul.f32 %v4209_v28, %v908_v47 }
 0x17f   : > { %v1904_v63 = vsel %vm1872_vm0, %v1871_v3, %v6533_v6  ;;  %v2065_v30 = vsel %vm2033_vm1, %v2032_v14, %v6534_v62  ;;  %v1874_v62 = vsel %vm1872_vm0, %v1869_v5, %v1870_v55  ;;  %v5532_v39 = vsel %vm1872_vm0, %v1868_v22, %v1869_v5 }
 0x180   : > { %v1969_v7 = vsel %vm5419_vm5, 0.0, %v1904_v63  ;;  %v2268_v53 = vadd.f32 %v2236_v2, %v2199_v61  ;;  %v5534_v60 = vadd.f32 %v2715_v38, %v2678_v36  ;;  %v6535_v63 = vrot.slane %v5363_v42, 7  ;;  %v5582_v2 = vld [vmem:[%s6271_s3] ss:$0 sm:$0xff] }
 0x181   : > { %v5525_v19 = vmul.f32 %v5522_v58, %v1969_v7  ;;  %v2343_v6 = vmul.f32 %v4549_v17, %v1969_v7  ;;  %v5542_v47 = vsel %vm5437_vm6, 0.0, %v1874_v62  ;;  %v6536_v10 = vrot.slane %v5387_v25, 1 }
 0x182   : > { %v1876_v1 = vsel %vm1872_vm0, %v6535_v63, %v1868_v22  ;;  %v5563_v22 = vsel %vm2033_vm1, %v2029_v48, %v2030_v20  ;;  %v5571_v54 = vsel %vm5469_vm9, 0.0, %v2065_v30  ;;  %v2198_v3 = vmul.f32 %v5522_v58, %v5542_v47 }
 0x183   : > { %v5545_v17 = vadd.f32 %v4530_v24, %v2343_v6  ;;  %v5549_v55 = vsel %vm5446_vm7, 0.0, %v1876_v1  ;;  %v5555_v36 = vsel %vm2033_vm1, %v6536_v10, %v2032_v14  ;;  %v6537_v28 = vmov %v6536_v10 }
 0x184   : > { %v2035_v43 = vsel %vm2033_vm1, %v2030_v20, %v6537_v28  ;;  %v2304_v25 = vmul.f32 %v4600_v59, %v5555_v36  ;;  %v2305_v14 = vmul.f32 %v4600_v59, %v5571_v54  ;;  %v2371_v52 = vmul.f32 %v5582_v2, %v5549_v55 }
 0x185   : > { %v5567_v24 = vsel %vm5463_vm8, 0.0, %v2035_v43  ;;  %v2372_v37 = vmul.f32 %v5582_v2, %v5532_v39  ;;  %v2267_v38 = vadd.f32 %v5415_v45, %v2198_v3  ;;  %v2477_v5 = vmul.f32 %v4614_v27, %v5563_v22  ;;  %v5598_v45 = vld [vmem:[%s6272_s4] ss:$0 sm:$0xff] }
 0x186   : > { %v2478_v20 = vmul.f32 %v4614_v27, %v5567_v24  ;;  %v2623_v59 = vadd.f32 %v2493_v13, %v2320_v50  ;;  %v2337_v30 = vadd.f32 %v2305_v14, %v2268_v53  ;;  %v2440_v7 = vadd.f32 %v2408_v35, %v2371_v52 }
 0x187   : > { %v2441_v61 = vadd.f32 %v2409_v23, %v2372_v37  ;;  %v2624_v6 = vadd.f32 %v2494_v8, %v2321_v32  ;;  %v2336_v62 = vadd.f32 %v2304_v25, %v2267_v38  ;;  %v2802_v63 = vadd.f32 %v2770_v15, %v5235_v4 }
 0x188   : > { %v2927_v1 = vadd.f32 %v2801_v56, %v2623_v59  ;;  %v938_v10 = vadd.s32 208, %v4366_v26  ;;  %v2509_v28 = vadd.f32 %v2477_v5, %v2440_v7  ;;  %v939_v27 = vadd.s32 216, %v4366_v26 }
 0x189   : > { %v2510_v43 = vadd.f32 %v2478_v20, %v2441_v61  ;;  %v6538_v50 = vrot.slane %v5363_v42, 1  ;;  %v2928_v13 = vadd.f32 %v2802_v63, %v2624_v6  ;;  %v6540_v56 = vrot.slane %v5299_v21, 1 }
 0x18a   : > { %v2966_v4 = vadd.f32 %v5598_v45, %v2927_v1  ;;  %v1130_v8 = vand.u32 15, %v938_v10  ;;  %v2639_v23 = vadd.f32 %v2509_v28, %v2336_v62  ;;  %v1137_v3 = vand.u32 15, %v939_v27  ;;  %v5631_v62 = vld [vmem:[%s6271_s3 + $0x6] ss:$0 sm:$0xff] }
 0x18b   : > { %v2037_v32 = vsel %vm2033_vm1, %v6538_v50, %v2029_v48  ;;  %v6539_v15 = vmov %v6538_v50  ;;  %v2640_v53 = vadd.f32 %v2510_v43, %v2337_v30  ;;  %v2196_v25 = vmul.f32 %v5522_v58, %v5549_v55 }
 0x18c   : > { %v5612_v35 = vsel %vm2033_vm1, %v6540_v56, %v6539_v15  ;;  %v2967_v48 = vadd.f32 %v5598_v45, %v2928_v13  ;;  %v2998_v14 = vadd.f32 3.0, %v2966_v4  ;;  %vm1354_vm0 = vcmp.eq.s32.totalorder %v1130_v8, 0 }
 0x18d   : > { %v2197_v52 = vmul.f32 %v5522_v58, %v5532_v39  ;;  %v2982_v42 = vadd.f32 %v5598_v45, %v2639_v23  ;;  %v2983_v37 = vadd.f32 %v5598_v45, %v2640_v53  ;;  %vm1387_vm10 = vcmp.eq.s32.totalorder %v1137_v3, 15  ;;  %v5646_v53 = vld [vmem:[%s6271_s3 + $0x2] ss:$0 sm:$0xff] }
 0x18e   : > { %v5622_v38 = vsel %vm1354_vm0, 0.0, %v5425_v44  ;;  %v2999_v5 = vadd.f32 3.0, %v2967_v48  ;;  %v3030_v20 = vmax.f32 %v2998_v14, 0.0  ;;  %v5624_v59 = vsel %vm1387_vm10, 0.0, %v2037_v32 }
 0x18f   : > { %v2265_v30 = vadd.f32 %v5489_v51, %v2196_v25  ;;  %v3014_v7 = vadd.f32 3.0, %v2982_v42  ;;  %v3015_v61 = vadd.f32 3.0, %v2983_v37  ;;  %v2266_v6 = vadd.f32 %v5501_v12, %v2197_v52 }
 0x190   : > { %v2302_v63 = vmul.f32 %v5631_v62, %v5563_v22  ;;  %v3031_v44 = vmax.f32 %v2999_v5, 0.0  ;;  %v3062_v1 = vmin.f32 %v3030_v20, 6.0  ;;  %v2303_v10 = vmul.f32 %v5631_v62, %v5567_v24 }
 0x191   : > { %v2369_v51 = vmul.f32 %v5582_v2, %v5622_v38  ;;  %v3046_v28 = vmax.f32 %v3014_v7, 0.0  ;;  %v3047_v43 = vmax.f32 %v3015_v61, 0.0  ;;  %v2370_v12 = vmul.f32 %v5582_v2, %v5393_v46 }
 0x192   : > { %v2334_v27 = vadd.f32 %v2302_v63, %v2265_v30  ;;  %v3063_v50 = vmin.f32 %v3031_v44, 6.0  ;;  %v3094_v32 = vmul.f32 %v3062_v1, %v2966_v4  ;;  %v2335_v13 = vadd.f32 %v2303_v10, %v2266_v6 }
 0x193   : > { %v2438_v8 = vadd.f32 %v5333_v34, %v2369_v51  ;;  %v3078_v15 = vmin.f32 %v3046_v28, 6.0  ;;  %v3079_v56 = vmin.f32 %v3047_v43, 6.0  ;;  %v2439_v23 = vadd.f32 %v5379_v18, %v2370_v12  ;;  %v5655_v34 = vld [vmem:[%s6271_s3 + $0x8] ss:$0 sm:$0xff] }
 0x194   : > { %v2475_v3 = vmul.f32 %v5646_v53, %v5612_v35  ;;  %v3095_v25 = vmul.f32 %v3063_v50, %v2967_v48  ;;  %v3126_v14 = vmul.f32 0.16666667, %v3094_v32  ;;  %v2476_v4 = vmul.f32 %v5646_v53, %v5624_v59 }
 0x195   : > { %v2677_v18 = vmul.f32 %v5655_v34, %v5542_v47  ;;  %v3110_v52 = vmul.f32 %v3078_v15, %v2982_v42  ;;  %v3111_v5 = vmul.f32 %v3079_v56, %v2983_v37  ;;  %v2783_v30 = vmul.f32 %v5459_v11, %v5555_v36 }
 0x196   : > { %v2507_v20 = vadd.f32 %v2475_v3, %v2438_v8  ;;  %v3127_v7 = vmul.f32 0.16666667, %v3095_v25  ;;  %v2508_v48 = vadd.f32 %v2476_v4, %v2439_v23  ;;  %v2784_v6 = vmul.f32 %v5459_v11, %v5571_v54  ;;  %v6543_v8 = vld [vmem:[#allocation52_spill] sm:$0xff]  ;;  %v6544_v3 = vld [vmem:[#allocation42_spill] sm:$0xff] }
 0x197   : > { %v2746_v61 = vadd.f32 %v5433_v40, %v2677_v18  ;;  %v3142_v63 = vmul.f32 0.16666667, %v3110_v52  ;;  %v3143_v44 = vmul.f32 0.16666667, %v3111_v5  ;;  %v2286_v10 = vmul.f32 %v5631_v62, %v5098_v29  ;;  %v6546_v18 = vld [vmem:[#allocation49_spill] sm:$0xff] }
 0x198   : > { %v2637_v1 = vadd.f32 %v2507_v20, %v2334_v27  ;;  %v5666_v47 = vpack.c.bf16 %v3127_v7, %v3126_v14  ;;  %v2638_v42 = vadd.f32 %v2508_v48, %v2335_v13  ;;  %v2816_v51 = vadd.f32 %v2784_v6, %v5534_v60  ;;  %v6542_v13 = vld [vmem:[#allocation56_spill] sm:$0xff]  ;;  %v6545_v14 = vld [vmem:[#allocation66_spill] sm:$0xff]  ;;  %v6547_v48 = vld [vmem:[#allocation55_spill] sm:$0xff] }
 0x199   : > { %v2815_v37 = vadd.f32 %v2783_v30, %v2746_v61  ;;  %v5669_v36 = vpack.c.bf16 %v3143_v44, %v3142_v63  ;;  %v2287_v40 = vmul.f32 %v5631_v62, %v5106_v9  ;;  %v2318_v28 = vadd.f32 %v2286_v10, %v5053_v16 }
 0x19a   : > { %v2353_v54 = vmul.f32 %v5582_v2, %v4934_v33  ;;  %v2942_v27 = vadd.f32 %v2816_v51, %v2638_v42  ;;  %v2459_v12 = vmul.f32 %v5646_v53, %v4878_v41  ;;  %v2460_v50 = vmul.f32 %v5646_v53, %v5020_v49 }
 0x19b   : > { %6541 = vst [vmem:[#allocation112_spill] sm:$0xff] %v5669_v36  ;;  %v2941_v43 = vadd.f32 %v2815_v37, %v2637_v1  ;;  %4005 = vmatprep.subr.bf16.mxu0 %v5669_v36  ;;  %v2319_v60 = vadd.f32 %v2287_v40, %v5114_v31  ;;  %v2661_v16 = vmul.f32 %v5655_v34, %v6542_v13  ;;  %v936_v52 = vadd.s32 192, %v4366_v26  ;;  %v6549_v40 = vld [vmem:[#allocation106_spill] sm:$0xff] }
 0x19c   : > { %v2422_v32 = vadd.f32 %v4810_v0, %v2353_v54  ;;  %v2767_v15 = vmul.f32 %v5459_v11, %v6543_v8  ;;  %4006 = vmatpush3.bf16.msra.mxu0 %v5666_v47  ;;  %v2981_v23 = vadd.f32 %v5598_v45, %v2942_v27  ;;  %v2492_v25 = vadd.f32 %v2460_v50, %v6544_v3  ;;  %v6552_v50 = vld [vmem:[#allocation98_spill] sm:$0xff] }
 0x19d   : > { %v2980_v56 = vadd.f32 %v5598_v45, %v2941_v43  ;;  %v2768_v4 = vmul.f32 %v5459_v11, %v6545_v14  ;;  %v2730_v0 = vadd.f32 %v6546_v18, %v2661_v16  ;;  %v937_v5 = vadd.s32 200, %v4366_v26 }
 0x19e   : > { %v2491_v31 = vadd.f32 %v2459_v12, %v2422_v32  ;;  %v3013_v30 = vadd.f32 3.0, %v2981_v23  ;;  %v2622_v7 = vadd.f32 %v2492_v25, %v2319_v60  ;;  %v1116_v44 = vand.u32 15, %v936_v52 }
 0x19f   : > { %v3012_v20 = vadd.f32 3.0, %v2980_v56  ;;  %v2800_v61 = vadd.f32 %v2768_v4, %v6547_v48  ;;  %v2799_v63 = vadd.f32 %v2767_v15, %v2730_v0  ;;  %v1123_v1 = vand.u32 15, %v937_v5  ;;  %v6554_v15 = vld [vmem:[#allocation103_spill] sm:$0xff] }
 0x1a0   : > { %v2621_v6 = vadd.f32 %v2491_v31, %v2318_v28  ;;  %v3045_v42 = vmax.f32 %v3013_v30, 0.0  ;;  %v6548_v51 = vrot.slane %v5299_v21, 1  ;;  %v6550_v54 = vrot.slane %v6549_v40, 1 }
 0x1a1   : > { %v3044_v10 = vmax.f32 %v3012_v20, 0.0  ;;  %v2926_v37 = vadd.f32 %v2800_v61, %v2622_v7  ;;  %vm1352_vm11 = vcmp.eq.s32.totalorder %v1116_v44, 0  ;;  %vm1385_vm12 = vcmp.eq.s32.totalorder %v1123_v1, 15  ;;  %v6555_v7 = vld [vmem:[#allocation94_spill] sm:$0xff]  ;;  %v6556_v61 = vld [vmem:[#allocation104_spill] sm:$0xff] }
 0x1a2   : > { %v2039_v43 = vsel %vm2033_vm1, %v6550_v54, %v6548_v51  ;;  %v2925_v27 = vadd.f32 %v2799_v63, %v2621_v6  ;;  %v6551_v12 = vmov %v6550_v54  ;;  %v6553_v28 = vrot.slane %v6552_v50, 1  ;;  %v6557_v51 = vld [vmem:[#allocation110_spill] sm:$0xff] }
 0x1a3   : > { %v3076_v32 = vmin.f32 %v3044_v10, 6.0  ;;  %v3077_v16 = vmin.f32 %v3045_v42, 6.0  ;;  %v2965_v21 = vadd.f32 %v5598_v45, %v2926_v37  ;;  %v5713_v3 = vsel %vm1352_vm11, 0.0, %v6554_v15 }
 0x1a4   : > { %v5709_v60 = vsel %vm2033_vm1, %v6553_v28, %v6551_v12  ;;  %v2964_v25 = vadd.f32 %v5598_v45, %v2925_v27  ;;  %v5716_v4 = vsel %vm1385_vm12, 0.0, %v2039_v43  ;;  %v2194_v31 = vmul.f32 %v5522_v58, %v5622_v38  ;;  %v6558_v27 = vld [vmem:[#allocation101_spill] sm:$0xff] }
 0x1a5   : > { %v2195_v18 = vmul.f32 %v5522_v58, %v5393_v46  ;;  %v3108_v0 = vmul.f32 %v3076_v32, %v2980_v56  ;;  %v3109_v52 = vmul.f32 %v3077_v16, %v2981_v23  ;;  %v2997_v5 = vadd.f32 3.0, %v2965_v21  ;;  %v6559_v16 = vld [vmem:[#allocation108_spill] sm:$0xff] }
 0x1a6   : > { %v2300_v20 = vmul.f32 %v5631_v62, %v5612_v35  ;;  %v2996_v30 = vadd.f32 3.0, %v2964_v25  ;;  %v2263_v48 = vadd.f32 %v6555_v7, %v2194_v31  ;;  %v2301_v63 = vmul.f32 %v5631_v62, %v5624_v59 }
 0x1a7   : > { %v2264_v6 = vadd.f32 %v6556_v61, %v2195_v18  ;;  %v3140_v44 = vmul.f32 0.16666667, %v3108_v0  ;;  %v3141_v1 = vmul.f32 0.16666667, %v3109_v52  ;;  %v3029_v10 = vmax.f32 %v2997_v5, 0.0 }
 0x1a8   : > { %v2367_v42 = vmul.f32 %v5582_v2, %v5713_v3  ;;  %v3028_v56 = vmax.f32 %v2996_v30, 0.0  ;;  %v2332_v23 = vadd.f32 %v2300_v20, %v2263_v48  ;;  %v2368_v40 = vmul.f32 %v5582_v2, %v6557_v51  ;;  %v6560_v48 = vld [vmem:[#allocation111_spill] sm:$0xff] }
 0x1a9   : > { %v2333_v37 = vadd.f32 %v2301_v63, %v2264_v6  ;;  %v5732_v54 = vpack.c.bf16 %v3141_v1, %v3140_v44  ;;  %v3061_v43 = vmin.f32 %v3029_v10, 6.0  ;;  %v2473_v28 = vmul.f32 %v5646_v53, %v5709_v60 }
 0x1aa   : > { %v2436_v12 = vadd.f32 %v6558_v27, %v2367_v42  ;;  %v3060_v32 = vmin.f32 %v3028_v56, 6.0  ;;  %v2437_v15 = vadd.f32 %v6559_v16, %v2368_v40  ;;  %v2474_v31 = vmul.f32 %v5646_v53, %v5716_v4  ;;  %v6561_v42 = vld [vmem:[#allocation35_spill] sm:$0xff]  ;;  %v6563_v27 = vld [vmem:[#allocation45_spill] sm:$0xff] }
 0x1ab   : > { %v2675_v18 = vmul.f32 %v5655_v34, %v5549_v55  ;;  %4007 = vmatprep.subr.bf16.mxu0 %v5732_v54  ;;  %v3093_v0 = vmul.f32 %v3061_v43, %v2965_v21  ;;  %v2676_v5 = vmul.f32 %v5655_v34, %v5532_v39  ;;  %v2781_v20 = vmul.f32 %v5459_v11, %v5563_v22  ;;  %v6564_v16 = vld [vmem:[#allocation41_spill] sm:$0xff] }
 0x1ac   : > { %v2505_v52 = vadd.f32 %v2473_v28, %v2436_v12  ;;  %v3092_v30 = vmul.f32 %v3060_v32, %v2964_v25  ;;  %v2506_v7 = vadd.f32 %v2474_v31, %v2437_v15  ;;  %v2782_v6 = vmul.f32 %v5459_v11, %v5567_v24  ;;  %v6562_v24 = vld [vmem:[#allocation44_spill] sm:$0xff]  ;;  %v6565_v31 = vld [vmem:[#allocation39_spill] sm:$0xff] }
 0x1ad   : > { %v2744_v61 = vadd.f32 %v6560_v48, %v2675_v18  ;;  %v3125_v63 = vmul.f32 0.16666667, %v3093_v0  ;;  %v2745_v55 = vadd.f32 %v5517_v57, %v2676_v5  ;;  %v2178_v21 = vmul.f32 %v5522_v58, %v4934_v33 }
 0x1ae   : > { %v2635_v44 = vadd.f32 %v2505_v52, %v2332_v23  ;;  %v3124_v1 = vmul.f32 0.16666667, %v3092_v30  ;;  %v2636_v10 = vadd.f32 %v2506_v7, %v2333_v37  ;;  %v2284_v22 = vmul.f32 %v5631_v62, %v4878_v41  ;;  %v6566_v52 = vld [vmem:[#allocation47_spill] sm:$0xff]  ;;  %v6567_v30 = vld [vmem:[#allocation54_spill] sm:$0xff] }
 0x1af   : > { %v2813_v39 = vadd.f32 %v2781_v20, %v2744_v61  ;;  %v2814_v25 = vadd.f32 %v2782_v6, %v2745_v55  ;;  %v2247_v56 = vadd.f32 %v6561_v42, %v2178_v21  ;;  %v2285_v40 = vmul.f32 %v5631_v62, %v5020_v49  ;;  %v6568_v55 = vld [vmem:[#allocation58_spill] sm:$0xff] }
 0x1b0   : > { %v2457_v23 = vmul.f32 %v5646_v53, %v6562_v24  ;;  %v5760_v43 = vpack.c.bf16 %v3125_v63, %v3124_v1  ;;  %v2458_v12 = vmul.f32 %v5646_v53, %v6563_v27  ;;  %v2765_v37 = vmul.f32 %v5459_v11, %v5098_v29 }
 0x1b1   : > { %v2939_v57 = vadd.f32 %v2813_v39, %v2635_v44  ;;  %v2940_v28 = vadd.f32 %v2814_v25, %v2636_v10  ;;  %v2316_v32 = vadd.f32 %v2284_v22, %v2247_v56  ;;  %v2317_v15 = vadd.f32 %v2285_v40, %v6564_v16  ;;  %v6570_v10 = vld [vmem:[#allocation81_spill] sm:$0xff] }
 0x1b2   : > { %v2489_v18 = vadd.f32 %v2457_v23, %v6565_v31  ;;  %4008 = vmatpush3.bf16.msra.mxu0 %v5760_v43  ;;  %v2490_v5 = vadd.f32 %v2458_v12, %v6566_v52  ;;  %v2766_v20 = vmul.f32 %v5459_v11, %v5106_v9  ;;  %v2797_v7 = vadd.f32 %v2765_v37, %v6567_v30  ;;  %v6573_v12 = vld [vmem:[#allocation73_spill] sm:$0xff] }
 0x1b3   : > { %v2978_v0 = vadd.f32 %v5598_v45, %v2939_v57  ;;  %v2979_v48 = vadd.f32 %v5598_v45, %v2940_v28  ;;  %v934_v61 = vadd.s32 176, %v4366_v26  ;;  %v935_v6 = vadd.s32 184, %v4366_v26 }
 0x1b4   : > { %v2619_v29 = vadd.f32 %v2489_v18, %v2316_v32  ;;  %v2620_v44 = vadd.f32 %v2490_v5, %v2317_v15  ;;  %v2798_v21 = vadd.f32 %v2766_v20, %v6568_v55  ;;  %v6569_v1 = vrot.slane %v6552_v50, 1  ;;  %v6575_v18 = vld [vmem:[#allocation95_spill] sm:$0xff] }
 0x1b5   : > { %v3010_v63 = vadd.f32 3.0, %v2978_v0  ;;  %v6571_v39 = vrot.slane %v6570_v10, 1  ;;  %v3011_v22 = vadd.f32 3.0, %v2979_v48  ;;  %v1102_v42 = vand.u32 15, %v934_v61  ;;  %v6577_v10 = vld [vmem:[#allocation107_spill] sm:$0xff] }
 0x1b6   : > { %v2923_v25 = vadd.f32 %v2797_v7, %v2619_v29  ;;  %v1109_v56 = vand.u32 15, %v935_v6  ;;  %v2924_v23 = vadd.f32 %v2798_v21, %v2620_v44  ;;  %v6574_v37 = vrot.slane %v6573_v12, 1  ;;  %v6576_v29 = vld [vmem:[#allocation100_spill] sm:$0xff] }
 0x1b7   : > { %v2041_v9 = vsel %vm2033_vm1, %v6571_v39, %v6569_v1  ;;  %v3042_v40 = vmax.f32 %v3010_v63, 0.0  ;;  %v6572_v57 = vmov %v6571_v39  ;;  %v2192_v50 = vmul.f32 %v5522_v58, %v5713_v3 }
 0x1b8   : > { %v5790_v28 = vsel %vm2033_vm1, %v6574_v37, %v6572_v57  ;;  %v3043_v32 = vmax.f32 %v3011_v22, 0.0  ;;  %v2962_v16 = vadd.f32 %v5598_v45, %v2923_v25  ;;  %vm1350_vm13 = vcmp.eq.s32.totalorder %v1102_v42, 0  ;;  %v6579_v37 = vld [vmem:[#allocation78_spill] sm:$0xff] }
 0x1b9   : > { %vm1383_vm14 = vcmp.eq.s32.totalorder %v1109_v56, 15  ;;  %v3074_v15 = vmin.f32 %v3042_v40, 6.0  ;;  %v2963_v31 = vadd.f32 %v5598_v45, %v2924_v23  ;;  %v5797_v52 = vsel %vm1350_vm13, 0.0, %v6575_v18  ;;  %v6578_v56 = vld [vmem:[#allocation90_spill] sm:$0xff] }
 0x1ba   : > { %v5799_v5 = vsel %vm1383_vm14, 0.0, %v2041_v9  ;;  %v3075_v20 = vmin.f32 %v3043_v32, 6.0  ;;  %v2994_v30 = vadd.f32 3.0, %v2962_v16  ;;  %v2193_v7 = vmul.f32 %v5522_v58, %v6557_v51 }
 0x1bb   : > { %v2261_v61 = vadd.f32 %v6576_v29, %v2192_v50  ;;  %v3106_v6 = vmul.f32 %v3074_v15, %v2978_v0  ;;  %v2995_v63 = vadd.f32 3.0, %v2963_v31  ;;  %v2298_v44 = vmul.f32 %v5631_v62, %v5709_v60  ;;  %v6580_v15 = vld [vmem:[#allocation87_spill] sm:$0xff] }
 0x1bc   : > { %v2299_v55 = vmul.f32 %v5631_v62, %v5716_v4  ;;  %v3107_v21 = vmul.f32 %v3075_v20, %v2979_v48  ;;  %v3026_v1 = vmax.f32 %v2994_v30, 0.0  ;;  %v2262_v39 = vadd.f32 %v6577_v10, %v2193_v7 }
 0x1bd   : > { %v2365_v9 = vmul.f32 %v5582_v2, %v5797_v52  ;;  %v3138_v22 = vmul.f32 0.16666667, %v3106_v6  ;;  %v3027_v25 = vmax.f32 %v2995_v63, 0.0  ;;  %v2330_v42 = vadd.f32 %v2298_v44, %v2261_v61 }
 0x1be   : > { %v2366_v0 = vmul.f32 %v5582_v2, %v6578_v56  ;;  %v3139_v40 = vmul.f32 0.16666667, %v3107_v21  ;;  %v3058_v23 = vmin.f32 %v3026_v1, 6.0  ;;  %v2331_v57 = vadd.f32 %v2299_v55, %v2262_v39  ;;  %v6581_v1 = vld [vmem:[#allocation97_spill] sm:$0xff] }
 0x1bf   : > { %v2434_v50 = vadd.f32 %v6579_v37, %v2365_v9  ;;  %v3059_v32 = vmin.f32 %v3027_v25, 6.0  ;;  %v2471_v18 = vmul.f32 %v5646_v53, %v5790_v28  ;;  %v2472_v20 = vmul.f32 %v5646_v53, %v5799_v5  ;;  %v6582_v39 = vld [vmem:[#allocation105_spill] sm:$0xff] }
 0x1c0   : > { %v2435_v48 = vadd.f32 %v6580_v15, %v2366_v0  ;;  %v5819_v30 = vpack.c.bf16 %v3139_v40, %v3138_v22  ;;  %v3090_v7 = vmul.f32 %v3058_v23, %v2962_v16  ;;  %v2673_v29 = vmul.f32 %v5655_v34, %v5622_v38  ;;  %v6583_v40 = vld [vmem:[#allocation29_spill] sm:$0xff]  ;;  %v6585_v15 = vld [vmem:[#allocation22_spill] sm:$0xff] }
 0x1c1   : > { %v2674_v61 = vmul.f32 %v5655_v34, %v5393_v46  ;;  %v3091_v6 = vmul.f32 %v3059_v32, %v2963_v31  ;;  %v2503_v63 = vadd.f32 %v2471_v18, %v2434_v50  ;;  %v2779_v55 = vmul.f32 %v5459_v11, %v5612_v35  ;;  %v6584_v50 = vld [vmem:[#allocation38_spill] sm:$0xff] }
 0x1c2   : > { %v2504_v44 = vadd.f32 %v2472_v20, %v2435_v48  ;;  %4009 = vmatprep.subr.bf16.mxu0 %v5819_v30  ;;  %v3122_v21 = vmul.f32 0.16666667, %v3090_v7  ;;  %v2742_v10 = vadd.f32 %v6581_v1, %v2673_v29  ;;  %v2780_v16 = vmul.f32 %v5459_v11, %v5624_v59  ;;  %v6587_v20 = vld [vmem:[#allocation46_spill] sm:$0xff]  ;;  %v6588_v29 = vld [vmem:[#allocation17_spill] sm:$0xff] }
 0x1c3   : > { %v2743_v9 = vadd.f32 %v6582_v39, %v2674_v61  ;;  %v3123_v38 = vmul.f32 0.16666667, %v3091_v6  ;;  %v2633_v22 = vadd.f32 %v2503_v63, %v2330_v42  ;;  %v2282_v46 = vmul.f32 %v5631_v62, %v6562_v24  ;;  %v6586_v42 = vld [vmem:[#allocation37_spill] sm:$0xff]  ;;  %v6589_v6 = vld [vmem:[#allocation27_spill] sm:$0xff] }
 0x1c4   : > { %v2634_v25 = vadd.f32 %v2504_v44, %v2331_v57  ;;  %v2811_v31 = vadd.f32 %v2779_v55, %v2742_v10  ;;  %v2283_v35 = vmul.f32 %v5631_v62, %v6563_v27  ;;  %v2349_v23 = vmul.f32 %v5582_v2, %v6583_v40 }
 0x1c5   : > { %v2812_v0 = vadd.f32 %v2780_v16, %v2743_v9  ;;  %v5838_v37 = vpack.c.bf16 %v3123_v38, %v3122_v21  ;;  %v2314_v32 = vadd.f32 %v2282_v46, %v6584_v50  ;;  %v2455_v59 = vmul.f32 %v5646_v53, %v6585_v15  ;;  %v6590_v38 = vld [vmem:[#allocation36_spill] sm:$0xff] }
 0x1c6   : > { %v2456_v57 = vmul.f32 %v5646_v53, %v6586_v42  ;;  %v2937_v48 = vadd.f32 %v2811_v31, %v2633_v22  ;;  %v2315_v7 = vadd.f32 %v2283_v35, %v6587_v20  ;;  %v2418_v61 = vadd.f32 %v6588_v29, %v2349_v23 }
 0x1c7   : > { %v2938_v18 = vadd.f32 %v2812_v0, %v2634_v25  ;;  %4010 = vmatpush3.bf16.msra.mxu0 %v5838_v37  ;;  %v2657_v44 = vmul.f32 %v5655_v34, %v4934_v33  ;;  %v2763_v55 = vmul.f32 %v5459_v11, %v4878_v41  ;;  %v2764_v21 = vmul.f32 %v5459_v11, %v5020_v49  ;;  %v6591_v25 = vld [vmem:[#allocation43_spill] sm:$0xff] }
 0x1c8   : > { %v2488_v63 = vadd.f32 %v2456_v57, %v6589_v6  ;;  %v2976_v1 = vadd.f32 %v5598_v45, %v2937_v48  ;;  %v2487_v39 = vadd.f32 %v2455_v59, %v2418_v61  ;;  %v932_v9 = vadd.s32 160, %v4366_v26  ;;  %v6593_v48 = vld [vmem:[#allocation89_spill] sm:$0xff]  ;;  %v6596_v61 = vld [vmem:[#allocation80_spill] sm:$0xff] }
 0x1c9   : > { %v2977_v10 = vadd.f32 %v5598_v45, %v2938_v18  ;;  %v2726_v22 = vadd.f32 %v6590_v38, %v2657_v44  ;;  %v2796_v46 = vadd.f32 %v2764_v21, %v6591_v25  ;;  %v933_v33 = vadd.s32 168, %v4366_v26 }
 0x1ca   : > { %v2618_v16 = vadd.f32 %v2488_v63, %v2315_v7  ;;  %v3008_v31 = vadd.f32 3.0, %v2976_v1  ;;  %v2617_v41 = vadd.f32 %v2487_v39, %v2314_v32  ;;  %v1088_v35 = vand.u32 15, %v932_v9 }
 0x1cb   : > { %v3009_v0 = vadd.f32 3.0, %v2977_v10  ;;  %v2795_v23 = vadd.f32 %v2763_v55, %v2726_v22  ;;  %v1095_v50 = vand.u32 15, %v933_v33  ;;  %v6592_v57 = vrot.slane %v6573_v12, 1  ;;  %v6598_v12 = vld [vmem:[#allocation86_spill] sm:$0xff] }
 0x1cc   : > { %v2922_v49 = vadd.f32 %v2796_v46, %v2618_v16  ;;  %v6594_v59 = vrot.slane %v6593_v48, 1  ;;  %v3040_v20 = vmax.f32 %v3008_v31, 0.0  ;;  %vm1348_vm15 = vcmp.eq.s32.totalorder %v1088_v35, 0 }
 0x1cd   : > { %v3041_v7 = vmax.f32 %v3009_v0, 0.0  ;;  %v6597_v6 = vrot.slane %v6596_v61, 1  ;;  %v2921_v63 = vadd.f32 %v2795_v23, %v2617_v41  ;;  %vm1381_vm2 = vcmp.eq.s32.totalorder %v1095_v50, 15  ;;  %v6599_v0 = vld [vmem:[#allocation77_spill] sm:$0xff] }
 0x1ce   : > { %v2043_v18 = vsel %vm2033_vm1, %v6594_v59, %v6592_v57  ;;  %v6595_v29 = vmov %v6594_v59  ;;  %v2961_v44 = vadd.f32 %v5598_v45, %v2922_v49  ;;  %v5877_v55 = vsel %vm1348_vm15, 0.0, %v6598_v12  ;;  %v6600_v50 = vld [vmem:[#allocation85_spill] sm:$0xff] }
 0x1cf   : > { %v5873_v32 = vsel %vm2033_vm1, %v6597_v6, %v6595_v29  ;;  %v3072_v21 = vmin.f32 %v3040_v20, 6.0  ;;  %v3073_v39 = vmin.f32 %v3041_v7, 6.0  ;;  %v5879_v9 = vsel %vm1381_vm2, 0.0, %v2043_v18  ;;  %v6601_v7 = vld [vmem:[#allocation96_spill] sm:$0xff] }
 0x1d0   : > { %v2190_v16 = vmul.f32 %v5522_v58, %v5797_v52  ;;  %v2960_v38 = vadd.f32 %v5598_v45, %v2921_v63  ;;  %v2993_v22 = vadd.f32 3.0, %v2961_v44  ;;  %v2191_v25 = vmul.f32 %v5522_v58, %v6578_v56  ;;  %v6602_v63 = vld [vmem:[#allocation83_spill] sm:$0xff] }
 0x1d1   : > { %v2296_v46 = vmul.f32 %v5631_v62, %v5790_v28  ;;  %v3104_v33 = vmul.f32 %v3072_v21, %v2976_v1  ;;  %v3105_v31 = vmul.f32 %v3073_v39, %v2977_v10  ;;  %v2297_v35 = vmul.f32 %v5631_v62, %v5799_v5  ;;  %v6603_v39 = vld [vmem:[#allocation92_spill] sm:$0xff] }
 0x1d2   : > { %v2259_v41 = vadd.f32 %v6599_v0, %v2190_v16  ;;  %v2992_v23 = vadd.f32 3.0, %v2960_v38  ;;  %v3025_v49 = vmax.f32 %v2993_v22, 0.0  ;;  %v2260_v57 = vadd.f32 %v6600_v50, %v2191_v25 }
 0x1d3   : > { %v2363_v48 = vmul.f32 %v5582_v2, %v5877_v55  ;;  %v3136_v59 = vmul.f32 0.16666667, %v3104_v33  ;;  %v3137_v18 = vmul.f32 0.16666667, %v3105_v31  ;;  %v2364_v29 = vmul.f32 %v5582_v2, %v6601_v7 }
 0x1d4   : > { %v2328_v20 = vadd.f32 %v2296_v46, %v2259_v41  ;;  %v3024_v1 = vmax.f32 %v2992_v23, 0.0  ;;  %v3057_v10 = vmin.f32 %v3025_v49, 6.0  ;;  %v2329_v6 = vadd.f32 %v2297_v35, %v2260_v57 }
 0x1d5   : > { %v2432_v12 = vadd.f32 %v6602_v63, %v2363_v48  ;;  %v5897_v21 = vpack.c.bf16 %v3137_v18, %v3136_v59  ;;  %v2433_v16 = vadd.f32 %v6603_v39, %v2364_v29  ;;  %v2469_v22 = vmul.f32 %v5646_v53, %v5873_v32  ;;  %v6604_v48 = vld [vmem:[#allocation102_spill] sm:$0xff]  ;;  %v6605_v59 = vld [vmem:[#allocation109_spill] sm:$0xff] }
 0x1d6   : > { %v2470_v25 = vmul.f32 %v5646_v53, %v5879_v9  ;;  %v3056_v33 = vmin.f32 %v3024_v1, 6.0  ;;  %v3089_v46 = vmul.f32 %v3057_v10, %v2961_v44  ;;  %v2671_v31 = vmul.f32 %v5655_v34, %v5713_v3  ;;  %v6607_v39 = vld [vmem:[#allocation30_spill] sm:$0xff] }
 0x1d7   : > { %v2672_v0 = vmul.f32 %v5655_v34, %v6557_v51  ;;  %4011 = vmatprep.subr.bf16.mxu0 %v5897_v21  ;;  %v2501_v41 = vadd.f32 %v2469_v22, %v2432_v12  ;;  %v2777_v23 = vmul.f32 %v5459_v11, %v5709_v60  ;;  %v2778_v49 = vmul.f32 %v5459_v11, %v5716_v4  ;;  %v6608_v22 = vld [vmem:[#allocation31_spill] sm:$0xff] }
 0x1d8   : > { %v2502_v35 = vadd.f32 %v2470_v25, %v2433_v16  ;;  %v3088_v50 = vmul.f32 %v3056_v33, %v2960_v38  ;;  %v3121_v57 = vmul.f32 0.16666667, %v3089_v46  ;;  %v2740_v44 = vadd.f32 %v6604_v48, %v2671_v31  ;;  %v6606_v38 = vld [vmem:[#allocation16_spill] sm:$0xff]  ;;  %v6609_v31 = vld [vmem:[#allocation26_spill] sm:$0xff] }
 0x1d9   : > { %v2741_v18 = vadd.f32 %v6605_v59, %v2672_v0  ;;  %v2631_v3 = vadd.f32 %v2501_v41, %v2328_v20  ;;  %v2174_v51 = vmul.f32 %v5522_v58, %v6583_v40  ;;  %v2280_v1 = vmul.f32 %v5631_v62, %v6585_v15 }
 0x1da   : > { %v2632_v29 = vadd.f32 %v2502_v35, %v2329_v6  ;;  %v3120_v10 = vmul.f32 0.16666667, %v3088_v50  ;;  %v2809_v63 = vadd.f32 %v2777_v23, %v2740_v44  ;;  %v2281_v4 = vmul.f32 %v5631_v62, %v6586_v42  ;;  %v6610_v35 = vld [vmem:[#allocation24_spill] sm:$0xff] }
 0x1db   : > { %v2810_v60 = vadd.f32 %v2778_v49, %v2741_v18  ;;  %v2243_v12 = vadd.f32 %v6606_v38, %v2174_v51  ;;  %v2453_v16 = vmul.f32 %v5646_v53, %v6607_v39  ;;  %v2454_v20 = vmul.f32 %v5646_v53, %v6608_v22  ;;  %v6611_v49 = vld [vmem:[#allocation33_spill] sm:$0xff]  ;;  %v6613_v51 = vld [vmem:[#allocation50_spill] sm:$0xff]  ;;  %v6615_v38 = vld [vmem:[#allocation64_spill] sm:$0xff] }
 0x1dc   : > { %v2761_v6 = vmul.f32 %v5459_v11, %v6562_v24  ;;  %v5928_v25 = vpack.c.bf16 %v3121_v57, %v3120_v10  ;;  %v2935_v33 = vadd.f32 %v2809_v63, %v2631_v3  ;;  %v2313_v0 = vadd.f32 %v2281_v4, %v6609_v31  ;;  %v6612_v57 = vld [vmem:[#allocation40_spill] sm:$0xff]  ;;  %v6618_v31 = vld [vmem:[#allocation57_spill] sm:$0xff] }
 0x1dd   : > { %v2936_v46 = vadd.f32 %v2810_v60, %v2632_v29  ;;  %v2312_v41 = vadd.f32 %v2280_v1, %v2243_v12  ;;  %v2485_v23 = vadd.f32 %v2453_v16, %v6610_v35  ;;  %v2486_v50 = vadd.f32 %v2454_v20, %v6611_v49 }
 0x1de   : > { %v2762_v48 = vmul.f32 %v5459_v11, %v6563_v27  ;;  %4012 = vmatpush3.bf16.msra.mxu0 %v5928_v25  ;;  %v2974_v44 = vadd.f32 %v5598_v45, %v2935_v33  ;;  %v2793_v59 = vadd.f32 %v2761_v6, %v6612_v57  ;;  %v930_v18 = vadd.s32 144, %v4366_v26 }
 0x1df   : > { %v2975_v24 = vadd.f32 %v5598_v45, %v2936_v46  ;;  %v2615_v3 = vadd.f32 %v2485_v23, %v2312_v41  ;;  %v2616_v29 = vadd.f32 %v2486_v50, %v2313_v0  ;;  %v931_v10 = vadd.s32 152, %v4366_v26 }
 0x1e0   : > { %v2794_v1 = vadd.f32 %v2762_v48, %v6613_v51  ;;  %v3006_v63 = vadd.f32 3.0, %v2974_v44  ;;  %v1074_v4 = vand.u32 15, %v930_v18  ;;  %v6614_v27 = vrot.slane %v6596_v61, 1  ;;  %v6620_v48 = vld [vmem:[#allocation74_spill] sm:$0xff] }
 0x1e1   : > { %v3007_v60 = vadd.f32 3.0, %v2975_v24  ;;  %v6616_v12 = vrot.slane %v6615_v38, 1  ;;  %v2919_v20 = vadd.f32 %v2793_v59, %v2615_v3  ;;  %v1081_v33 = vand.u32 15, %v931_v10  ;;  %v6621_v10 = vld [vmem:[#allocation82_spill] sm:$0xff]  ;;  %v6622_v38 = vld [vmem:[#allocation91_spill] sm:$0xff] }
 0x1e2   : > { %v2920_v6 = vadd.f32 %v2794_v1, %v2616_v29  ;;  %v6619_v0 = vrot.slane %v6618_v31, 1  ;;  %v3038_v35 = vmax.f32 %v3006_v63, 0.0  ;;  %vm1346_vm3 = vcmp.eq.s32.totalorder %v1074_v4, 0 }
 0x1e3   : > { %v2045_v16 = vsel %vm2033_vm1, %v6616_v12, %v6614_v27  ;;  %v6617_v46 = vmov %v6616_v12  ;;  %v3039_v23 = vmax.f32 %v3007_v60, 0.0  ;;  %v2188_v61 = vmul.f32 %v5522_v58, %v5877_v55 }
 0x1e4   : > { %v5954_v41 = vsel %vm2033_vm1, %v6619_v0, %v6617_v46  ;;  %v2958_v49 = vadd.f32 %v5598_v45, %v2919_v20  ;;  %v2959_v50 = vadd.f32 %v5598_v45, %v2920_v6  ;;  %vm1379_vm4 = vcmp.eq.s32.totalorder %v1081_v33, 15 }
 0x1e5   : > { %v5961_v57 = vsel %vm1346_vm3, 0.0, %v6620_v48  ;;  %v3070_v59 = vmin.f32 %v3038_v35, 6.0  ;;  %v3071_v18 = vmin.f32 %v3039_v23, 6.0  ;;  %v5963_v3 = vsel %vm1379_vm4, 0.0, %v2045_v16  ;;  %v6623_v23 = vld [vmem:[#allocation70_spill] sm:$0xff] }
 0x1e6   : > { %v2189_v29 = vmul.f32 %v5522_v58, %v6601_v7  ;;  %v2990_v51 = vadd.f32 3.0, %v2958_v49  ;;  %v2991_v1 = vadd.f32 3.0, %v2959_v50  ;;  %v2257_v63 = vadd.f32 %v6621_v10, %v2188_v61 }
 0x1e7   : > { %v2294_v60 = vmul.f32 %v5631_v62, %v5873_v32  ;;  %v3102_v4 = vmul.f32 %v3070_v59, %v2974_v44  ;;  %v3103_v27 = vmul.f32 %v3071_v18, %v2975_v24  ;;  %v2295_v20 = vmul.f32 %v5631_v62, %v5879_v9  ;;  %v6624_v24 = vld [vmem:[#allocation60_spill] sm:$0xff] }
 0x1e8   : > { %v2258_v12 = vadd.f32 %v6622_v38, %v2189_v29  ;;  %v3022_v6 = vmax.f32 %v2990_v51, 0.0  ;;  %v3023_v16 = vmax.f32 %v2991_v1, 0.0  ;;  %v2361_v46 = vmul.f32 %v5582_v2, %v5961_v57  ;;  %v6625_v51 = vld [vmem:[#allocation68_spill] sm:$0xff] }
 0x1e9   : > { %v2326_v33 = vadd.f32 %v2294_v60, %v2257_v63  ;;  %v3134_v31 = vmul.f32 0.16666667, %v3102_v4  ;;  %v3135_v0 = vmul.f32 0.16666667, %v3103_v27  ;;  %v2362_v61 = vmul.f32 %v5582_v2, %v6623_v23 }
 0x1ea   : > { %v2327_v35 = vadd.f32 %v2295_v20, %v2258_v12  ;;  %v3054_v48 = vmin.f32 %v3022_v6, 6.0  ;;  %v3055_v44 = vmin.f32 %v3023_v16, 6.0  ;;  %v2430_v59 = vadd.f32 %v6624_v24, %v2361_v46  ;;  %v6626_v20 = vld [vmem:[#allocation79_spill] sm:$0xff] }
 0x1eb   : > { %v2467_v18 = vmul.f32 %v5646_v53, %v5954_v41  ;;  %v5980_v29 = vpack.c.bf16 %v3135_v0, %v3134_v31  ;;  %v2431_v1 = vadd.f32 %v6625_v51, %v2362_v61  ;;  %v2468_v10 = vmul.f32 %v5646_v53, %v5963_v3 }
 0x1ec   : > { %v2669_v63 = vmul.f32 %v5655_v34, %v5797_v52  ;;  %v3086_v60 = vmul.f32 %v3054_v48, %v2958_v49  ;;  %v3087_v4 = vmul.f32 %v3055_v44, %v2959_v50  ;;  %v2670_v38 = vmul.f32 %v5655_v34, %v6578_v56  ;;  %v6627_v49 = vld [vmem:[#allocation88_spill] sm:$0xff] }
 0x1ed   : > { %v2499_v27 = vadd.f32 %v2467_v18, %v2430_v59  ;;  %4013 = vmatprep.subr.bf16.mxu0 %v5980_v29  ;;  %v2500_v12 = vadd.f32 %v2468_v10, %v2431_v1  ;;  %v2775_v16 = vmul.f32 %v5459_v11, %v5790_v28  ;;  %v2776_v46 = vmul.f32 %v5459_v11, %v5799_v5  ;;  %v6628_v28 = vld [vmem:[#allocation13_spill] sm:$0xff]  ;;  %v6629_v18 = vld [vmem:[#allocation4_spill] sm:$0xff]  ;;  %v6630_v5 = vld [vmem:[#allocation7_spill] sm:$0xff] }
 0x1ee   : > { %v2738_v6 = vadd.f32 %v6626_v20, %v2669_v63  ;;  %v3118_v31 = vmul.f32 0.16666667, %v3086_v60  ;;  %v3119_v0 = vmul.f32 0.16666667, %v3087_v4  ;;  %v2739_v50 = vadd.f32 %v6627_v49, %v2670_v38  ;;  %v6631_v10 = vld [vmem:[#allocation23_spill] sm:$0xff]  ;;  %v6633_v4 = vld [vmem:[#allocation21_spill] sm:$0xff] }
 0x1ef   : > { %v2629_v52 = vadd.f32 %v2499_v27, %v2326_v33  ;;  %v2630_v61 = vadd.f32 %v2500_v12, %v2327_v35  ;;  %v2278_v56 = vmul.f32 %v5631_v62, %v6607_v39  ;;  %v2279_v44 = vmul.f32 %v5631_v62, %v6608_v22  ;;  %v6632_v35 = vld [vmem:[#allocation32_spill] sm:$0xff] }
 0x1f0   : > { %v2807_v48 = vadd.f32 %v2775_v16, %v2738_v6  ;;  %v6000_v24 = vpack.c.bf16 %v3119_v0, %v3118_v31  ;;  %v2808_v59 = vadd.f32 %v2776_v46, %v2739_v50  ;;  %v2414_v51 = vadd.f32 %v6629_v18, %v6628_v28  ;;  %v6634_v46 = vld [vmem:[#allocation9_spill] sm:$0xff]  ;;  %v6637_v28 = vld [vmem:[#allocation59_spill] sm:$0xff] }
 0x1f1   : > { %v2451_v1 = vmul.f32 %v5646_v53, %v6630_v5  ;;  %v2310_v63 = vadd.f32 %v2278_v56, %v6631_v10  ;;  %v2311_v60 = vadd.f32 %v2279_v44, %v6632_v35  ;;  %v2452_v27 = vmul.f32 %v5646_v53, %v6633_v4  ;;  %v6636_v44 = vld [vmem:[#allocation28_spill] sm:$0xff] }
 0x1f2   : > { %v2933_v33 = vadd.f32 %v2807_v48, %v2629_v52  ;;  %4014 = vmatpush3.bf16.msra.mxu0 %v6000_v24  ;;  %v2934_v38 = vadd.f32 %v2808_v59, %v2630_v61  ;;  %v2653_v20 = vmul.f32 %v5655_v34, %v6583_v40  ;;  %v2759_v6 = vmul.f32 %v5459_v11, %v6585_v15  ;;  %v6635_v61 = vld [vmem:[#allocation19_spill] sm:$0xff] }
 0x1f3   : > { %v2483_v12 = vadd.f32 %v2451_v1, %v2414_v51  ;;  %v2484_v31 = vadd.f32 %v2452_v27, %v6634_v46  ;;  %v2760_v0 = vmul.f32 %v5459_v11, %v6586_v42  ;;  %v2186_v52 = vmul.f32 %v5522_v58, %v5961_v57  ;;  %v6638_v11 = vld [vmem:[#allocation67_spill] sm:$0xff]  ;;  %v6639_v27 = vld [vmem:[#allocation65_spill] sm:$0xff] }
 0x1f4   : > { %v2972_v16 = vadd.f32 %v5598_v45, %v2933_v33  ;;  %v2973_v49 = vadd.f32 %v5598_v45, %v2934_v38  ;;  %v2722_v48 = vadd.f32 %v6635_v61, %v2653_v20  ;;  %v2187_v40 = vmul.f32 %v5522_v58, %v6623_v23  ;;  %v6640_v20 = vld [vmem:[#allocation75_spill] sm:$0xff] }
 0x1f5   : > { %v2613_v50 = vadd.f32 %v2483_v12, %v2310_v63  ;;  %v2614_v15 = vadd.f32 %v2484_v31, %v2311_v60  ;;  %v2792_v59 = vadd.f32 %v2760_v0, %v6636_v44  ;;  %v2255_v18 = vadd.f32 %v6637_v28, %v2186_v52  ;;  %v6641_v52 = vld [vmem:[#allocation63_spill] sm:$0xff]  ;;  %v6643_v44 = vld [vmem:[#allocation76_spill] sm:$0xff] }
 0x1f6   : > { %v3004_v56 = vadd.f32 3.0, %v2972_v16  ;;  %v3005_v51 = vadd.f32 3.0, %v2973_v49  ;;  %v2791_v1 = vadd.f32 %v2759_v6, %v2722_v48  ;;  %v2256_v42 = vadd.f32 %v6638_v11, %v2187_v40 }
 0x1f7   : > { %v2292_v33 = vmul.f32 %v5631_v62, %v5954_v41  ;;  %v2918_v63 = vadd.f32 %v2792_v59, %v2614_v15  ;;  %v2293_v35 = vmul.f32 %v5631_v62, %v5963_v3  ;;  %v2359_v58 = vmul.f32 %v5582_v2, %v6639_v27 }
 0x1f8   : > { %v3036_v10 = vmax.f32 %v3004_v56, 0.0  ;;  %v3037_v60 = vmax.f32 %v3005_v51, 0.0  ;;  %v2917_v38 = vadd.f32 %v2791_v1, %v2613_v50  ;;  %v2360_v46 = vmul.f32 %v5582_v2, %v6640_v20  ;;  %v6642_v56 = vld [vmem:[#allocation72_spill] sm:$0xff] }
 0x1f9   : > { %v2324_v12 = vadd.f32 %v2292_v33, %v2255_v18  ;;  %v2957_v31 = vadd.f32 %v5598_v45, %v2918_v63  ;;  %v2325_v0 = vadd.f32 %v2293_v35, %v2256_v42  ;;  %v2428_v61 = vadd.f32 %v6641_v52, %v2359_v58  ;;  %v6644_v18 = vld [vmem:[#allocation99_spill] sm:$0xff]  ;;  %v6645_v58 = vld [vmem:[#allocation84_spill] sm:$0xff] }
 0x1fa   : > { %v3068_v6 = vmin.f32 %v3036_v10, 6.0  ;;  %v3069_v48 = vmin.f32 %v3037_v60, 6.0  ;;  %v2956_v40 = vadd.f32 %v5598_v45, %v2917_v38  ;;  %v2429_v15 = vadd.f32 %v6642_v56, %v2360_v46 }
 0x1fb   : > { %v2465_v59 = vmul.f32 %v5646_v53, %v6643_v44  ;;  %v2989_v50 = vadd.f32 3.0, %v2957_v31  ;;  %v2466_v51 = vmul.f32 %v5646_v53, %v6644_v18  ;;  %v2667_v2 = vmul.f32 %v5655_v34, %v5877_v55  ;;  %v6053_v55 = vld [vmem:[%s6271_s3 + $0xa] ss:$0 sm:$0xff] }
 0x1fc   : > { %v3100_v28 = vmul.f32 %v3068_v6, %v2972_v16  ;;  %v3101_v1 = vmul.f32 %v3069_v48, %v2973_v49  ;;  %v2988_v11 = vadd.f32 3.0, %v2956_v40  ;;  %v2668_v33 = vmul.f32 %v5655_v34, %v6601_v7  ;;  %v6646_v6 = vld [vmem:[#allocation93_spill] sm:$0xff] }
 0x1fd   : > { %v2497_v42 = vadd.f32 %v2465_v59, %v2428_v61  ;;  %v3021_v63 = vmax.f32 %v2989_v50, 0.0  ;;  %v2498_v35 = vadd.f32 %v2466_v51, %v2429_v15  ;;  %v2736_v60 = vadd.f32 %v6645_v58, %v2667_v2  ;;  %v6647_v15 = vld [vmem:[#allocation11_spill] sm:$0xff] }
 0x1fe   : > { %v3132_v10 = vmul.f32 0.16666667, %v3100_v28  ;;  %v3133_v38 = vmul.f32 0.16666667, %v3101_v1  ;;  %v3020_v16 = vmax.f32 %v2988_v11, 0.0  ;;  %v2737_v52 = vadd.f32 %v6646_v6, %v2668_v33 }
 0x1ff   : > { %v2627_v46 = vadd.f32 %v2497_v42, %v2324_v12  ;;  %v3053_v56 = vmin.f32 %v3021_v63, 6.0  ;;  %v2628_v36 = vadd.f32 %v2498_v35, %v2325_v0  ;;  %v2773_v7 = vmul.f32 %v6053_v55, %v5873_v32  ;;  %v6648_v12 = vld [vmem:[#allocation3_spill] sm:$0xff]  ;;  %v6650_v35 = vld [vmem:[#allocation8_spill] sm:$0xff] }
 0x200   : > { %v2774_v49 = vmul.f32 %v6053_v55, %v5879_v9  ;;  %v6059_v61 = vpack.c.bf16 %v3133_v38, %v3132_v10  ;;  %v3052_v48 = vmin.f32 %v3020_v16, 6.0  ;;  %v2239_v59 = vadd.f32 %v6648_v12, %v6647_v15  ;;  %v6649_v9 = vld [vmem:[#allocation14_spill] sm:$0xff]  ;;  %v6651_v16 = vld [vmem:[#allocation25_spill] sm:$0xff] }
 0x201   : > { %v2276_v0 = vmul.f32 %v5631_v62, %v6630_v5  ;;  %v3085_v28 = vmul.f32 %v3053_v56, %v2957_v31  ;;  %v2805_v50 = vadd.f32 %v2773_v7, %v2736_v60  ;;  %v2277_v2 = vmul.f32 %v5631_v62, %v6633_v4  ;;  %v6653_v7 = vld [vmem:[#allocation34_spill] sm:$0xff] }
 0x202   : > { %v2806_v51 = vadd.f32 %v2774_v49, %v2737_v52  ;;  %4015 = vmatprep.subr.bf16.mxu0 %v6059_v61  ;;  %v3084_v32 = vmul.f32 %v3052_v48, %v2956_v40  ;;  %v2481_v11 = vadd.f32 %v6649_v9, %v5545_v17  ;;  %v2757_v42 = vmul.f32 %v6053_v55, %v6607_v39  ;;  %v6652_v17 = vld [vmem:[#allocation20_spill] sm:$0xff]  ;;  %v4216_v39 = vld [vmem:[%s6271_s3 + $0x4] ss:$0 sm:$0xff] }
 0x203   : > { %v2308_v1 = vadd.f32 %v2276_v0, %v2239_v59  ;;  %v3117_v33 = vmul.f32 0.16666667, %v3085_v28  ;;  %v2931_v10 = vadd.f32 %v2805_v50, %v2627_v46  ;;  %v2309_v31 = vadd.f32 %v2277_v2, %v6650_v35  ;;  %v6654_v59 = vld [vmem:[#allocation62_spill] sm:$0xff] }
 0x204   : > { %v2932_v63 = vadd.f32 %v2806_v51, %v2628_v36  ;;  %v3116_v58 = vmul.f32 0.16666667, %v3084_v32  ;;  %v2758_v38 = vmul.f32 %v6053_v55, %v6608_v22  ;;  %v2789_v6 = vadd.f32 %v2757_v42, %v6651_v16 }
 0x205   : > { %v2611_v60 = vadd.f32 %v2481_v11, %v2308_v1  ;;  %v2970_v40 = vadd.f32 %v5598_v45, %v2931_v10  ;;  %v2612_v56 = vadd.f32 %v6652_v17, %v2309_v31  ;;  %v2184_v36 = vmul.f32 %v4216_v39, %v6639_v27  ;;  %v6655_v27 = vld [vmem:[#allocation71_spill] sm:$0xff]  ;;  %v4217_v11 = vld [vmem:[%s6271_s3] ss:$0 sm:$0xff] }
 0x206   : > { %v2971_v52 = vadd.f32 %v5598_v45, %v2932_v63  ;;  %v6083_v46 = vpack.c.bf16 %v3117_v33, %v3116_v58  ;;  %v2790_v49 = vadd.f32 %v2758_v38, %v6653_v7  ;;  %v2185_v22 = vmul.f32 %v4216_v39, %v6640_v20  ;;  %v6656_v63 = vld [vmem:[#allocation51_spill] sm:$0xff] }
 0x207   : > { %v2915_v48 = vadd.f32 %v2789_v6, %v2611_v60  ;;  %v3002_v15 = vadd.f32 3.0, %v2970_v40  ;;  %v2253_v0 = vadd.f32 %v6654_v59, %v2184_v36  ;;  %v2290_v28 = vmul.f32 %v5631_v62, %v6643_v44  ;;  %v6657_v60 = vld [vmem:[#allocation48_spill] sm:$0xff]  ;;  %v6658_v6 = vld [vmem:[#allocation53_spill] sm:$0xff] }
 0x208   : > { %v3003_v12 = vadd.f32 3.0, %v2971_v52  ;;  %4016 = vmatpush3.bf16.msra.mxu0 %v6083_v46  ;;  %v2916_v50 = vadd.f32 %v2790_v49, %v2612_v56  ;;  %v2254_v2 = vadd.f32 %v6655_v27, %v2185_v22  ;;  %v2291_v32 = vmul.f32 %v5631_v62, %v6644_v18  ;;  %v6659_v59 = vld [vmem:[#allocation61_spill] sm:$0xff] }
 0x209   : > { %v2954_v51 = vadd.f32 %v5598_v45, %v2915_v48  ;;  %v3034_v1 = vmax.f32 %v3002_v15, 0.0  ;;  %v2322_v20 = vadd.f32 %v2290_v28, %v2253_v0  ;;  %v2357_v42 = vmul.f32 %v4217_v11, %v6542_v13 }
 0x20a   : > { %v3035_v9 = vmax.f32 %v3003_v12, 0.0  ;;  %v2955_v44 = vadd.f32 %v5598_v45, %v2916_v50  ;;  %v2323_v10 = vadd.f32 %v2291_v32, %v2254_v2  ;;  %v2358_v35 = vmul.f32 %v4217_v11, %v6656_v63 }
 0x20b   : > { %v2986_v33 = vadd.f32 3.0, %v2954_v51  ;;  %v3066_v31 = vmin.f32 %v3034_v1, 6.0  ;;  %v2426_v38 = vadd.f32 %v6657_v60, %v2357_v42  ;;  %v2463_v62 = vmul.f32 %v5646_v53, %v6543_v8  ;;  %v6662_v1 = vld [vmem:[#allocation15_spill] sm:$0xff] }
 0x20c   : > { %v3067_v58 = vmin.f32 %v3035_v9, 6.0  ;;  %v2987_v18 = vadd.f32 3.0, %v2955_v44  ;;  %v2427_v17 = vadd.f32 %v6658_v6, %v2358_v35  ;;  %v2464_v13 = vmul.f32 %v5646_v53, %v6545_v14  ;;  %v6660_v14 = vld [vmem:[#allocation69_spill] sm:$0xff]  ;;  %v6665_v35 = vld [vmem:[#allocation10_spill] sm:$0xff] }
 0x20d   : > { %v3018_v16 = vmax.f32 %v2986_v33, 0.0  ;;  %v3098_v56 = vmul.f32 %v3066_v31, %v2970_v40  ;;  %v2495_v39 = vadd.f32 %v2463_v62, %v2426_v38  ;;  %v2665_v36 = vmul.f32 %v5655_v34, %v5961_v57  ;;  %v6663_v9 = vld [vmem:[#allocation5_spill] sm:$0xff]  ;;  %v6664_v33 = vld [vmem:[#allocation12_spill] sm:$0xff]  ;;  %v4218_v38 = vld [vmem:[%s6272_s4] ss:$0 sm:$0xff] }
 0x20e   : > { %v3099_v45 = vmul.f32 %v3067_v58, %v2971_v52  ;;  %v3019_v7 = vmax.f32 %v2987_v18, 0.0  ;;  %v2496_v48 = vadd.f32 %v2464_v13, %v2427_v17  ;;  %v2666_v22 = vmul.f32 %v5655_v34, %v6623_v23  ;;  %v6661_v34 = vld [vmem:[#allocation6_spill] sm:$0xff] }
 0x20f   : > { %v3050_v49 = vmin.f32 %v3018_v16, 6.0  ;;  %v3130_v8 = vmul.f32 0.16666667, %v3098_v56  ;;  %v2625_v12 = vadd.f32 %v2495_v39, %v2322_v20  ;;  %v2734_v0 = vadd.f32 %v6659_v59, %v2665_v36  ;;  %v6666_v16 = vld [vmem:[#allocation18_spill] sm:$0xff] }
 0x210   : > { %v3131_v15 = vmul.f32 0.16666667, %v3099_v45  ;;  %v3051_v28 = vmin.f32 %v3019_v7, 6.0  ;;  %v2626_v53 = vadd.f32 %v2496_v48, %v2323_v10  ;;  %v2735_v40 = vadd.f32 %v6660_v14, %v2666_v22 }
 0x211   : > { %v3082_v50 = vmul.f32 %v3050_v49, %v2954_v51  ;;  %v2771_v57 = vmul.f32 %v6053_v55, %v5954_v41  ;;  %v2772_v27 = vmul.f32 %v6053_v55, %v5963_v3  ;;  %v2237_v23 = vadd.f32 %v6661_v34, %v5525_v19 }
 0x212   : > { %v6113_v52 = vpack.c.bf16 %v3131_v15, %v3130_v8  ;;  %v3083_v2 = vmul.f32 %v3051_v28, %v2955_v44  ;;  %v2718_v20 = vadd.f32 %v6663_v9, %v6662_v1  ;;  %v2755_v51 = vmul.f32 %v6053_v55, %v6630_v5 }
 0x213   : > { %v3114_v32 = vmul.f32 0.16666667, %v3082_v50  ;;  %v2803_v11 = vadd.f32 %v2771_v57, %v2734_v0  ;;  %v2804_v42 = vadd.f32 %v2772_v27, %v2735_v40  ;;  %v2306_v41 = vadd.f32 %v6664_v33, %v2237_v23  ;;  %v4183_v33 = vld [vmem:[%s6277_s9 + $0x30] sm:$0xff]  }
 0x214   : > { %4017 = vmatprep.subr.bf16.mxu0 %v6113_v52  ;;  %v2756_v3 = vmul.f32 %v6053_v55, %v6633_v4  ;;  %v3115_v10 = vmul.f32 0.16666667, %v3083_v2  ;;  %v2787_v63 = vadd.f32 %v2755_v51, %v2718_v20  ;;  %v4243_v58 = vmov 998259584   ;;  %v3200_v2 = vld [vmem:[%s6273_s5] sm:$0x1] }
 0x215   : > { %v2929_v19 = vadd.f32 %v2803_v11, %v2625_v12  ;;  %v2930_v44 = vadd.f32 %v2804_v42, %v2626_v53  ;;  %3192 = vmatprep.mubr.bf16.mxu0 %v4243_v58  ;;  %vm3202_vm1 = vcmask 1040384   ;;  %v4244_v11 = vmov 0   ;;  %v4182_v42 = vld [vmem:[%s6277_s9 + $0x38] sm:$0xff]  }
 0x216   : > { %v2788_v31 = vadd.f32 %v2756_v3, %v6665_v35  ;;  %v6130_v60 = vpack.c.bf16 %v3115_v10, %v3114_v32  ;;  %v2913_v5 = vadd.f32 %v2787_v63, %v2306_v41  ;;  %4157 = vset.pattern.permute.xlu0 %v4244_v11  ;;  %4099 = vmatprep.subr.bf16.mxu1 %v4182_v42  ;;  %v4184_v41 = vld [vmem:[%s6277_s9 + $0x28] sm:$0xff]   ;;  %v3206_v3 = vld [vmem:[#allocation2] sm:$0x1] }
 0x217   : > { %v2968_v62 = vadd.f32 %v4218_v38, %v2929_v19  ;;  %v2969_v18 = vadd.f32 %v4218_v38, %v2930_v44  ;;  %4100 = vmatpush3.bf16.msra.mxu1 %v4182_v42  ;;  %v4185_v35 = vld [vmem:[%s6277_s9 + $0x20] sm:$0xff]  }
 0x218   : > { %v2914_v6 = vadd.f32 %v2788_v31, %v6666_v16  ;;  %4018 = vmatpush3.bf16.msra.mxu0 %v6130_v60  ;;  %v2952_v4 = vadd.f32 %v4218_v38, %v2913_v5  ;;  %4101 = vmatprep.subr.bf16.mxu1 %v4183_v33  ;;  %v4186_v31 = vld [vmem:[%s6277_s9 + $0x18] sm:$0xff]   ;;  %v4188_v5 = vld [vmem:[%s6277_s9 + $0x8] sm:$0xff]  }
 0x219   : > { %v3000_v55 = vadd.f32 3.0, %v2968_v62  ;;  %v3001_v17 = vadd.f32 3.0, %v2969_v18 }
 0x21a   : > { %v2953_v13 = vadd.f32 %v4218_v38, %v2914_v6  ;;  %v2984_v56 = vadd.f32 3.0, %v2952_v4  ;;  %v4189_v38 = vld [vmem:[%s6277_s9] sm:$0xff]  }
 0x21b   : > { %v3032_v45 = vmax.f32 %v3000_v55, 0.0  ;;  %v3033_v39 = vmax.f32 %v3001_v17, 0.0  ;;  %4102 = vmatpush3.bf16.msra.mxu1 %v4183_v33 }
 0x21c   : > { %v2985_v36 = vadd.f32 3.0, %v2953_v13  ;;  %v3016_v7 = vmax.f32 %v2984_v56, 0.0  ;;  %4103 = vmatprep.subr.bf16.mxu1 %v4184_v41 }
 0x21d   : > { %v3064_v49 = vmin.f32 %v3032_v45, 6.0  ;;  %v3065_v48 = vmin.f32 %v3033_v39, 6.0  ;;  %v3230_v45 = vsub.s32 0, %v4366_v26 }
 0x21e   : > { %v3017_v22 = vmax.f32 %v2985_v36, 0.0  ;;  %v3048_v8 = vmin.f32 %v3016_v7, 6.0 }
 0x21f   : > { %v3096_v15 = vmul.f32 %v3064_v49, %v2968_v62  ;;  %v3097_v12 = vmul.f32 %v3065_v48, %v2969_v18  ;;  %4104 = vmatpush3.bf16.msra.mxu1 %v4184_v41  ;;  %v3210_v62 = vld [vmem:[%s6275_s7] sm:$0x1] }
 0x220   : > { %v3049_v59 = vmin.f32 %v3017_v22, 6.0  ;;  %v3080_v0 = vmul.f32 %v3048_v8, %v2952_v4  ;;  %4105 = vmatprep.subr.bf16.mxu1 %v4185_v35  ;;  %v3218_v18 = vld [vmem:[%s6276_s8] sm:$0x1] }
 0x221   : > { %v3128_v28 = vmul.f32 0.16666667, %v3096_v15  ;;  %v3129_v50 = vmul.f32 0.16666667, %v3097_v12 }
 0x222   : > { %v3081_v53 = vmul.f32 %v3049_v59, %v2953_v13  ;;  %v3112_v14 = vmul.f32 0.16666667, %v3080_v0  ;;  %v6667_v0 = vld [vmem:[#allocation112_spill] sm:$0xff] }
 0x223   : > { %v6137_v40 = vpack.c.bf16 %v3129_v50, %v3128_v28  ;;  %4106 = vmatpush3.bf16.msra.mxu1 %v4185_v35  ;;  %v6192_v28 = vld [vmem:[%s6278_s10] ss:$0 sm:$0xff]  ;;  %v4219_v50 = vld [vmem:[%s4333_s29 + $0x8] sm:$0xff]   ;;  %v4222_v35 = vld [vmem:[%s4333_s29 + $0x10] sm:$0xff]  }
 0x224   : > { %v3113_v57 = vmul.f32 0.16666667, %v3081_v53  ;;  %4107 = vmatprep.subr.bf16.mxu1 %v4186_v31  ;;  %v3482_v53 = vunpack.c.l.bf16 %v4219_v50 }
 0x225   : > { %4019 = vmatprep.subr.bf16.mxu0 %v6137_v40 }
 0x226   : > { %v3144_v27 = vpack.c.bf16 %v3113_v57, %v3112_v14 }
 0x227   : > { %4108 = vmatpush3.bf16.msra.mxu1 %v4186_v31  ;;  %v3484_v31 = vunpack.c.l.bf16 %v4222_v35 }
 0x228   : > { %4020 = vmatpush3.bf16.msra.mxu0 %v3144_v27 }
 0x22b   : > { %3193 = vmatmul.mubr.bf16.vlgmr.msra.gmra.mxu0 %v4243_v58  ;;  %v4187_v58 = vld [vmem:[%s6277_s9 + $0x10] sm:$0xff]  }
 0x22c   : > { %4109 = vmatprep.subr.bf16.mxu1 %v4187_v58 }
 0x22d   : > { %4110 = vmatpush3.bf16.msra.mxu1 %v4187_v58 }
 0x22e   : > { %4111 = vmatprep.subr.bf16.mxu1 %v4188_v5 }
 0x231   : > { %4112 = vmatpush3.bf16.msra.mxu1 %v4188_v5  ;;  %v3485_v5 = vunpack.c.h.bf16 %v4222_v35 }
 0x232   : > { %4113 = vmatprep.subr.bf16.mxu1 %v4189_v38 }
 0x235   : > { %4114 = vmatpush3.bf16.msra.mxu1 %v4189_v38 }
 0x2eb   : > { %v4021_v34 = vpop.f32.mrf.mxu0 }
 0x2ed   : > { %v4022_v23 = vpop.f32.mrf.mxu0 }
 0x2ee   : > { %v4023_v32 = vadd.f32 %v4022_v23, %v4021_v34 }
 0x2ef   : > { %v4024_v1 = vpop.f32.mrf.mxu0 }
 0x2f0   : > { %v3201_v9 = vmul.f32 %v4023_v32, %v3200_v2 }
 0x2f1   : > { %v4025_v20 = vpop.f32.mrf.mxu0 }
 0x2f2   : > { %v3203_v51 = vsel %vm3202_vm1, %v3201_v9, 0.0 }
 0x2f3   : > { %3204 = vadd.xlane.f32.xlu0 %v3203_v51 }
 0x37c   : > { %v3205_v10 = vpop.xlane.xlu0 %3204 }
 0x37d   : > { %v3207_v63 = vadd.f32 %v3206_v3, %v3205_v10  ;;  %v4221_v3 = vld [vmem:[%s4333_s29 + $0x18] sm:$0xff]  }
 0x37e   : > { %v3486_v10 = vunpack.c.l.bf16 %v4221_v3 }
 0x37f   : > { %v3208_v19 = vmax.f32 %v3207_v63, 0.0  ;;  %v3487_v63 = vunpack.c.h.bf16 %v4221_v3 }
 0x381   : > { %v3209_v44 = vmin.f32 %v3208_v19, 6.0 }
 0x383   : > { %3213 = vperm.xlu0 %4157, %v3209_v44  }
 0x3fe   : > { %v3214_v16 = vpop.permute.xlu0 %3213 }
 0x3ff   : > { %v3216_v6 = vmul.f32 %v3214_v16, %v3210_v62 }
 0x401   : > { %v3219_v4 = vadd.f32 %v3218_v18, %v3216_v6 }
 0x403   : > { %v3220_v55 = vadd.f32 3.0, %v3219_v4 }
 0x405   : > { %v3221_v17 = vmax.f32 %v3220_v55, 0.0 }
 0x407   : > { %v3222_v13 = vmin.f32 %v3221_v17, 6.0 }
 0x409   : > { %v3223_v56 = vmul.f32 0.16666667, %v3222_v13 }
 0x40b   : > { %v3224_v39 = vpack.c.bf16 %v3223_v56, %v3223_v56 }
 0x40d   : > { %v3226_v36 = vpack.i.b16 %v3224_v39, %v3224_v39  ;;  %v4223_v39 = vld [vmem:[%s4333_s29 + $0x28] sm:$0xff]  }
 0x40f   : > { %v3231_v7 = vrot.slane %v3226_v36, %v3230_v45  ;;  %v3490_v36 = vunpack.c.l.bf16 %v4223_v39 }
 0x411   : > { %v3232_v49 = vmul.bf16 %v3231_v7, %v3144_v27  ;;  %v3233_v48 = vmul.bf16 %v3231_v7, %v6130_v60  ;;  %v3234_v22 = vmul.bf16 %v3231_v7, %v6083_v46  ;;  %v3235_v8 = vmul.bf16 %v3231_v7, %v6000_v24 }
 0x412   : > { %v3236_v15 = vmul.bf16 %v3231_v7, %v5928_v25  ;;  %v3237_v12 = vmul.bf16 %v3231_v7, %v5838_v37  ;;  %v3238_v26 = vmul.bf16 %v3231_v7, %v5760_v43  ;;  %v3239_v59 = vmul.bf16 %v3231_v7, %v5666_v47 }
 0x413   : > { %4115 = vmatprep.mubr.bf16.mxu1 %v3232_v49  ;;  %v3240_v60 = vmul.bf16 %v3231_v7, %v6137_v40  ;;  %v3241_v46 = vmul.bf16 %v3231_v7, %v6113_v52  ;;  %v3242_v24 = vmul.bf16 %v3231_v7, %v6059_v61  ;;  %v3243_v25 = vmul.bf16 %v3231_v7, %v5980_v29 }
 0x414   : > { %4116 = vmatmul.mubr.bf16.vlgmr.msra.gmra.mxu1 %v3233_v48  ;;  %v3244_v37 = vmul.bf16 %v3231_v7, %v5897_v21  ;;  %v3245_v47 = vmul.bf16 %v3231_v7, %v5819_v30  ;;  %v3246_v43 = vmul.bf16 %v3231_v7, %v5732_v54  ;;  %v3247_v52 = vmul.bf16 %v3231_v7, %v6667_v0  ;;  %v4220_v54 = vld [vmem:[%s4333_s29] sm:$0xff]  }
 0x415   : > { %4119 = vmatprep.mubr.bf16.mxu1 %v3234_v22  ;;  %v3483_v30 = vunpack.c.h.bf16 %v4219_v50  ;;  %v3480_v40 = vunpack.c.l.bf16 %v4220_v54  ;;  %v3481_v57 = vunpack.c.h.bf16 %v4220_v54  ;;  %v3491_v7 = vunpack.c.h.bf16 %v4223_v39  ;;  %v4224_v22 = vld [vmem:[%s4333_s29 + $0x20] sm:$0xff]  }
 0x41c   : > { %4120 = vmatmul.mubr.bf16.gmra.mxu1 %v3235_v8  ;;  %v3488_v8 = vunpack.c.l.bf16 %v4224_v22 }
 0x41d   : > { %4123 = vmatprep.mubr.bf16.mxu1 %v3236_v15 }
 0x424   : > { %4124 = vmatmul.mubr.bf16.gmra.mxu1 %v3237_v12  ;;  %v3489_v12 = vunpack.c.h.bf16 %v4224_v22 }
 0x425   : > { %4127 = vmatprep.mubr.bf16.mxu1 %v3238_v26 }
 0x42c   : > { %4128 = vmatmul.mubr.bf16.gmra.mxu1 %v3239_v59 }
 0x42d   : > { %4131 = vmatprep.mubr.bf16.mxu1 %v3240_v60 }
 0x434   : > { %4132 = vmatmul.mubr.bf16.gmra.mxu1 %v3241_v46 }
 0x435   : > { %4135 = vmatprep.mubr.bf16.mxu1 %v3242_v24 }
 0x43c   : > { %4136 = vmatmul.mubr.bf16.gmra.mxu1 %v3243_v25 }
 0x43d   : > { %4139 = vmatprep.mubr.bf16.mxu1 %v3244_v37 }
 0x444   : > { %4140 = vmatmul.mubr.bf16.gmra.mxu1 %v3245_v47 }
 0x445   : > { %4143 = vmatprep.mubr.bf16.mxu1 %v3246_v43 }
 0x44c   : > { %4144 = vmatmul.mubr.bf16.gmra.mxu1 %v3247_v52 }
 0x4d4   : > { %v4117_v61 = vpop.f32.mrf.mxu1 }
 0x4d5   : > { %v3362_v29 = vadd.f32 %v4117_v61, %v6192_v28  ;;  %v4225_v61 = vld [vmem:[%s4333_s29 + $0x38] sm:$0xff]  }
 0x4d6   : > { %v3353_v21 = vpop.f32.mrf.mxu1 }
 0x4d7   : > { %v3354_v27 = vadd.f32 %v6192_v28, %v3353_v21  ;;  %v3514_v2 = vadd.f32 %v3482_v53, %v3362_v29  ;;  %v3494_v21 = vunpack.c.l.bf16 %v4225_v61  ;;  %v3495_v29 = vunpack.c.h.bf16 %v4225_v61 }
 0x4d8   : > { %v4118_v14 = vpop.f32.mrf.mxu1 }
 0x4d9   : > { %v3365_v34 = vadd.f32 %v4118_v14, %v6192_v28  ;;  %v3512_v20 = vadd.f32 %v3480_v40, %v3354_v27 }
 0x4da   : > { %v3356_v23 = vpop.f32.mrf.mxu1 }
 0x4db   : > { %v3515_v32 = vadd.f32 %v3483_v30, %v3365_v34  ;;  %v3357_v1 = vadd.f32 %v6192_v28, %v3356_v23  ;;  %v4226_v30 = vld [vmem:[%s4333_s29 + $0x30] sm:$0xff]  }
 0x4dc   : > { %v4121_v9 = vpop.f32.mrf.mxu1  ;;  %v3492_v14 = vunpack.c.l.bf16 %v4226_v30  ;;  %v3493_v40 = vunpack.c.h.bf16 %v4226_v30 }
 0x4dd   : > { %v3894_v51 = vpack.c.bf16 %v3515_v32, %v3514_v2  ;;  %v3513_v11 = vadd.f32 %v3481_v57, %v3357_v1  ;;  %v3378_v41 = vadd.f32 %v4121_v9, %v6192_v28 }
 0x4de   : > { %v3369_v42 = vpop.f32.mrf.mxu1 }
 0x4df   : > { %3966 = vst [vmem:[%s6205_s15 + $0x8] sm:$0xff] %v3894_v51   ;;  %v3889_v33 = vpack.c.bf16 %v3513_v11, %v3512_v20  ;;  %v3370_v44 = vadd.f32 %v6192_v28, %v3369_v42  ;;  %v3518_v62 = vadd.f32 %v3486_v10, %v3378_v41  ;;  %v4227_v42 = vld [vmem:[%s4333_s29 + $0x48] sm:$0xff]  }
 0x4e0   : > { %v4122_v19 = vpop.f32.mrf.mxu1  ;;  %v3499_v41 = vunpack.c.h.bf16 %v4227_v42 }
 0x4e1   : > { %3890 = vst [vmem:[%s6205_s15] sm:$0xff] %v3889_v33   ;;  %v3381_v58 = vadd.f32 %v4122_v19, %v6192_v28  ;;  %v3516_v4 = vadd.f32 %v3484_v31, %v3370_v44  ;;  %v3498_v33 = vunpack.c.l.bf16 %v4227_v42 }
 0x4e2   : > { %v3372_v38 = vpop.f32.mrf.mxu1 }
 0x4e3   : > { %v3519_v18 = vadd.f32 %v3487_v63, %v3381_v58  ;;  %v3373_v16 = vadd.f32 %v6192_v28, %v3372_v38  ;;  %v4228_v63 = vld [vmem:[%s4333_s29 + $0x40] sm:$0xff]  }
 0x4e4   : > { %v4125_v6 = vpop.f32.mrf.mxu1  ;;  %v3496_v19 = vunpack.c.l.bf16 %v4228_v63  ;;  %v3497_v35 = vunpack.c.h.bf16 %v4228_v63 }
 0x4e5   : > { %v3904_v55 = vpack.c.bf16 %v3519_v18, %v3518_v62  ;;  %v3517_v17 = vadd.f32 %v3485_v5, %v3373_v16  ;;  %v3394_v45 = vadd.f32 %v4125_v6, %v6192_v28 }
 0x4e6   : > { %v3385_v13 = vpop.f32.mrf.mxu1 }
 0x4e7   : > { %3968 = vst [vmem:[%s6205_s15 + $0x18] sm:$0xff] %v3904_v55   ;;  %v3899_v56 = vpack.c.bf16 %v3517_v17, %v3516_v4  ;;  %v3386_v48 = vadd.f32 %v6192_v28, %v3385_v13  ;;  %v3522_v59 = vadd.f32 %v3490_v36, %v3394_v45  ;;  %v4229_v13 = vld [vmem:[%s4333_s29 + $0x58] sm:$0xff]  }
 0x4e8   : > { %v4126_v49 = vpop.f32.mrf.mxu1  ;;  %v3503_v45 = vunpack.c.h.bf16 %v4229_v13 }
 0x4e9   : > { %3967 = vst [vmem:[%s6205_s15 + $0x10] sm:$0xff] %v3899_v56   ;;  %v3397_v15 = vadd.f32 %v4126_v49, %v6192_v28  ;;  %v3520_v25 = vadd.f32 %v3488_v8, %v3386_v48  ;;  %v3502_v56 = vunpack.c.l.bf16 %v4229_v13 }
 0x4ea   : > { %v3388_v26 = vpop.f32.mrf.mxu1 }
 0x4eb   : > { %v3523_v60 = vadd.f32 %v3491_v7, %v3397_v15  ;;  %v3389_v46 = vadd.f32 %v6192_v28, %v3388_v26  ;;  %v4230_v7 = vld [vmem:[%s4333_s29 + $0x50] sm:$0xff]  }
 0x4ec   : > { %v4129_v24 = vpop.f32.mrf.mxu1  ;;  %v3500_v49 = vunpack.c.l.bf16 %v4230_v7  ;;  %v3501_v22 = vunpack.c.h.bf16 %v4230_v7 }
 0x4ed   : > { %v3914_v37 = vpack.c.bf16 %v3523_v60, %v3522_v59  ;;  %v3521_v47 = vadd.f32 %v3489_v12, %v3389_v46  ;;  %v3410_v52 = vadd.f32 %v4129_v24, %v6192_v28 }
 0x4ee   : > { %v3401_v43 = vpop.f32.mrf.mxu1 }
 0x4ef   : > { %3970 = vst [vmem:[%s6205_s15 + $0x28] sm:$0xff] %v3914_v37   ;;  %v3909_v0 = vpack.c.bf16 %v3521_v47, %v3520_v25  ;;  %v3402_v53 = vadd.f32 %v6192_v28, %v3401_v43  ;;  %v3526_v27 = vadd.f32 %v3494_v21, %v3410_v52  ;;  %v4231_v43 = vld [vmem:[%s4333_s29 + $0x68] sm:$0xff]  }
 0x4f0   : > { %v4130_v50 = vpop.f32.mrf.mxu1  ;;  %v3507_v52 = vunpack.c.h.bf16 %v4231_v43 }
 0x4f1   : > { %3969 = vst [vmem:[%s6205_s15 + $0x20] sm:$0xff] %v3909_v0   ;;  %v3413_v54 = vadd.f32 %v4130_v50, %v6192_v28  ;;  %v3524_v32 = vadd.f32 %v3492_v14, %v3402_v53  ;;  %v3506_v0 = vunpack.c.l.bf16 %v4231_v43 }
 0x4f2   : > { %v3404_v57 = vpop.f32.mrf.mxu1 }
 0x4f3   : > { %v3527_v34 = vadd.f32 %v3495_v29, %v3413_v54  ;;  %v3405_v23 = vadd.f32 %v6192_v28, %v3404_v57  ;;  %v4232_v29 = vld [vmem:[%s4333_s29 + $0x60] sm:$0xff]  }
 0x4f4   : > { %v4133_v2 = vpop.f32.mrf.mxu1  ;;  %v3504_v50 = vunpack.c.l.bf16 %v4232_v29  ;;  %v3505_v30 = vunpack.c.h.bf16 %v4232_v29 }
 0x4f5   : > { %v3924_v1 = vpack.c.bf16 %v3527_v34, %v3526_v27  ;;  %v3525_v9 = vadd.f32 %v3493_v40, %v3405_v23  ;;  %v3426_v11 = vadd.f32 %v4133_v2, %v6192_v28 }
 0x4f6   : > { %v3417_v20 = vpop.f32.mrf.mxu1 }
 0x4f7   : > { %3972 = vst [vmem:[%s6205_s15 + $0x38] sm:$0xff] %v3924_v1   ;;  %v3919_v51 = vpack.c.bf16 %v3525_v9, %v3524_v32  ;;  %v3418_v10 = vadd.f32 %v6192_v28, %v3417_v20  ;;  %v3530_v58 = vadd.f32 %v3498_v33, %v3426_v11  ;;  %v4233_v20 = vld [vmem:[%s4333_s29 + $0x78] sm:$0xff]  }
 0x4f8   : > { %v4134_v3 = vpop.f32.mrf.mxu1  ;;  %v3511_v11 = vunpack.c.h.bf16 %v4233_v20 }
 0x4f9   : > { %3971 = vst [vmem:[%s6205_s15 + $0x30] sm:$0xff] %v3919_v51   ;;  %v3429_v44 = vadd.f32 %v4134_v3, %v6192_v28  ;;  %v3528_v18 = vadd.f32 %v3496_v19, %v3418_v10  ;;  %v3510_v51 = vunpack.c.l.bf16 %v4233_v20 }
 0x4fa   : > { %v3420_v31 = vpop.f32.mrf.mxu1 }
 0x4fb   : > { %v3531_v5 = vadd.f32 %v3499_v41, %v3429_v44  ;;  %v3421_v38 = vadd.f32 %v6192_v28, %v3420_v31  ;;  %v4234_v41 = vld [vmem:[%s4333_s29 + $0x70] sm:$0xff]  }
 0x4fc   : > { %v4137_v62 = vpop.f32.mrf.mxu1  ;;  %v3508_v3 = vunpack.c.l.bf16 %v4234_v41  ;;  %v3509_v63 = vunpack.c.h.bf16 %v4234_v41 }
 0x4fd   : > { %v3934_v16 = vpack.c.bf16 %v3531_v5, %v3530_v58  ;;  %v3529_v6 = vadd.f32 %v3497_v35, %v3421_v38  ;;  %v3442_v17 = vadd.f32 %v4137_v62, %v6192_v28 }
 0x4fe   : > { %v3433_v4 = vpop.f32.mrf.mxu1 }
 0x4ff   : > { %3974 = vst [vmem:[%s6205_s15 + $0x48] sm:$0xff] %v3934_v16   ;;  %v3929_v55 = vpack.c.bf16 %v3529_v6, %v3528_v18  ;;  %v3434_v36 = vadd.f32 %v6192_v28, %v3433_v4  ;;  %v3534_v15 = vadd.f32 %v3502_v56, %v3442_v17 }
 0x500   : > { %v4138_v39 = vpop.f32.mrf.mxu1 }
 0x501   : > { %3973 = vst [vmem:[%s6205_s15 + $0x40] sm:$0xff] %v3929_v55   ;;  %v3445_v48 = vadd.f32 %v4138_v39, %v6192_v28  ;;  %v3532_v60 = vadd.f32 %v3500_v49, %v3434_v36 }
 0x502   : > { %v3436_v8 = vpop.f32.mrf.mxu1 }
 0x503   : > { %v3535_v12 = vadd.f32 %v3503_v45, %v3445_v48  ;;  %v3437_v26 = vadd.f32 %v6192_v28, %v3436_v8 }
 0x504   : > { %v4141_v59 = vpop.f32.mrf.mxu1 }
 0x505   : > { %v3944_v46 = vpack.c.bf16 %v3535_v12, %v3534_v15  ;;  %v3533_v24 = vadd.f32 %v3501_v22, %v3437_v26  ;;  %v3458_v47 = vadd.f32 %v4141_v59, %v6192_v28 }
 0x506   : > { %v3449_v25 = vpop.f32.mrf.mxu1 }
 0x507   : > { %3976 = vst [vmem:[%s6205_s15 + $0x58] sm:$0xff] %v3944_v46   ;;  %v3939_v37 = vpack.c.bf16 %v3533_v24, %v3532_v60  ;;  %v3450_v21 = vadd.f32 %v6192_v28, %v3449_v25  ;;  %v3538_v54 = vadd.f32 %v3506_v0, %v3458_v47 }
 0x508   : > { %v4142_v61 = vpop.f32.mrf.mxu1 }
 0x509   : > { %3975 = vst [vmem:[%s6205_s15 + $0x50] sm:$0xff] %v3939_v37   ;;  %v3461_v53 = vadd.f32 %v4142_v61, %v6192_v28  ;;  %v3536_v34 = vadd.f32 %v3504_v50, %v3450_v21 }
 0x50a   : > { %v3452_v14 = vpop.f32.mrf.mxu1 }
 0x50b   : > { %v3539_v40 = vadd.f32 %v3507_v52, %v3461_v53  ;;  %v3453_v57 = vadd.f32 %v6192_v28, %v3452_v14 }
 0x50c   : > { %v4145_v27 = vpop.f32.mrf.mxu1 }
 0x50d   : > { %v3954_v23 = vpack.c.bf16 %v3539_v40, %v3538_v54  ;;  %v3537_v2 = vadd.f32 %v3505_v30, %v3453_v57  ;;  %v3474_v9 = vadd.f32 %v4145_v27, %v6192_v28 }
 0x50e   : > { %v3465_v32 = vpop.f32.mrf.mxu1 }
 0x50f   : > { %3978 = vst [vmem:[%s6205_s15 + $0x68] sm:$0xff] %v3954_v23   ;;  %v3949_v1 = vpack.c.bf16 %v3537_v2, %v3536_v34  ;;  %v3466_v33 = vadd.f32 %v6192_v28, %v3465_v32  ;;  %v3542_v44 = vadd.f32 %v3510_v51, %v3474_v9 }
 0x510   : > { %v4146_v42 = vpop.f32.mrf.mxu1 }
 0x511   : > { %3977 = vst [vmem:[%s6205_s15 + $0x60] sm:$0xff] %v3949_v1   ;;  %v3477_v10 = vadd.f32 %v4146_v42, %v6192_v28  ;;  %v3540_v58 = vadd.f32 %v3508_v3, %v3466_v33 }
 0x512   : > { %v3468_v19 = vpop.f32.mrf.mxu1 }
 0x513   : > { %v3543_v35 = vadd.f32 %v3511_v11, %v3477_v10  ;;  %v3469_v31 = vadd.f32 %v6192_v28, %v3468_v19 }
 0x515   : > { %v3964_v5 = vpack.c.bf16 %v3543_v35, %v3542_v44  ;;  %v3541_v38 = vadd.f32 %v3509_v63, %v3469_v31 }
 0x517   : > { %3980 = vst [vmem:[%s6205_s15 + $0x78] sm:$0xff] %v3964_v5   ;;  %v3959_v62 = vpack.c.bf16 %v3541_v38, %v3540_v58 }
 0x519   : > { %3979 = vst [vmem:[%s6205_s15 + $0x70] sm:$0xff] %v3959_v62  }
 0x51a PF: > { %s23_s19 = sadd.s32 1, %s4241_s19  }
 0x51b   : > { %p20_p4 = scmp.ge.s32.totalorder %s23_s19, 4  }
 0x51d   :  { %22 = sbr.rel (!%p20_p4) target bundleno = 3 (0x3), region = 96 }

</bundles_post_ra>
